<compile_context>
chip_gen: v5e
topology: v5e:2x2
jax: 0.10.0
libtpu: 0.0.40
codegen_flags: <defaults>
</compile_context>

<pallas_src>
import functools
import math

import jax
import jax.numpy as jnp
from jax import lax
from jax.experimental import pallas as pl
from jax.experimental.pallas import tpu as pltpu

_MM_DTYPE = jnp.bfloat16          # MXU operand dtype (accumulation stays f32)
_BN_EPS = 1e-5
_VMEM_LIMIT = 32 * 1024 * 1024


def _cparams(dims):
    return pltpu.CompilerParams(dimension_semantics=dims,
                                vmem_limit_bytes=_VMEM_LIMIT)


# ----------------------------------------------------------------------------
# GraphConv (add_self=False, normalize_embedding=True, dropout=0.0):
#   y = relu( L2norm( (adj @ x) @ W + b ) )
# fused with BatchNorm1d(num_nodes) statistic accumulation.
# ----------------------------------------------------------------------------
def _conv_relu_stats_kernel(adj_ref, x_ref, w_ref, b_ref,
                            y_ref, s1_ref, s2_ref, *, xw_first):
    adj = adj_ref[...].astype(_MM_DTYPE)                       # (N, N)
    x = x_ref[...].astype(_MM_DTYPE)                           # (N, Din)
    w = w_ref[...].astype(_MM_DTYPE)                           # (Din, Dout)
    if xw_first:                                               # cheaper if Dout < Din
        xw = jnp.dot(x, w, preferred_element_type=jnp.float32)
        y = jnp.dot(adj, xw.astype(_MM_DTYPE), preferred_element_type=jnp.float32)
    else:
        ax = jnp.dot(adj, x, preferred_element_type=jnp.float32)
        y = jnp.dot(ax.astype(_MM_DTYPE), w, preferred_element_type=jnp.float32)
    y = y + b_ref[...]                                         # bias (1, Dout)
    # F.normalize(y, p=2, dim=2):  y / max(||y||, 1e-12) == y * rsqrt(max(ss, 1e-24))
    ss = jnp.sum(y * y, axis=-1, keepdims=True)
    y = y * lax.rsqrt(jnp.maximum(ss, 1e-24))
    y = jnp.maximum(y, 0.0)                                    # ReLU (before BN)
    y_ref[...] = y

    # BatchNorm1d(N) stats: per-node sums over (batch, feature), node on sublanes.
    @pl.when(pl.program_id(0) == 0)
    def _():
        s1_ref[...] = jnp.zeros_like(s1_ref)
        s2_ref[...] = jnp.zeros_like(s2_ref)
    s1_ref[...] += jnp.sum(y, axis=-1, keepdims=True)          # (N, 1)
    s2_ref[...] += jnp.sum(y * y, axis=-1, keepdims=True)      # (N, 1)


def graph_conv_relu_stats(x, adj, w, b):
    B, N, Din = x.shape
    Dout = w.shape[1]
    kern = functools.partial(_conv_relu_stats_kernel, xw_first=Dout < Din)
    return pl.pallas_call(
        kern,
        out_shape=(jax.ShapeDtypeStruct((B, N, Dout), jnp.float32),
                   jax.ShapeDtypeStruct((N, 1), jnp.float32),
                   jax.ShapeDtypeStruct((N, 1), jnp.float32)),
        grid=(B,),
        in_specs=[
            pl.BlockSpec((None, N, N), lambda i: (i, 0, 0)),     # adj[b]
            pl.BlockSpec((None, N, Din), lambda i: (i, 0, 0)),   # x[b]
            pl.BlockSpec((Din, Dout), lambda i: (0, 0)),         # W (shared)
            pl.BlockSpec((1, Dout), lambda i: (0, 0)),           # bias (shared)
        ],
        out_specs=(
            pl.BlockSpec((None, N, Dout), lambda i: (i, 0, 0)),
            pl.BlockSpec((N, 1), lambda i: (0, 0)),              # stats accumulator
            pl.BlockSpec((N, 1), lambda i: (0, 0)),              # stats accumulator
        ),
        # "arbitrary": stats outputs are accumulated across the batch axis.
        compiler_params=_cparams(("arbitrary",)),
    )(adj, x, w, b)


# ----------------------------------------------------------------------------
# conv_last: y = L2norm((adj @ x) @ W + b), no ReLU / BN, fused max readout.
# ----------------------------------------------------------------------------
def _conv_max_kernel(adj_ref, x_ref, w_ref, b_ref, y_ref, max_ref, *, xw_first):
    adj = adj_ref[...].astype(_MM_DTYPE)
    x = x_ref[...].astype(_MM_DTYPE)
    w = w_ref[...].astype(_MM_DTYPE)
    if xw_first:
        xw = jnp.dot(x, w, preferred_element_type=jnp.float32)
        y = jnp.dot(adj, xw.astype(_MM_DTYPE), preferred_element_type=jnp.float32)
    else:
        ax = jnp.dot(adj, x, preferred_element_type=jnp.float32)
        y = jnp.dot(ax.astype(_MM_DTYPE), w, preferred_element_type=jnp.float32)
    y = y + b_ref[...]
    ss = jnp.sum(y * y, axis=-1, keepdims=True)
    y = y * lax.rsqrt(jnp.maximum(ss, 1e-24))
    y_ref[...] = y
    max_ref[...] = jnp.max(y, axis=0, keepdims=True)


def graph_conv_max(x, adj, w, b):
    B, N, Din = x.shape
    Dout = w.shape[1]
    kern = functools.partial(_conv_max_kernel, xw_first=Dout < Din)
    y, mx = pl.pallas_call(
        kern,
        out_shape=(jax.ShapeDtypeStruct((B, N, Dout), jnp.float32),
                   jax.ShapeDtypeStruct((B, 1, Dout), jnp.float32)),
        grid=(B,),
        in_specs=[
            pl.BlockSpec((None, N, N), lambda i: (i, 0, 0)),
            pl.BlockSpec((None, N, Din), lambda i: (i, 0, 0)),
            pl.BlockSpec((Din, Dout), lambda i: (0, 0)),
            pl.BlockSpec((1, Dout), lambda i: (0, 0)),
        ],
        out_specs=(
            pl.BlockSpec((None, N, Dout), lambda i: (i, 0, 0)),
            pl.BlockSpec((None, 1, Dout), lambda i: (i, 0, 0)),
        ),
        compiler_params=_cparams(("parallel",)),
    )(adj, x, w, b)
    return y, mx[:, 0, :]


# ----------------------------------------------------------------------------
# BatchNorm1d(num_nodes) apply (training mode, weight=1, bias=0, biased var,
# eps=1e-5) fused with the max-over-nodes readout.
# ----------------------------------------------------------------------------
def _bn_apply_max_kernel(y_ref, s1_ref, s2_ref, o_ref, max_ref, *, inv_count):
    y = y_ref[...]                                             # (N, H)
    mean = s1_ref[...] * inv_count                             # (N, 1)
    var = jnp.maximum(s2_ref[...] * inv_count - mean * mean, 0.0)
    inv = lax.rsqrt(var + _BN_EPS)
    out = (y - mean) * inv
    o_ref[...] = out
    max_ref[...] = jnp.max(out, axis=0, keepdims=True)


def bn_apply_max(y, s1, s2):
    B, N, H = y.shape
    kern = functools.partial(_bn_apply_max_kernel, inv_count=1.0 / float(B * H))
    out, mx = pl.pallas_call(
        kern,
        out_shape=(jax.ShapeDtypeStruct((B, N, H), jnp.float32),
                   jax.ShapeDtypeStruct((B, 1, H), jnp.float32)),
        grid=(B,),
        in_specs=[
            pl.BlockSpec((None, N, H), lambda i: (i, 0, 0)),
            pl.BlockSpec((N, 1), lambda i: (0, 0)),
            pl.BlockSpec((N, 1), lambda i: (0, 0)),
        ],
        out_specs=(
            pl.BlockSpec((None, N, H), lambda i: (i, 0, 0)),
            pl.BlockSpec((None, 1, H), lambda i: (i, 0, 0)),
        ),
        compiler_params=_cparams(("parallel",)),
    )(y, s1, s2)
    return out, mx[:, 0, :]


# ----------------------------------------------------------------------------
# Assignment head: per-node Linear + Softmax(dim=-1), fused.
# ----------------------------------------------------------------------------
def _linear_softmax_kernel(x_ref, w_ref, b_ref, o_ref):
    x = x_ref[...].astype(_MM_DTYPE)                           # (N, P)
    w = w_ref[...].astype(_MM_DTYPE)                           # (P, A)
    logits = jnp.dot(x, w, preferred_element_type=jnp.float32) + b_ref[...]
    m = jnp.max(logits, axis=-1, keepdims=True)
    e = jnp.exp(logits - m)
    o_ref[...] = e / jnp.sum(e, axis=-1, keepdims=True)


def linear_softmax(x, w, b):
    B, N, P = x.shape
    A = w.shape[1]
    return pl.pallas_call(
        _linear_softmax_kernel,
        out_shape=jax.ShapeDtypeStruct((B, N, A), jnp.float32),
        grid=(B,),
        in_specs=[
            pl.BlockSpec((None, N, P), lambda i: (i, 0, 0)),
            pl.BlockSpec((P, A), lambda i: (0, 0)),
            pl.BlockSpec((1, A), lambda i: (0, 0)),
        ],
        out_specs=pl.BlockSpec((None, N, A), lambda i: (i, 0, 0)),
        compiler_params=_cparams(("parallel",)),
    )(x, w, b)


# ----------------------------------------------------------------------------
# Soft pooling:  x_pool = S^T @ emb,   adj_pool = S^T @ adj @ S
# ----------------------------------------------------------------------------
def _pool_kernel(assign_ref, emb_ref, adj_ref, xo_ref, adjo_ref):
    s = assign_ref[...].astype(_MM_DTYPE)                      # (N, A)
    emb = emb_ref[...].astype(_MM_DTYPE)                       # (N, P)
    adj = adj_ref[...].astype(_MM_DTYPE)                       # (N, N)
    dn = (((0,), (0,)), ((), ()))                              # contract node dim
    xo_ref[...] = lax.dot_general(s, emb, dimension_numbers=dn,
                                  preferred_element_type=jnp.float32)   # (A, P)
    st_adj = lax.dot_general(s, adj, dimension_numbers=dn,
                             preferred_element_type=jnp.float32)        # (A, N)
    adjo_ref[...] = jnp.dot(st_adj.astype(_MM_DTYPE), s,
                            preferred_element_type=jnp.float32)         # (A, A)


def soft_pool(assign, emb, adj):
    B, N, A = assign.shape
    P = emb.shape[2]
    return pl.pallas_call(
        _pool_kernel,
        out_shape=(jax.ShapeDtypeStruct((B, A, P), jnp.float32),
                   jax.ShapeDtypeStruct((B, A, A), jnp.float32)),
        grid=(B,),
        in_specs=[
            pl.BlockSpec((None, N, A), lambda i: (i, 0, 0)),
            pl.BlockSpec((None, N, P), lambda i: (i, 0, 0)),
            pl.BlockSpec((None, N, N), lambda i: (i, 0, 0)),
        ],
        out_specs=(
            pl.BlockSpec((None, A, P), lambda i: (i, 0, 0)),
            pl.BlockSpec((None, A, A), lambda i: (i, 0, 0)),
        ),
        compiler_params=_cparams(("parallel",)),
    )(assign, emb, adj)


# ----------------------------------------------------------------------------
# gcn_forward (concat=True, bn=True, embedding_mask=None):
# returns (node embeddings [B, N, P], max-over-nodes readout [B, P]).
# max(concat(feats, dim=2), dim=1) == concat(per-layer maxes), so the readout
# is produced inside the per-layer kernels.
# ----------------------------------------------------------------------------
def gcn_forward(x, adj, lp):
    h, s1, s2 = graph_conv_relu_stats(x, adj, lp["first_w"], lp["first_b"])
    h, mx = bn_apply_max(h, s1, s2)
    feats, maxes = [h], [mx]
    for w, b in zip(lp["block_w"], lp["block_b"]):
        h, s1, s2 = graph_conv_relu_stats(h, adj, w, b)
        h, mx = bn_apply_max(h, s1, s2)
        feats.append(h)
        maxes.append(mx)
    h, mx = graph_conv_max(h, adj, lp["last_w"], lp["last_b"])
    feats.append(h)
    maxes.append(mx)
    return jnp.concatenate(feats, axis=2), jnp.concatenate(maxes, axis=1)


# ----------------------------------------------------------------------------
# SoftPoolingGcnEncoder.forward (num_aggs=1, gcn_concat=True, pool_concat=True,
# bn=True, dropout=0.0, batch_num_nodes=None).
# ----------------------------------------------------------------------------
def soft_pooling_gcn_forward(x, adj, params):
    emb, out = gcn_forward(x, adj, params["gcn"])
    out_all = [out]
    x_a, cur_adj, cur_emb = x, adj, emb
    for i in range(len(params["assign"])):                     # num_pooling
        ap = params["assign"][i]
        assign_feat, _ = gcn_forward(x_a, cur_adj, ap["gcn"])
        assign = linear_softmax(assign_feat, ap["pred_w"], ap["pred_b"])
        x_pool, adj_pool = soft_pool(assign, cur_emb, cur_adj)
        x_a, cur_adj = x_pool, adj_pool
        cur_emb, out = gcn_forward(x_pool, adj_pool, params["after_pool"][i])
        out_all.append(out)
    output = jnp.concatenate(out_all, axis=1)                  # pool_concat=True
    # Prediction MLP Linear(.,50)->ReLU->Linear(50,label): tiny graph-level
    # compute, kept in plain XLA per perf feedback.
    h = output
    for w, b in params["pred"][:-1]:
        h = jnp.maximum(jnp.dot(h, w) + b, 0.0)
    w, b = params["pred"][-1]
    return jnp.dot(h, w) + b

# TODO(synk): construct_mask(batch_num_nodes), dropout>0, and loss()/link-pred
# loss are not on the exercised forward path (batch_num_nodes=None, p=0.0).


# ----------------------------------------------------------------------------
# Deterministic parameter construction (xavier_uniform w/ relu gain, bias=0 for
# GraphConv; torch-default-style uniform for nn.Linear layers).
# ----------------------------------------------------------------------------
def _xavier_relu(key, fan_in, fan_out):
    gain = math.sqrt(2.0)
    bound = gain * math.sqrt(6.0 / (fan_in + fan_out))
    return jax.random.uniform(key, (fan_in, fan_out), jnp.float32, -bound, bound)


def _linear_default(key, fan_in, fan_out):
    kw, kb = jax.random.split(key)
    lim = 1.0 / math.sqrt(fan_in)
    w = jax.random.uniform(kw, (fan_in, fan_out), jnp.float32, -lim, lim)
    b = jax.random.uniform(kb, (1, fan_out), jnp.float32, -lim, lim)
    return w, b


def _gcn_layer_params(key, in_dim, hidden_dim, emb_dim, num_layers):
    keys = jax.random.split(key, num_layers)
    p = {"first_w": _xavier_relu(keys[0], in_dim, hidden_dim),
         "first_b": jnp.zeros((1, hidden_dim), jnp.float32),
         "block_w": [], "block_b": []}
    for i in range(num_layers - 2):
        p["block_w"].append(_xavier_relu(keys[1 + i], hidden_dim, hidden_dim))
        p["block_b"].append(jnp.zeros((1, hidden_dim), jnp.float32))
    p["last_w"] = _xavier_relu(keys[num_layers - 1], hidden_dim, emb_dim)
    p["last_b"] = jnp.zeros((1, emb_dim), jnp.float32)
    return p


def init_params(key, *, max_num_nodes, input_dim, hidden_dim, embedding_dim,
                label_dim, num_layers, assign_hidden_dim, assign_ratio=0.25,
                num_pooling=1, pred_hidden_dims=(50,)):
    pred_input_dim = hidden_dim * (num_layers - 1) + embedding_dim
    n_keys = 1 + 3 * num_pooling + len(pred_hidden_dims) + 1
    keys = iter(jax.random.split(key, n_keys))
    params = {"gcn": _gcn_layer_params(next(keys), input_dim, hidden_dim,
                                       embedding_dim, num_layers),
              "assign": [], "after_pool": []}
    assign_dim = int(max_num_nodes * assign_ratio)
    assign_input_dim = input_dim
    for i in range(num_pooling):
        a_in = assign_input_dim if i == 0 else pred_input_dim
        a_gcn = _gcn_layer_params(next(keys), a_in, assign_hidden_dim,
                                  assign_dim, num_layers)
        a_pred_in = assign_hidden_dim * (num_layers - 1) + assign_dim
        pw, pb = _linear_default(next(keys), a_pred_in, assign_dim)
        params["assign"].append({"gcn": a_gcn, "pred_w": pw, "pred_b": pb})
        params["after_pool"].append(
            _gcn_layer_params(next(keys), pred_input_dim, hidden_dim,
                              embedding_dim, num_layers))
        assign_dim = int(assign_dim * assign_ratio)
    in_dim = pred_input_dim * (num_pooling + 1)                # pool_concat=True
    pred = []
    for d in list(pred_hidden_dims) + [label_dim]:
        pred.append(_linear_default(next(keys), in_dim, d))
        in_dim = d
    params["pred"] = pred
    return params


if __name__ == "__main__":
    B, N = 2, 16
    input_dim, hidden_dim, embedding_dim, label_dim = 8, 32, 16, 6
    num_layers, assign_hidden_dim = 3, 32

    key = jax.random.PRNGKey(0)
    kx, kadj, kp = jax.random.split(key, 3)
    x = jax.random.normal(kx, (B, N, input_dim), jnp.float32)
    a = jax.random.uniform(kadj, (B, N, N), jnp.float32)
    adj = 0.5 * (a + jnp.swapaxes(a, 1, 2))                    # symmetric adjacency

    params = init_params(kp, max_num_nodes=N, input_dim=input_dim,
                         hidden_dim=hidden_dim, embedding_dim=embedding_dim,
                         label_dim=label_dim, num_layers=num_layers,
                         assign_hidden_dim=assign_hidden_dim,
                         assign_ratio=0.25, num_pooling=1,
                         pred_hidden_dims=(50,))

    ypred = jax.jit(soft_pooling_gcn_forward)(x, adj, params)
    ypred = jax.block_until_ready(ypred)

    assert ypred.shape == (B, label_dim), ypred.shape
    assert bool(jnp.all(jnp.isfinite(ypred)))
    print("KERNEL_OK")
</pallas_src>

<mosaic_0001>
module attributes {stable_mosaic.version = 11 : i64} {
  func.func @_bn_apply_max_kernel(%arg0: i32, %arg1: memref<1x16x32xf32, #tpu.memory_space<vmem>>, %arg2: memref<16x1xf32, #tpu.memory_space<vmem>>, %arg3: memref<16x1xf32, #tpu.memory_space<vmem>>, %arg4: memref<1x16x32xf32, #tpu.memory_space<vmem>>, %arg5: memref<1x1x32xf32, #tpu.memory_space<vmem>>) attributes {dimension_semantics = [#tpu.dimension_semantics<parallel>], iteration_bounds = array<i64: 2>, scalar_prefetch = 0 : i64, scratch_operands = 0 : i64, tpu.core_type = #tpu.core_type<tc>, window_params = [{transform_indices = @transform_0, window_bounds = array<i64: 1, 16, 32>}, {pipeline_mode = #tpu.pipeline_mode<synchronous>, transform_indices = @transform_1, window_bounds = array<i64: 16, 1>}, {pipeline_mode = #tpu.pipeline_mode<synchronous>, transform_indices = @transform_2, window_bounds = array<i64: 16, 1>}, {transform_indices = @transform_3, window_bounds = array<i64: 1, 16, 32>}, {transform_indices = @transform_4, window_bounds = array<i64: 1, 1, 32>}]} {
    %c0 = arith.constant 0 : index
    %c0_0 = arith.constant 0 : index
    %c0_1 = arith.constant 0 : index
    %0 = vector.load %arg1[%c0, %c0_0, %c0_1] : memref<1x16x32xf32, #tpu.memory_space<vmem>>, vector<1x16x32xf32>
    %1 = vector.shape_cast %0 : vector<1x16x32xf32> to vector<16x32xf32>
    %c0_2 = arith.constant 0 : index
    %c0_3 = arith.constant 0 : index
    %2 = vector.load %arg2[%c0_2, %c0_3] : memref<16x1xf32, #tpu.memory_space<vmem>>, vector<16x1xf32>
    %cst = arith.constant 1.562500e-02 : f32
    %3 = vector.broadcast %cst : f32 to vector<16x1xf32>
    %4 = arith.mulf %2, %3 : vector<16x1xf32>
    %c0_4 = arith.constant 0 : index
    %c0_5 = arith.constant 0 : index
    %5 = vector.load %arg3[%c0_4, %c0_5] : memref<16x1xf32, #tpu.memory_space<vmem>>, vector<16x1xf32>
    %cst_6 = arith.constant 1.562500e-02 : f32
    %6 = vector.broadcast %cst_6 : f32 to vector<16x1xf32>
    %7 = arith.mulf %5, %6 : vector<16x1xf32>
    %8 = arith.mulf %4, %4 : vector<16x1xf32>
    %9 = arith.subf %7, %8 : vector<16x1xf32>
    %cst_7 = arith.constant 0.000000e+00 : f32
    %10 = vector.broadcast %cst_7 : f32 to vector<16x1xf32>
    %11 = arith.maximumf %9, %10 : vector<16x1xf32>
    %cst_8 = arith.constant 9.99999974E-6 : f32
    %12 = vector.broadcast %cst_8 : f32 to vector<16x1xf32>
    %13 = arith.addf %11, %12 : vector<16x1xf32>
    %14 = math.rsqrt %13 : vector<16x1xf32>
    %15 = vector.broadcast %4 : vector<16x1xf32> to vector<16x32xf32>
    %16 = arith.subf %1, %15 : vector<16x32xf32>
    %17 = vector.broadcast %14 : vector<16x1xf32> to vector<16x32xf32>
    %18 = arith.mulf %16, %17 : vector<16x32xf32>
    %c0_9 = arith.constant 0 : index
    %c0_10 = arith.constant 0 : index
    %c0_11 = arith.constant 0 : index
    %19 = vector.load %arg4[%c0_9, %c0_10, %c0_11] : memref<1x16x32xf32, #tpu.memory_space<vmem>>, vector<1x16x32xf32>
    %20 = vector.shape_cast %19 : vector<1x16x32xf32> to vector<16x32xf32>
    %21 = vector.shape_cast %18 : vector<16x32xf32> to vector<1x16x32xf32>
    tpu.vector_store %arg4[%c0_9, %c0_10, %c0_11], %21 {strides = array<i32>} : memref<1x16x32xf32, #tpu.memory_space<vmem>>, vector<1x16x32xf32>,
    %cst_12 = arith.constant dense<0xFF800000> : vector<32xf32>
    %22 = vector.multi_reduction <maximumf>, %18, %cst_12 [0] : vector<16x32xf32> to vector<32xf32>
    %23 = vector.shape_cast %22 : vector<32xf32> to vector<1x32xf32>
    %c0_13 = arith.constant 0 : index
    %c0_14 = arith.constant 0 : index
    %c0_15 = arith.constant 0 : index
    %24 = vector.load %arg5[%c0_13, %c0_14, %c0_15] : memref<1x1x32xf32, #tpu.memory_space<vmem>>, vector<1x1x32xf32>
    %25 = vector.shape_cast %24 : vector<1x1x32xf32> to vector<1x32xf32>
    %26 = vector.shape_cast %23 : vector<1x32xf32> to vector<1x1x32xf32>
    tpu.vector_store %arg5[%c0_13, %c0_14, %c0_15], %26 {strides = array<i32>} : memref<1x1x32xf32, #tpu.memory_space<vmem>>, vector<1x1x32xf32>,
    return
  }
  func.func @transform_0(%arg0: i32) -> (i32, i32, i32) {
    %c0_i32 = arith.constant 0 : i32
    %c0_i32_0 = arith.constant 0 : i32
    %c0_i32_1 = arith.constant 0 : i32
    return %arg0, %c0_i32, %c0_i32_0 : i32, i32, i32
  }
  func.func @transform_1(%arg0: i32) -> (i32, i32) {
    %c0_i32 = arith.constant 0 : i32
    %c0_i32_0 = arith.constant 0 : i32
    %c0_i32_1 = arith.constant 0 : i32
    return %c0_i32, %c0_i32_0 : i32, i32
  }
  func.func @transform_2(%arg0: i32) -> (i32, i32) {
    %c0_i32 = arith.constant 0 : i32
    %c0_i32_0 = arith.constant 0 : i32
    %c0_i32_1 = arith.constant 0 : i32
    return %c0_i32, %c0_i32_0 : i32, i32
  }
  func.func @transform_3(%arg0: i32) -> (i32, i32, i32) {
    %c0_i32 = arith.constant 0 : i32
    %c0_i32_0 = arith.constant 0 : i32
    %c0_i32_1 = arith.constant 0 : i32
    return %arg0, %c0_i32, %c0_i32_0 : i32, i32, i32
  }
  func.func @transform_4(%arg0: i32) -> (i32, i32, i32) {
    %c0_i32 = arith.constant 0 : i32
    %c0_i32_0 = arith.constant 0 : i32
    %c0_i32_1 = arith.constant 0 : i32
    return %arg0, %c0_i32, %c0_i32_0 : i32, i32, i32
  }
}

module attributes {stable_mosaic.version = 11 : i64} {
  func.func @_conv_relu_stats_kernel(%arg0: i32, %arg1: memref<1x16x16xf32, #tpu.memory_space<vmem>>, %arg2: memref<1x16x32xf32, #tpu.memory_space<vmem>>, %arg3: memref<32x32xf32, #tpu.memory_space<vmem>>, %arg4: memref<1x32xf32, #tpu.memory_space<vmem>>, %arg5: memref<1x16x32xf32, #tpu.memory_space<vmem>>, %arg6: memref<16x1xf32, #tpu.memory_space<vmem>>, %arg7: memref<16x1xf32, #tpu.memory_space<vmem>>) attributes {dimension_semantics = [#tpu.dimension_semantics<arbitrary>], iteration_bounds = array<i64: 2>, scalar_prefetch = 0 : i64, scratch_operands = 0 : i64, tpu.core_type = #tpu.core_type<tc>, window_params = [{transform_indices = @transform_0, window_bounds = array<i64: 1, 16, 16>}, {transform_indices = @transform_1, window_bounds = array<i64: 1, 16, 32>}, {pipeline_mode = #tpu.pipeline_mode<synchronous>, transform_indices = @transform_2, window_bounds = array<i64: 32, 32>}, {pipeline_mode = #tpu.pipeline_mode<synchronous>, transform_indices = @transform_3, window_bounds = array<i64: 1, 32>}, {transform_indices = @transform_4, window_bounds = array<i64: 1, 16, 32>}, {pipeline_mode = #tpu.pipeline_mode<synchronous>, transform_indices = @transform_5, window_bounds = array<i64: 16, 1>}, {pipeline_mode = #tpu.pipeline_mode<synchronous>, transform_indices = @transform_6, window_bounds = array<i64: 16, 1>}]} {
    %c0 = arith.constant 0 : index
    %c0_0 = arith.constant 0 : index
    %c0_1 = arith.constant 0 : index
    %0 = vector.load %arg1[%c0, %c0_0, %c0_1] : memref<1x16x16xf32, #tpu.memory_space<vmem>>, vector<1x16x16xf32>
    %1 = vector.shape_cast %0 : vector<1x16x16xf32> to vector<16x16xf32>
    %2 = arith.truncf %1 : vector<16x16xf32> to vector<16x16xbf16>
    %c0_2 = arith.constant 0 : index
    %c0_3 = arith.constant 0 : index
    %c0_4 = arith.constant 0 : index
    %3 = vector.load %arg2[%c0_2, %c0_3, %c0_4] : memref<1x16x32xf32, #tpu.memory_space<vmem>>, vector<1x16x32xf32>
    %4 = vector.shape_cast %3 : vector<1x16x32xf32> to vector<16x32xf32>
    %5 = arith.truncf %4 : vector<16x32xf32> to vector<16x32xbf16>
    %c0_5 = arith.constant 0 : index
    %c0_6 = arith.constant 0 : index
    %6 = vector.load %arg3[%c0_5, %c0_6] : memref<32x32xf32, #tpu.memory_space<vmem>>, vector<32x32xf32>
    %7 = arith.truncf %6 : vector<32x32xf32> to vector<32x32xbf16>
    %cst = arith.constant dense<0.000000e+00> : vector<16x32xf32>
    %8 = tpu.matmul %2, %5, %cst {dimension_numbers = #tpu.dot_dimension_numbers<[1], [0], [0], [1], [0, 0, 1, 1], [], []>} : vector<16x16xbf16>, vector<16x32xbf16>, vector<16x32xf32> -> vector<16x32xf32>
    %9 = arith.truncf %8 : vector<16x32xf32> to vector<16x32xbf16>
    %cst_7 = arith.constant dense<0.000000e+00> : vector<16x32xf32>
    %10 = tpu.matmul %9, %7, %cst_7 {dimension_numbers = #tpu.dot_dimension_numbers<[1], [0], [0], [1], [0, 0, 1, 1], [], []>} : vector<16x32xbf16>, vector<32x32xbf16>, vector<16x32xf32> -> vector<16x32xf32>
    %c0_8 = arith.constant 0 : index
    %c0_9 = arith.constant 0 : index
    %11 = vector.load %arg4[%c0_8, %c0_9] : memref<1x32xf32, #tpu.memory_space<vmem>>, vector<1x32xf32>
    %12 = vector.broadcast %11 : vector<1x32xf32> to vector<16x32xf32>
    %13 = arith.addf %10, %12 : vector<16x32xf32>
    %14 = arith.mulf %13, %13 : vector<16x32xf32>
    %cst_10 = arith.constant dense<0.000000e+00> : vector<16xf32>
    %15 = vector.multi_reduction <add>, %14, %cst_10 [1] : vector<16x32xf32> to vector<16xf32>
    %16 = vector.shape_cast %15 : vector<16xf32> to vector<16x1xf32>
    %cst_11 = arith.constant 1.000000e-24 : f32
    %17 = vector.broadcast %cst_11 : f32 to vector<16x1xf32>
    %18 = arith.maximumf %16, %17 : vector<16x1xf32>
    %19 = math.rsqrt %18 : vector<16x1xf32>
    %20 = vector.broadcast %19 : vector<16x1xf32> to vector<16x32xf32>
    %21 = arith.mulf %13, %20 : vector<16x32xf32>
    %cst_12 = arith.constant 0.000000e+00 : f32
    %22 = vector.broadcast %cst_12 : f32 to vector<16x32xf32>
    %23 = arith.maximumf %21, %22 : vector<16x32xf32>
    %c0_13 = arith.constant 0 : index
    %c0_14 = arith.constant 0 : index
    %c0_15 = arith.constant 0 : index
    %24 = vector.load %arg5[%c0_13, %c0_14, %c0_15] : memref<1x16x32xf32, #tpu.memory_space<vmem>>, vector<1x16x32xf32>
    %25 = vector.shape_cast %24 : vector<1x16x32xf32> to vector<16x32xf32>
    %26 = vector.shape_cast %23 : vector<16x32xf32> to vector<1x16x32xf32>
    tpu.vector_store %arg5[%c0_13, %c0_14, %c0_15], %26 {strides = array<i32>} : memref<1x16x32xf32, #tpu.memory_space<vmem>>, vector<1x16x32xf32>,
    %c0_i32 = arith.constant 0 : i32
    %27 = arith.cmpi eq, %arg0, %c0_i32 : i32
    %28 = arith.extui %27 : i1 to i32
    %c0_i32_16 = arith.constant 0 : i32
    %29 = arith.cmpi ne, %28, %c0_i32_16 : i32
    scf.if %29 {
      %cst_27 = arith.constant 0.000000e+00 : f32
      %41 = vector.broadcast %cst_27 : f32 to vector<16x1xf32>
      %c0_28 = arith.constant 0 : index
      %c0_29 = arith.constant 0 : index
      %42 = vector.load %arg6[%c0_28, %c0_29] : memref<16x1xf32, #tpu.memory_space<vmem>>, vector<16x1xf32>
      tpu.vector_store %arg6[%c0_28, %c0_29], %41 {strides = array<i32>} : memref<16x1xf32, #tpu.memory_space<vmem>>, vector<16x1xf32>,
      %cst_30 = arith.constant 0.000000e+00 : f32
      %43 = vector.broadcast %cst_30 : f32 to vector<16x1xf32>
      %c0_31 = arith.constant 0 : index
      %c0_32 = arith.constant 0 : index
      %44 = vector.load %arg7[%c0_31, %c0_32] : memref<16x1xf32, #tpu.memory_space<vmem>>, vector<16x1xf32>
      tpu.vector_store %arg7[%c0_31, %c0_32], %43 {strides = array<i32>} : memref<16x1xf32, #tpu.memory_space<vmem>>, vector<16x1xf32>,
    } else {
    }
    %c0_17 = arith.constant 0 : index
    %c0_18 = arith.constant 0 : index
    %30 = vector.load %arg6[%c0_17, %c0_18] : memref<16x1xf32, #tpu.memory_space<vmem>>, vector<16x1xf32>
    %cst_19 = arith.constant dense<0.000000e+00> : vector<16xf32>
    %31 = vector.multi_reduction <add>, %23, %cst_19 [1] : vector<16x32xf32> to vector<16xf32>
    %32 = vector.shape_cast %31 : vector<16xf32> to vector<16x1xf32>
    %33 = arith.addf %30, %32 : vector<16x1xf32>
    %c0_20 = arith.constant 0 : index
    %c0_21 = arith.constant 0 : index
    %34 = vector.load %arg6[%c0_20, %c0_21] : memref<16x1xf32, #tpu.memory_space<vmem>>, vector<16x1xf32>
    tpu.vector_store %arg6[%c0_20, %c0_21], %33 {strides = array<i32>} : memref<16x1xf32, #tpu.memory_space<vmem>>, vector<16x1xf32>,
    %c0_22 = arith.constant 0 : index
    %c0_23 = arith.constant 0 : index
    %35 = vector.load %arg7[%c0_22, %c0_23] : memref<16x1xf32, #tpu.memory_space<vmem>>, vector<16x1xf32>
    %36 = arith.mulf %23, %23 : vector<16x32xf32>
    %cst_24 = arith.constant dense<0.000000e+00> : vector<16xf32>
    %37 = vector.multi_reduction <add>, %36, %cst_24 [1] : vector<16x32xf32> to vector<16xf32>
    %38 = vector.shape_cast %37 : vector<16xf32> to vector<16x1xf32>
    %39 = arith.addf %35, %38 : vector<16x1xf32>
    %c0_25 = arith.constant 0 : index
    %c0_26 = arith.constant 0 : index
    %40 = vector.load %arg7[%c0_25, %c0_26] : memref<16x1xf32, #tpu.memory_space<vmem>>, vector<16x1xf32>
    tpu.vector_store %arg7[%c0_25, %c0_26], %39 {strides = array<i32>} : memref<16x1xf32, #tpu.memory_space<vmem>>, vector<16x1xf32>,
    return
  }
  func.func @transform_0(%arg0: i32) -> (i32, i32, i32) {
    %c0_i32 = arith.constant 0 : i32
    %c0_i32_0 = arith.constant 0 : i32
    %c0_i32_1 = arith.constant 0 : i32
    return %arg0, %c0_i32, %c0_i32_0 : i32, i32, i32
  }
  func.func @transform_1(%arg0: i32) -> (i32, i32, i32) {
    %c0_i32 = arith.constant 0 : i32
    %c0_i32_0 = arith.constant 0 : i32
    %c0_i32_1 = arith.constant 0 : i32
    return %arg0, %c0_i32, %c0_i32_0 : i32, i32, i32
  }
  func.func @transform_2(%arg0: i32) -> (i32, i32) {
    %c0_i32 = arith.constant 0 : i32
    %c0_i32_0 = arith.constant 0 : i32
    %c0_i32_1 = arith.constant 0 : i32
    return %c0_i32, %c0_i32_0 : i32, i32
  }
  func.func @transform_3(%arg0: i32) -> (i32, i32) {
    %c0_i32 = arith.constant 0 : i32
    %c0_i32_0 = arith.constant 0 : i32
    %c0_i32_1 = arith.constant 0 : i32
    return %c0_i32, %c0_i32_0 : i32, i32
  }
  func.func @transform_4(%arg0: i32) -> (i32, i32, i32) {
    %c0_i32 = arith.constant 0 : i32
    %c0_i32_0 = arith.constant 0 : i32
    %c0_i32_1 = arith.constant 0 : i32
    return %arg0, %c0_i32, %c0_i32_0 : i32, i32, i32
  }
  func.func @transform_5(%arg0: i32) -> (i32, i32) {
    %c0_i32 = arith.constant 0 : i32
    %c0_i32_0 = arith.constant 0 : i32
    %c0_i32_1 = arith.constant 0 : i32
    return %c0_i32, %c0_i32_0 : i32, i32
  }
  func.func @transform_6(%arg0: i32) -> (i32, i32) {
    %c0_i32 = arith.constant 0 : i32
    %c0_i32_0 = arith.constant 0 : i32
    %c0_i32_1 = arith.constant 0 : i32
    return %c0_i32, %c0_i32_0 : i32, i32
  }
}

module attributes {stable_mosaic.version = 11 : i64} {
  func.func @_conv_relu_stats_kernel(%arg0: i32, %arg1: memref<1x16x16xf32, #tpu.memory_space<vmem>>, %arg2: memref<1x16x8xf32, #tpu.memory_space<vmem>>, %arg3: memref<8x32xf32, #tpu.memory_space<vmem>>, %arg4: memref<1x32xf32, #tpu.memory_space<vmem>>, %arg5: memref<1x16x32xf32, #tpu.memory_space<vmem>>, %arg6: memref<16x1xf32, #tpu.memory_space<vmem>>, %arg7: memref<16x1xf32, #tpu.memory_space<vmem>>) attributes {dimension_semantics = [#tpu.dimension_semantics<arbitrary>], iteration_bounds = array<i64: 2>, scalar_prefetch = 0 : i64, scratch_operands = 0 : i64, tpu.core_type = #tpu.core_type<tc>, window_params = [{transform_indices = @transform_0, window_bounds = array<i64: 1, 16, 16>}, {transform_indices = @transform_1, window_bounds = array<i64: 1, 16, 8>}, {pipeline_mode = #tpu.pipeline_mode<synchronous>, transform_indices = @transform_2, window_bounds = array<i64: 8, 32>}, {pipeline_mode = #tpu.pipeline_mode<synchronous>, transform_indices = @transform_3, window_bounds = array<i64: 1, 32>}, {transform_indices = @transform_4, window_bounds = array<i64: 1, 16, 32>}, {pipeline_mode = #tpu.pipeline_mode<synchronous>, transform_indices = @transform_5, window_bounds = array<i64: 16, 1>}, {pipeline_mode = #tpu.pipeline_mode<synchronous>, transform_indices = @transform_6, window_bounds = array<i64: 16, 1>}]} {
    %c0 = arith.constant 0 : index
    %c0_0 = arith.constant 0 : index
    %c0_1 = arith.constant 0 : index
    %0 = vector.load %arg1[%c0, %c0_0, %c0_1] : memref<1x16x16xf32, #tpu.memory_space<vmem>>, vector<1x16x16xf32>
    %1 = vector.shape_cast %0 : vector<1x16x16xf32> to vector<16x16xf32>
    %2 = arith.truncf %1 : vector<16x16xf32> to vector<16x16xbf16>
    %c0_2 = arith.constant 0 : index
    %c0_3 = arith.constant 0 : index
    %c0_4 = arith.constant 0 : index
    %3 = vector.load %arg2[%c0_2, %c0_3, %c0_4] : memref<1x16x8xf32, #tpu.memory_space<vmem>>, vector<1x16x8xf32>
    %4 = vector.shape_cast %3 : vector<1x16x8xf32> to vector<16x8xf32>
    %5 = arith.truncf %4 : vector<16x8xf32> to vector<16x8xbf16>
    %c0_5 = arith.constant 0 : index
    %c0_6 = arith.constant 0 : index
    %6 = vector.load %arg3[%c0_5, %c0_6] : memref<8x32xf32, #tpu.memory_space<vmem>>, vector<8x32xf32>
    %7 = arith.truncf %6 : vector<8x32xf32> to vector<8x32xbf16>
    %cst = arith.constant dense<0.000000e+00> : vector<16x8xf32>
    %8 = tpu.matmul %2, %5, %cst {dimension_numbers = #tpu.dot_dimension_numbers<[1], [0], [0], [1], [0, 0, 1, 1], [], []>} : vector<16x16xbf16>, vector<16x8xbf16>, vector<16x8xf32> -> vector<16x8xf32>
    %9 = arith.truncf %8 : vector<16x8xf32> to vector<16x8xbf16>
    %cst_7 = arith.constant dense<0.000000e+00> : vector<16x32xf32>
    %10 = tpu.matmul %9, %7, %cst_7 {dimension_numbers = #tpu.dot_dimension_numbers<[1], [0], [0], [1], [0, 0, 1, 1], [], []>} : vector<16x8xbf16>, vector<8x32xbf16>, vector<16x32xf32> -> vector<16x32xf32>
    %c0_8 = arith.constant 0 : index
    %c0_9 = arith.constant 0 : index
    %11 = vector.load %arg4[%c0_8, %c0_9] : memref<1x32xf32, #tpu.memory_space<vmem>>, vector<1x32xf32>
    %12 = vector.broadcast %11 : vector<1x32xf32> to vector<16x32xf32>
    %13 = arith.addf %10, %12 : vector<16x32xf32>
    %14 = arith.mulf %13, %13 : vector<16x32xf32>
    %cst_10 = arith.constant dense<0.000000e+00> : vector<16xf32>
    %15 = vector.multi_reduction <add>, %14, %cst_10 [1] : vector<16x32xf32> to vector<16xf32>
    %16 = vector.shape_cast %15 : vector<16xf32> to vector<16x1xf32>
    %cst_11 = arith.constant 1.000000e-24 : f32
    %17 = vector.broadcast %cst_11 : f32 to vector<16x1xf32>
    %18 = arith.maximumf %16, %17 : vector<16x1xf32>
    %19 = math.rsqrt %18 : vector<16x1xf32>
    %20 = vector.broadcast %19 : vector<16x1xf32> to vector<16x32xf32>
    %21 = arith.mulf %13, %20 : vector<16x32xf32>
    %cst_12 = arith.constant 0.000000e+00 : f32
    %22 = vector.broadcast %cst_12 : f32 to vector<16x32xf32>
    %23 = arith.maximumf %21, %22 : vector<16x32xf32>
    %c0_13 = arith.constant 0 : index
    %c0_14 = arith.constant 0 : index
    %c0_15 = arith.constant 0 : index
    %24 = vector.load %arg5[%c0_13, %c0_14, %c0_15] : memref<1x16x32xf32, #tpu.memory_space<vmem>>, vector<1x16x32xf32>
    %25 = vector.shape_cast %24 : vector<1x16x32xf32> to vector<16x32xf32>
    %26 = vector.shape_cast %23 : vector<16x32xf32> to vector<1x16x32xf32>
    tpu.vector_store %arg5[%c0_13, %c0_14, %c0_15], %26 {strides = array<i32>} : memref<1x16x32xf32, #tpu.memory_space<vmem>>, vector<1x16x32xf32>,
    %c0_i32 = arith.constant 0 : i32
    %27 = arith.cmpi eq, %arg0, %c0_i32 : i32
    %28 = arith.extui %27 : i1 to i32
    %c0_i32_16 = arith.constant 0 : i32
    %29 = arith.cmpi ne, %28, %c0_i32_16 : i32
    scf.if %29 {
      %cst_27 = arith.constant 0.000000e+00 : f32
      %41 = vector.broadcast %cst_27 : f32 to vector<16x1xf32>
      %c0_28 = arith.constant 0 : index
      %c0_29 = arith.constant 0 : index
      %42 = vector.load %arg6[%c0_28, %c0_29] : memref<16x1xf32, #tpu.memory_space<vmem>>, vector<16x1xf32>
      tpu.vector_store %arg6[%c0_28, %c0_29], %41 {strides = array<i32>} : memref<16x1xf32, #tpu.memory_space<vmem>>, vector<16x1xf32>,
      %cst_30 = arith.constant 0.000000e+00 : f32
      %43 = vector.broadcast %cst_30 : f32 to vector<16x1xf32>
      %c0_31 = arith.constant 0 : index
      %c0_32 = arith.constant 0 : index
      %44 = vector.load %arg7[%c0_31, %c0_32] : memref<16x1xf32, #tpu.memory_space<vmem>>, vector<16x1xf32>
      tpu.vector_store %arg7[%c0_31, %c0_32], %43 {strides = array<i32>} : memref<16x1xf32, #tpu.memory_space<vmem>>, vector<16x1xf32>,
    } else {
    }
    %c0_17 = arith.constant 0 : index
    %c0_18 = arith.constant 0 : index
    %30 = vector.load %arg6[%c0_17, %c0_18] : memref<16x1xf32, #tpu.memory_space<vmem>>, vector<16x1xf32>
    %cst_19 = arith.constant dense<0.000000e+00> : vector<16xf32>
    %31 = vector.multi_reduction <add>, %23, %cst_19 [1] : vector<16x32xf32> to vector<16xf32>
    %32 = vector.shape_cast %31 : vector<16xf32> to vector<16x1xf32>
    %33 = arith.addf %30, %32 : vector<16x1xf32>
    %c0_20 = arith.constant 0 : index
    %c0_21 = arith.constant 0 : index
    %34 = vector.load %arg6[%c0_20, %c0_21] : memref<16x1xf32, #tpu.memory_space<vmem>>, vector<16x1xf32>
    tpu.vector_store %arg6[%c0_20, %c0_21], %33 {strides = array<i32>} : memref<16x1xf32, #tpu.memory_space<vmem>>, vector<16x1xf32>,
    %c0_22 = arith.constant 0 : index
    %c0_23 = arith.constant 0 : index
    %35 = vector.load %arg7[%c0_22, %c0_23] : memref<16x1xf32, #tpu.memory_space<vmem>>, vector<16x1xf32>
    %36 = arith.mulf %23, %23 : vector<16x32xf32>
    %cst_24 = arith.constant dense<0.000000e+00> : vector<16xf32>
    %37 = vector.multi_reduction <add>, %36, %cst_24 [1] : vector<16x32xf32> to vector<16xf32>
    %38 = vector.shape_cast %37 : vector<16xf32> to vector<16x1xf32>
    %39 = arith.addf %35, %38 : vector<16x1xf32>
    %c0_25 = arith.constant 0 : index
    %c0_26 = arith.constant 0 : index
    %40 = vector.load %arg7[%c0_25, %c0_26] : memref<16x1xf32, #tpu.memory_space<vmem>>, vector<16x1xf32>
    tpu.vector_store %arg7[%c0_25, %c0_26], %39 {strides = array<i32>} : memref<16x1xf32, #tpu.memory_space<vmem>>, vector<16x1xf32>,
    return
  }
  func.func @transform_0(%arg0: i32) -> (i32, i32, i32) {
    %c0_i32 = arith.constant 0 : i32
    %c0_i32_0 = arith.constant 0 : i32
    %c0_i32_1 = arith.constant 0 : i32
    return %arg0, %c0_i32, %c0_i32_0 : i32, i32, i32
  }
  func.func @transform_1(%arg0: i32) -> (i32, i32, i32) {
    %c0_i32 = arith.constant 0 : i32
    %c0_i32_0 = arith.constant 0 : i32
    %c0_i32_1 = arith.constant 0 : i32
    return %arg0, %c0_i32, %c0_i32_0 : i32, i32, i32
  }
  func.func @transform_2(%arg0: i32) -> (i32, i32) {
    %c0_i32 = arith.constant 0 : i32
    %c0_i32_0 = arith.constant 0 : i32
    %c0_i32_1 = arith.constant 0 : i32
    return %c0_i32, %c0_i32_0 : i32, i32
  }
  func.func @transform_3(%arg0: i32) -> (i32, i32) {
    %c0_i32 = arith.constant 0 : i32
    %c0_i32_0 = arith.constant 0 : i32
    %c0_i32_1 = arith.constant 0 : i32
    return %c0_i32, %c0_i32_0 : i32, i32
  }
  func.func @transform_4(%arg0: i32) -> (i32, i32, i32) {
    %c0_i32 = arith.constant 0 : i32
    %c0_i32_0 = arith.constant 0 : i32
    %c0_i32_1 = arith.constant 0 : i32
    return %arg0, %c0_i32, %c0_i32_0 : i32, i32, i32
  }
  func.func @transform_5(%arg0: i32) -> (i32, i32) {
    %c0_i32 = arith.constant 0 : i32
    %c0_i32_0 = arith.constant 0 : i32
    %c0_i32_1 = arith.constant 0 : i32
    return %c0_i32, %c0_i32_0 : i32, i32
  }
  func.func @transform_6(%arg0: i32) -> (i32, i32) {
    %c0_i32 = arith.constant 0 : i32
    %c0_i32_0 = arith.constant 0 : i32
    %c0_i32_1 = arith.constant 0 : i32
    return %c0_i32, %c0_i32_0 : i32, i32
  }
}

module attributes {stable_mosaic.version = 11 : i64} {
  func.func @_conv_max_kernel(%arg0: i32, %arg1: memref<1x16x16xf32, #tpu.memory_space<vmem>>, %arg2: memref<1x16x32xf32, #tpu.memory_space<vmem>>, %arg3: memref<32x16xf32, #tpu.memory_space<vmem>>, %arg4: memref<1x16xf32, #tpu.memory_space<vmem>>, %arg5: memref<1x16x16xf32, #tpu.memory_space<vmem>>, %arg6: memref<1x1x16xf32, #tpu.memory_space<vmem>>) attributes {dimension_semantics = [#tpu.dimension_semantics<parallel>], iteration_bounds = array<i64: 2>, scalar_prefetch = 0 : i64, scratch_operands = 0 : i64, tpu.core_type = #tpu.core_type<tc>, window_params = [{transform_indices = @transform_0, window_bounds = array<i64: 1, 16, 16>}, {transform_indices = @transform_1, window_bounds = array<i64: 1, 16, 32>}, {pipeline_mode = #tpu.pipeline_mode<synchronous>, transform_indices = @transform_2, window_bounds = array<i64: 32, 16>}, {pipeline_mode = #tpu.pipeline_mode<synchronous>, transform_indices = @transform_3, window_bounds = array<i64: 1, 16>}, {transform_indices = @transform_4, window_bounds = array<i64: 1, 16, 16>}, {transform_indices = @transform_5, window_bounds = array<i64: 1, 1, 16>}]} {
    %c0 = arith.constant 0 : index
    %c0_0 = arith.constant 0 : index
    %c0_1 = arith.constant 0 : index
    %0 = vector.load %arg1[%c0, %c0_0, %c0_1] : memref<1x16x16xf32, #tpu.memory_space<vmem>>, vector<1x16x16xf32>
    %1 = vector.shape_cast %0 : vector<1x16x16xf32> to vector<16x16xf32>
    %2 = arith.truncf %1 : vector<16x16xf32> to vector<16x16xbf16>
    %c0_2 = arith.constant 0 : index
    %c0_3 = arith.constant 0 : index
    %c0_4 = arith.constant 0 : index
    %3 = vector.load %arg2[%c0_2, %c0_3, %c0_4] : memref<1x16x32xf32, #tpu.memory_space<vmem>>, vector<1x16x32xf32>
    %4 = vector.shape_cast %3 : vector<1x16x32xf32> to vector<16x32xf32>
    %5 = arith.truncf %4 : vector<16x32xf32> to vector<16x32xbf16>
    %c0_5 = arith.constant 0 : index
    %c0_6 = arith.constant 0 : index
    %6 = vector.load %arg3[%c0_5, %c0_6] : memref<32x16xf32, #tpu.memory_space<vmem>>, vector<32x16xf32>
    %7 = arith.truncf %6 : vector<32x16xf32> to vector<32x16xbf16>
    %cst = arith.constant dense<0.000000e+00> : vector<16x16xf32>
    %8 = tpu.matmul %5, %7, %cst {dimension_numbers = #tpu.dot_dimension_numbers<[1], [0], [0], [1], [0, 0, 1, 1], [], []>} : vector<16x32xbf16>, vector<32x16xbf16>, vector<16x16xf32> -> vector<16x16xf32>
    %9 = arith.truncf %8 : vector<16x16xf32> to vector<16x16xbf16>
    %cst_7 = arith.constant dense<0.000000e+00> : vector<16x16xf32>
    %10 = tpu.matmul %2, %9, %cst_7 {dimension_numbers = #tpu.dot_dimension_numbers<[1], [0], [0], [1], [0, 0, 1, 1], [], []>} : vector<16x16xbf16>, vector<16x16xbf16>, vector<16x16xf32> -> vector<16x16xf32>
    %c0_8 = arith.constant 0 : index
    %c0_9 = arith.constant 0 : index
    %11 = vector.load %arg4[%c0_8, %c0_9] : memref<1x16xf32, #tpu.memory_space<vmem>>, vector<1x16xf32>
    %12 = vector.broadcast %11 : vector<1x16xf32> to vector<16x16xf32>
    %13 = arith.addf %10, %12 : vector<16x16xf32>
    %14 = arith.mulf %13, %13 : vector<16x16xf32>
    %cst_10 = arith.constant dense<0.000000e+00> : vector<16xf32>
    %15 = vector.multi_reduction <add>, %14, %cst_10 [1] : vector<16x16xf32> to vector<16xf32>
    %16 = vector.shape_cast %15 : vector<16xf32> to vector<16x1xf32>
    %cst_11 = arith.constant 1.000000e-24 : f32
    %17 = vector.broadcast %cst_11 : f32 to vector<16x1xf32>
    %18 = arith.maximumf %16, %17 : vector<16x1xf32>
    %19 = math.rsqrt %18 : vector<16x1xf32>
    %20 = vector.broadcast %19 : vector<16x1xf32> to vector<16x16xf32>
    %21 = arith.mulf %13, %20 : vector<16x16xf32>
    %c0_12 = arith.constant 0 : index
    %c0_13 = arith.constant 0 : index
    %c0_14 = arith.constant 0 : index
    %22 = vector.load %arg5[%c0_12, %c0_13, %c0_14] : memref<1x16x16xf32, #tpu.memory_space<vmem>>, vector<1x16x16xf32>
    %23 = vector.shape_cast %22 : vector<1x16x16xf32> to vector<16x16xf32>
    %24 = vector.shape_cast %21 : vector<16x16xf32> to vector<1x16x16xf32>
    tpu.vector_store %arg5[%c0_12, %c0_13, %c0_14], %24 {strides = array<i32>} : memref<1x16x16xf32, #tpu.memory_space<vmem>>, vector<1x16x16xf32>,
    %cst_15 = arith.constant dense<0xFF800000> : vector<16xf32>
    %25 = vector.multi_reduction <maximumf>, %21, %cst_15 [0] : vector<16x16xf32> to vector<16xf32>
    %26 = vector.shape_cast %25 : vector<16xf32> to vector<1x16xf32>
    %c0_16 = arith.constant 0 : index
    %c0_17 = arith.constant 0 : index
    %c0_18 = arith.constant 0 : index
    %27 = vector.load %arg6[%c0_16, %c0_17, %c0_18] : memref<1x1x16xf32, #tpu.memory_space<vmem>>, vector<1x1x16xf32>
    %28 = vector.shape_cast %27 : vector<1x1x16xf32> to vector<1x16xf32>
    %29 = vector.shape_cast %26 : vector<1x16xf32> to vector<1x1x16xf32>
    tpu.vector_store %arg6[%c0_16, %c0_17, %c0_18], %29 {strides = array<i32>} : memref<1x1x16xf32, #tpu.memory_space<vmem>>, vector<1x1x16xf32>,
    return
  }
  func.func @transform_0(%arg0: i32) -> (i32, i32, i32) {
    %c0_i32 = arith.constant 0 : i32
    %c0_i32_0 = arith.constant 0 : i32
    %c0_i32_1 = arith.constant 0 : i32
    return %arg0, %c0_i32, %c0_i32_0 : i32, i32, i32
  }
  func.func @transform_1(%arg0: i32) -> (i32, i32, i32) {
    %c0_i32 = arith.constant 0 : i32
    %c0_i32_0 = arith.constant 0 : i32
    %c0_i32_1 = arith.constant 0 : i32
    return %arg0, %c0_i32, %c0_i32_0 : i32, i32, i32
  }
  func.func @transform_2(%arg0: i32) -> (i32, i32) {
    %c0_i32 = arith.constant 0 : i32
    %c0_i32_0 = arith.constant 0 : i32
    %c0_i32_1 = arith.constant 0 : i32
    return %c0_i32, %c0_i32_0 : i32, i32
  }
  func.func @transform_3(%arg0: i32) -> (i32, i32) {
    %c0_i32 = arith.constant 0 : i32
    %c0_i32_0 = arith.constant 0 : i32
    %c0_i32_1 = arith.constant 0 : i32
    return %c0_i32, %c0_i32_0 : i32, i32
  }
  func.func @transform_4(%arg0: i32) -> (i32, i32, i32) {
    %c0_i32 = arith.constant 0 : i32
    %c0_i32_0 = arith.constant 0 : i32
    %c0_i32_1 = arith.constant 0 : i32
    return %arg0, %c0_i32, %c0_i32_0 : i32, i32, i32
  }
  func.func @transform_5(%arg0: i32) -> (i32, i32, i32) {
    %c0_i32 = arith.constant 0 : i32
    %c0_i32_0 = arith.constant 0 : i32
    %c0_i32_1 = arith.constant 0 : i32
    return %arg0, %c0_i32, %c0_i32_0 : i32, i32, i32
  }
}

module attributes {stable_mosaic.version = 11 : i64} {
  func.func @_conv_relu_stats_kernel(%arg0: i32, %arg1: memref<1x16x16xf32, #tpu.memory_space<vmem>>, %arg2: memref<1x16x8xf32, #tpu.memory_space<vmem>>, %arg3: memref<8x32xf32, #tpu.memory_space<vmem>>, %arg4: memref<1x32xf32, #tpu.memory_space<vmem>>, %arg5: memref<1x16x32xf32, #tpu.memory_space<vmem>>, %arg6: memref<16x1xf32, #tpu.memory_space<vmem>>, %arg7: memref<16x1xf32, #tpu.memory_space<vmem>>) attributes {dimension_semantics = [#tpu.dimension_semantics<arbitrary>], iteration_bounds = array<i64: 2>, scalar_prefetch = 0 : i64, scratch_operands = 0 : i64, tpu.core_type = #tpu.core_type<tc>, window_params = [{transform_indices = @transform_0, window_bounds = array<i64: 1, 16, 16>}, {transform_indices = @transform_1, window_bounds = array<i64: 1, 16, 8>}, {pipeline_mode = #tpu.pipeline_mode<synchronous>, transform_indices = @transform_2, window_bounds = array<i64: 8, 32>}, {pipeline_mode = #tpu.pipeline_mode<synchronous>, transform_indices = @transform_3, window_bounds = array<i64: 1, 32>}, {transform_indices = @transform_4, window_bounds = array<i64: 1, 16, 32>}, {pipeline_mode = #tpu.pipeline_mode<synchronous>, transform_indices = @transform_5, window_bounds = array<i64: 16, 1>}, {pipeline_mode = #tpu.pipeline_mode<synchronous>, transform_indices = @transform_6, window_bounds = array<i64: 16, 1>}]} {
    %c0 = arith.constant 0 : index
    %c0_0 = arith.constant 0 : index
    %c0_1 = arith.constant 0 : index
    %0 = vector.load %arg1[%c0, %c0_0, %c0_1] : memref<1x16x16xf32, #tpu.memory_space<vmem>>, vector<1x16x16xf32>
    %1 = vector.shape_cast %0 : vector<1x16x16xf32> to vector<16x16xf32>
    %2 = arith.truncf %1 : vector<16x16xf32> to vector<16x16xbf16>
    %c0_2 = arith.constant 0 : index
    %c0_3 = arith.constant 0 : index
    %c0_4 = arith.constant 0 : index
    %3 = vector.load %arg2[%c0_2, %c0_3, %c0_4] : memref<1x16x8xf32, #tpu.memory_space<vmem>>, vector<1x16x8xf32>
    %4 = vector.shape_cast %3 : vector<1x16x8xf32> to vector<16x8xf32>
    %5 = arith.truncf %4 : vector<16x8xf32> to vector<16x8xbf16>
    %c0_5 = arith.constant 0 : index
    %c0_6 = arith.constant 0 : index
    %6 = vector.load %arg3[%c0_5, %c0_6] : memref<8x32xf32, #tpu.memory_space<vmem>>, vector<8x32xf32>
    %7 = arith.truncf %6 : vector<8x32xf32> to vector<8x32xbf16>
    %cst = arith.constant dense<0.000000e+00> : vector<16x8xf32>
    %8 = tpu.matmul %2, %5, %cst {dimension_numbers = #tpu.dot_dimension_numbers<[1], [0], [0], [1], [0, 0, 1, 1], [], []>} : vector<16x16xbf16>, vector<16x8xbf16>, vector<16x8xf32> -> vector<16x8xf32>
    %9 = arith.truncf %8 : vector<16x8xf32> to vector<16x8xbf16>
    %cst_7 = arith.constant dense<0.000000e+00> : vector<16x32xf32>
    %10 = tpu.matmul %9, %7, %cst_7 {dimension_numbers = #tpu.dot_dimension_numbers<[1], [0], [0], [1], [0, 0, 1, 1], [], []>} : vector<16x8xbf16>, vector<8x32xbf16>, vector<16x32xf32> -> vector<16x32xf32>
    %c0_8 = arith.constant 0 : index
    %c0_9 = arith.constant 0 : index
    %11 = vector.load %arg4[%c0_8, %c0_9] : memref<1x32xf32, #tpu.memory_space<vmem>>, vector<1x32xf32>
    %12 = vector.broadcast %11 : vector<1x32xf32> to vector<16x32xf32>
    %13 = arith.addf %10, %12 : vector<16x32xf32>
    %14 = arith.mulf %13, %13 : vector<16x32xf32>
    %cst_10 = arith.constant dense<0.000000e+00> : vector<16xf32>
    %15 = vector.multi_reduction <add>, %14, %cst_10 [1] : vector<16x32xf32> to vector<16xf32>
    %16 = vector.shape_cast %15 : vector<16xf32> to vector<16x1xf32>
    %cst_11 = arith.constant 1.000000e-24 : f32
    %17 = vector.broadcast %cst_11 : f32 to vector<16x1xf32>
    %18 = arith.maximumf %16, %17 : vector<16x1xf32>
    %19 = math.rsqrt %18 : vector<16x1xf32>
    %20 = vector.broadcast %19 : vector<16x1xf32> to vector<16x32xf32>
    %21 = arith.mulf %13, %20 : vector<16x32xf32>
    %cst_12 = arith.constant 0.000000e+00 : f32
    %22 = vector.broadcast %cst_12 : f32 to vector<16x32xf32>
    %23 = arith.maximumf %21, %22 : vector<16x32xf32>
    %c0_13 = arith.constant 0 : index
    %c0_14 = arith.constant 0 : index
    %c0_15 = arith.constant 0 : index
    %24 = vector.load %arg5[%c0_13, %c0_14, %c0_15] : memref<1x16x32xf32, #tpu.memory_space<vmem>>, vector<1x16x32xf32>
    %25 = vector.shape_cast %24 : vector<1x16x32xf32> to vector<16x32xf32>
    %26 = vector.shape_cast %23 : vector<16x32xf32> to vector<1x16x32xf32>
    tpu.vector_store %arg5[%c0_13, %c0_14, %c0_15], %26 {strides = array<i32>} : memref<1x16x32xf32, #tpu.memory_space<vmem>>, vector<1x16x32xf32>,
    %c0_i32 = arith.constant 0 : i32
    %27 = arith.cmpi eq, %arg0, %c0_i32 : i32
    %28 = arith.extui %27 : i1 to i32
    %c0_i32_16 = arith.constant 0 : i32
    %29 = arith.cmpi ne, %28, %c0_i32_16 : i32
    scf.if %29 {
      %cst_27 = arith.constant 0.000000e+00 : f32
      %41 = vector.broadcast %cst_27 : f32 to vector<16x1xf32>
      %c0_28 = arith.constant 0 : index
      %c0_29 = arith.constant 0 : index
      %42 = vector.load %arg6[%c0_28, %c0_29] : memref<16x1xf32, #tpu.memory_space<vmem>>, vector<16x1xf32>
      tpu.vector_store %arg6[%c0_28, %c0_29], %41 {strides = array<i32>} : memref<16x1xf32, #tpu.memory_space<vmem>>, vector<16x1xf32>,
      %cst_30 = arith.constant 0.000000e+00 : f32
      %43 = vector.broadcast %cst_30 : f32 to vector<16x1xf32>
      %c0_31 = arith.constant 0 : index
      %c0_32 = arith.constant 0 : index
      %44 = vector.load %arg7[%c0_31, %c0_32] : memref<16x1xf32, #tpu.memory_space<vmem>>, vector<16x1xf32>
      tpu.vector_store %arg7[%c0_31, %c0_32], %43 {strides = array<i32>} : memref<16x1xf32, #tpu.memory_space<vmem>>, vector<16x1xf32>,
    } else {
    }
    %c0_17 = arith.constant 0 : index
    %c0_18 = arith.constant 0 : index
    %30 = vector.load %arg6[%c0_17, %c0_18] : memref<16x1xf32, #tpu.memory_space<vmem>>, vector<16x1xf32>
    %cst_19 = arith.constant dense<0.000000e+00> : vector<16xf32>
    %31 = vector.multi_reduction <add>, %23, %cst_19 [1] : vector<16x32xf32> to vector<16xf32>
    %32 = vector.shape_cast %31 : vector<16xf32> to vector<16x1xf32>
    %33 = arith.addf %30, %32 : vector<16x1xf32>
    %c0_20 = arith.constant 0 : index
    %c0_21 = arith.constant 0 : index
    %34 = vector.load %arg6[%c0_20, %c0_21] : memref<16x1xf32, #tpu.memory_space<vmem>>, vector<16x1xf32>
    tpu.vector_store %arg6[%c0_20, %c0_21], %33 {strides = array<i32>} : memref<16x1xf32, #tpu.memory_space<vmem>>, vector<16x1xf32>,
    %c0_22 = arith.constant 0 : index
    %c0_23 = arith.constant 0 : index
    %35 = vector.load %arg7[%c0_22, %c0_23] : memref<16x1xf32, #tpu.memory_space<vmem>>, vector<16x1xf32>
    %36 = arith.mulf %23, %23 : vector<16x32xf32>
    %cst_24 = arith.constant dense<0.000000e+00> : vector<16xf32>
    %37 = vector.multi_reduction <add>, %36, %cst_24 [1] : vector<16x32xf32> to vector<16xf32>
    %38 = vector.shape_cast %37 : vector<16xf32> to vector<16x1xf32>
    %39 = arith.addf %35, %38 : vector<16x1xf32>
    %c0_25 = arith.constant 0 : index
    %c0_26 = arith.constant 0 : index
    %40 = vector.load %arg7[%c0_25, %c0_26] : memref<16x1xf32, #tpu.memory_space<vmem>>, vector<16x1xf32>
    tpu.vector_store %arg7[%c0_25, %c0_26], %39 {strides = array<i32>} : memref<16x1xf32, #tpu.memory_space<vmem>>, vector<16x1xf32>,
    return
  }
  func.func @transform_0(%arg0: i32) -> (i32, i32, i32) {
    %c0_i32 = arith.constant 0 : i32
    %c0_i32_0 = arith.constant 0 : i32
    %c0_i32_1 = arith.constant 0 : i32
    return %arg0, %c0_i32, %c0_i32_0 : i32, i32, i32
  }
  func.func @transform_1(%arg0: i32) -> (i32, i32, i32) {
    %c0_i32 = arith.constant 0 : i32
    %c0_i32_0 = arith.constant 0 : i32
    %c0_i32_1 = arith.constant 0 : i32
    return %arg0, %c0_i32, %c0_i32_0 : i32, i32, i32
  }
  func.func @transform_2(%arg0: i32) -> (i32, i32) {
    %c0_i32 = arith.constant 0 : i32
    %c0_i32_0 = arith.constant 0 : i32
    %c0_i32_1 = arith.constant 0 : i32
    return %c0_i32, %c0_i32_0 : i32, i32
  }
  func.func @transform_3(%arg0: i32) -> (i32, i32) {
    %c0_i32 = arith.constant 0 : i32
    %c0_i32_0 = arith.constant 0 : i32
    %c0_i32_1 = arith.constant 0 : i32
    return %c0_i32, %c0_i32_0 : i32, i32
  }
  func.func @transform_4(%arg0: i32) -> (i32, i32, i32) {
    %c0_i32 = arith.constant 0 : i32
    %c0_i32_0 = arith.constant 0 : i32
    %c0_i32_1 = arith.constant 0 : i32
    return %arg0, %c0_i32, %c0_i32_0 : i32, i32, i32
  }
  func.func @transform_5(%arg0: i32) -> (i32, i32) {
    %c0_i32 = arith.constant 0 : i32
    %c0_i32_0 = arith.constant 0 : i32
    %c0_i32_1 = arith.constant 0 : i32
    return %c0_i32, %c0_i32_0 : i32, i32
  }
  func.func @transform_6(%arg0: i32) -> (i32, i32) {
    %c0_i32 = arith.constant 0 : i32
    %c0_i32_0 = arith.constant 0 : i32
    %c0_i32_1 = arith.constant 0 : i32
    return %c0_i32, %c0_i32_0 : i32, i32
  }
}

module attributes {stable_mosaic.version = 11 : i64} {
  func.func @_bn_apply_max_kernel(%arg0: i32, %arg1: memref<1x16x32xf32, #tpu.memory_space<vmem>>, %arg2: memref<16x1xf32, #tpu.memory_space<vmem>>, %arg3: memref<16x1xf32, #tpu.memory_space<vmem>>, %arg4: memref<1x16x32xf32, #tpu.memory_space<vmem>>, %arg5: memref<1x1x32xf32, #tpu.memory_space<vmem>>) attributes {dimension_semantics = [#tpu.dimension_semantics<parallel>], iteration_bounds = array<i64: 2>, scalar_prefetch = 0 : i64, scratch_operands = 0 : i64, tpu.core_type = #tpu.core_type<tc>, window_params = [{transform_indices = @transform_0, window_bounds = array<i64: 1, 16, 32>}, {pipeline_mode = #tpu.pipeline_mode<synchronous>, transform_indices = @transform_1, window_bounds = array<i64: 16, 1>}, {pipeline_mode = #tpu.pipeline_mode<synchronous>, transform_indices = @transform_2, window_bounds = array<i64: 16, 1>}, {transform_indices = @transform_3, window_bounds = array<i64: 1, 16, 32>}, {transform_indices = @transform_4, window_bounds = array<i64: 1, 1, 32>}]} {
    %c0 = arith.constant 0 : index
    %c0_0 = arith.constant 0 : index
    %c0_1 = arith.constant 0 : index
    %0 = vector.load %arg1[%c0, %c0_0, %c0_1] : memref<1x16x32xf32, #tpu.memory_space<vmem>>, vector<1x16x32xf32>
    %1 = vector.shape_cast %0 : vector<1x16x32xf32> to vector<16x32xf32>
    %c0_2 = arith.constant 0 : index
    %c0_3 = arith.constant 0 : index
    %2 = vector.load %arg2[%c0_2, %c0_3] : memref<16x1xf32, #tpu.memory_space<vmem>>, vector<16x1xf32>
    %cst = arith.constant 1.562500e-02 : f32
    %3 = vector.broadcast %cst : f32 to vector<16x1xf32>
    %4 = arith.mulf %2, %3 : vector<16x1xf32>
    %c0_4 = arith.constant 0 : index
    %c0_5 = arith.constant 0 : index
    %5 = vector.load %arg3[%c0_4, %c0_5] : memref<16x1xf32, #tpu.memory_space<vmem>>, vector<16x1xf32>
    %cst_6 = arith.constant 1.562500e-02 : f32
    %6 = vector.broadcast %cst_6 : f32 to vector<16x1xf32>
    %7 = arith.mulf %5, %6 : vector<16x1xf32>
    %8 = arith.mulf %4, %4 : vector<16x1xf32>
    %9 = arith.subf %7, %8 : vector<16x1xf32>
    %cst_7 = arith.constant 0.000000e+00 : f32
    %10 = vector.broadcast %cst_7 : f32 to vector<16x1xf32>
    %11 = arith.maximumf %9, %10 : vector<16x1xf32>
    %cst_8 = arith.constant 9.99999974E-6 : f32
    %12 = vector.broadcast %cst_8 : f32 to vector<16x1xf32>
    %13 = arith.addf %11, %12 : vector<16x1xf32>
    %14 = math.rsqrt %13 : vector<16x1xf32>
    %15 = vector.broadcast %4 : vector<16x1xf32> to vector<16x32xf32>
    %16 = arith.subf %1, %15 : vector<16x32xf32>
    %17 = vector.broadcast %14 : vector<16x1xf32> to vector<16x32xf32>
    %18 = arith.mulf %16, %17 : vector<16x32xf32>
    %c0_9 = arith.constant 0 : index
    %c0_10 = arith.constant 0 : index
    %c0_11 = arith.constant 0 : index
    %19 = vector.load %arg4[%c0_9, %c0_10, %c0_11] : memref<1x16x32xf32, #tpu.memory_space<vmem>>, vector<1x16x32xf32>
    %20 = vector.shape_cast %19 : vector<1x16x32xf32> to vector<16x32xf32>
    %21 = vector.shape_cast %18 : vector<16x32xf32> to vector<1x16x32xf32>
    tpu.vector_store %arg4[%c0_9, %c0_10, %c0_11], %21 {strides = array<i32>} : memref<1x16x32xf32, #tpu.memory_space<vmem>>, vector<1x16x32xf32>,
    %cst_12 = arith.constant dense<0xFF800000> : vector<32xf32>
    %22 = vector.multi_reduction <maximumf>, %18, %cst_12 [0] : vector<16x32xf32> to vector<32xf32>
    %23 = vector.shape_cast %22 : vector<32xf32> to vector<1x32xf32>
    %c0_13 = arith.constant 0 : index
    %c0_14 = arith.constant 0 : index
    %c0_15 = arith.constant 0 : index
    %24 = vector.load %arg5[%c0_13, %c0_14, %c0_15] : memref<1x1x32xf32, #tpu.memory_space<vmem>>, vector<1x1x32xf32>
    %25 = vector.shape_cast %24 : vector<1x1x32xf32> to vector<1x32xf32>
    %26 = vector.shape_cast %23 : vector<1x32xf32> to vector<1x1x32xf32>
    tpu.vector_store %arg5[%c0_13, %c0_14, %c0_15], %26 {strides = array<i32>} : memref<1x1x32xf32, #tpu.memory_space<vmem>>, vector<1x1x32xf32>,
    return
  }
  func.func @transform_0(%arg0: i32) -> (i32, i32, i32) {
    %c0_i32 = arith.constant 0 : i32
    %c0_i32_0 = arith.constant 0 : i32
    %c0_i32_1 = arith.constant 0 : i32
    return %arg0, %c0_i32, %c0_i32_0 : i32, i32, i32
  }
  func.func @transform_1(%arg0: i32) -> (i32, i32) {
    %c0_i32 = arith.constant 0 : i32
    %c0_i32_0 = arith.constant 0 : i32
    %c0_i32_1 = arith.constant 0 : i32
    return %c0_i32, %c0_i32_0 : i32, i32
  }
  func.func @transform_2(%arg0: i32) -> (i32, i32) {
    %c0_i32 = arith.constant 0 : i32
    %c0_i32_0 = arith.constant 0 : i32
    %c0_i32_1 = arith.constant 0 : i32
    return %c0_i32, %c0_i32_0 : i32, i32
  }
  func.func @transform_3(%arg0: i32) -> (i32, i32, i32) {
    %c0_i32 = arith.constant 0 : i32
    %c0_i32_0 = arith.constant 0 : i32
    %c0_i32_1 = arith.constant 0 : i32
    return %arg0, %c0_i32, %c0_i32_0 : i32, i32, i32
  }
  func.func @transform_4(%arg0: i32) -> (i32, i32, i32) {
    %c0_i32 = arith.constant 0 : i32
    %c0_i32_0 = arith.constant 0 : i32
    %c0_i32_1 = arith.constant 0 : i32
    return %arg0, %c0_i32, %c0_i32_0 : i32, i32, i32
  }
}

module attributes {stable_mosaic.version = 11 : i64} {
  func.func @_conv_max_kernel(%arg0: i32, %arg1: memref<1x16x16xf32, #tpu.memory_space<vmem>>, %arg2: memref<1x16x32xf32, #tpu.memory_space<vmem>>, %arg3: memref<32x4xf32, #tpu.memory_space<vmem>>, %arg4: memref<1x4xf32, #tpu.memory_space<vmem>>, %arg5: memref<1x16x4xf32, #tpu.memory_space<vmem>>, %arg6: memref<1x1x4xf32, #tpu.memory_space<vmem>>) attributes {dimension_semantics = [#tpu.dimension_semantics<parallel>], iteration_bounds = array<i64: 2>, scalar_prefetch = 0 : i64, scratch_operands = 0 : i64, tpu.core_type = #tpu.core_type<tc>, window_params = [{transform_indices = @transform_0, window_bounds = array<i64: 1, 16, 16>}, {transform_indices = @transform_1, window_bounds = array<i64: 1, 16, 32>}, {pipeline_mode = #tpu.pipeline_mode<synchronous>, transform_indices = @transform_2, window_bounds = array<i64: 32, 4>}, {pipeline_mode = #tpu.pipeline_mode<synchronous>, transform_indices = @transform_3, window_bounds = array<i64: 1, 4>}, {transform_indices = @transform_4, window_bounds = array<i64: 1, 16, 4>}, {transform_indices = @transform_5, window_bounds = array<i64: 1, 1, 4>}]} {
    %c0 = arith.constant 0 : index
    %c0_0 = arith.constant 0 : index
    %c0_1 = arith.constant 0 : index
    %0 = vector.load %arg1[%c0, %c0_0, %c0_1] : memref<1x16x16xf32, #tpu.memory_space<vmem>>, vector<1x16x16xf32>
    %1 = vector.shape_cast %0 : vector<1x16x16xf32> to vector<16x16xf32>
    %2 = arith.truncf %1 : vector<16x16xf32> to vector<16x16xbf16>
    %c0_2 = arith.constant 0 : index
    %c0_3 = arith.constant 0 : index
    %c0_4 = arith.constant 0 : index
    %3 = vector.load %arg2[%c0_2, %c0_3, %c0_4] : memref<1x16x32xf32, #tpu.memory_space<vmem>>, vector<1x16x32xf32>
    %4 = vector.shape_cast %3 : vector<1x16x32xf32> to vector<16x32xf32>
    %5 = arith.truncf %4 : vector<16x32xf32> to vector<16x32xbf16>
    %c0_5 = arith.constant 0 : index
    %c0_6 = arith.constant 0 : index
    %6 = vector.load %arg3[%c0_5, %c0_6] : memref<32x4xf32, #tpu.memory_space<vmem>>, vector<32x4xf32>
    %7 = arith.truncf %6 : vector<32x4xf32> to vector<32x4xbf16>
    %cst = arith.constant dense<0.000000e+00> : vector<16x4xf32>
    %8 = tpu.matmul %5, %7, %cst {dimension_numbers = #tpu.dot_dimension_numbers<[1], [0], [0], [1], [0, 0, 1, 1], [], []>} : vector<16x32xbf16>, vector<32x4xbf16>, vector<16x4xf32> -> vector<16x4xf32>
    %9 = arith.truncf %8 : vector<16x4xf32> to vector<16x4xbf16>
    %cst_7 = arith.constant dense<0.000000e+00> : vector<16x4xf32>
    %10 = tpu.matmul %2, %9, %cst_7 {dimension_numbers = #tpu.dot_dimension_numbers<[1], [0], [0], [1], [0, 0, 1, 1], [], []>} : vector<16x16xbf16>, vector<16x4xbf16>, vector<16x4xf32> -> vector<16x4xf32>
    %c0_8 = arith.constant 0 : index
    %c0_9 = arith.constant 0 : index
    %11 = vector.load %arg4[%c0_8, %c0_9] : memref<1x4xf32, #tpu.memory_space<vmem>>, vector<1x4xf32>
    %12 = vector.broadcast %11 : vector<1x4xf32> to vector<16x4xf32>
    %13 = arith.addf %10, %12 : vector<16x4xf32>
    %14 = arith.mulf %13, %13 : vector<16x4xf32>
    %cst_10 = arith.constant dense<0.000000e+00> : vector<16xf32>
    %15 = vector.multi_reduction <add>, %14, %cst_10 [1] : vector<16x4xf32> to vector<16xf32>
    %16 = vector.shape_cast %15 : vector<16xf32> to vector<16x1xf32>
    %cst_11 = arith.constant 1.000000e-24 : f32
    %17 = vector.broadcast %cst_11 : f32 to vector<16x1xf32>
    %18 = arith.maximumf %16, %17 : vector<16x1xf32>
    %19 = math.rsqrt %18 : vector<16x1xf32>
    %20 = vector.broadcast %19 : vector<16x1xf32> to vector<16x4xf32>
    %21 = arith.mulf %13, %20 : vector<16x4xf32>
    %c0_12 = arith.constant 0 : index
    %c0_13 = arith.constant 0 : index
    %c0_14 = arith.constant 0 : index
    %22 = vector.load %arg5[%c0_12, %c0_13, %c0_14] : memref<1x16x4xf32, #tpu.memory_space<vmem>>, vector<1x16x4xf32>
    %23 = vector.shape_cast %22 : vector<1x16x4xf32> to vector<16x4xf32>
    %24 = vector.shape_cast %21 : vector<16x4xf32> to vector<1x16x4xf32>
    tpu.vector_store %arg5[%c0_12, %c0_13, %c0_14], %24 {strides = array<i32>} : memref<1x16x4xf32, #tpu.memory_space<vmem>>, vector<1x16x4xf32>,
    %cst_15 = arith.constant dense<0xFF800000> : vector<4xf32>
    %25 = vector.multi_reduction <maximumf>, %21, %cst_15 [0] : vector<16x4xf32> to vector<4xf32>
    %26 = vector.shape_cast %25 : vector<4xf32> to vector<1x4xf32>
    %c0_16 = arith.constant 0 : index
    %c0_17 = arith.constant 0 : index
    %c0_18 = arith.constant 0 : index
    %27 = vector.load %arg6[%c0_16, %c0_17, %c0_18] : memref<1x1x4xf32, #tpu.memory_space<vmem>>, vector<1x1x4xf32>
    %28 = vector.shape_cast %27 : vector<1x1x4xf32> to vector<1x4xf32>
    %29 = vector.shape_cast %26 : vector<1x4xf32> to vector<1x1x4xf32>
    tpu.vector_store %arg6[%c0_16, %c0_17, %c0_18], %29 {strides = array<i32>} : memref<1x1x4xf32, #tpu.memory_space<vmem>>, vector<1x1x4xf32>,
    return
  }
  func.func @transform_0(%arg0: i32) -> (i32, i32, i32) {
    %c0_i32 = arith.constant 0 : i32
    %c0_i32_0 = arith.constant 0 : i32
    %c0_i32_1 = arith.constant 0 : i32
    return %arg0, %c0_i32, %c0_i32_0 : i32, i32, i32
  }
  func.func @transform_1(%arg0: i32) -> (i32, i32, i32) {
    %c0_i32 = arith.constant 0 : i32
    %c0_i32_0 = arith.constant 0 : i32
    %c0_i32_1 = arith.constant 0 : i32
    return %arg0, %c0_i32, %c0_i32_0 : i32, i32, i32
  }
  func.func @transform_2(%arg0: i32) -> (i32, i32) {
    %c0_i32 = arith.constant 0 : i32
    %c0_i32_0 = arith.constant 0 : i32
    %c0_i32_1 = arith.constant 0 : i32
    return %c0_i32, %c0_i32_0 : i32, i32
  }
  func.func @transform_3(%arg0: i32) -> (i32, i32) {
    %c0_i32 = arith.constant 0 : i32
    %c0_i32_0 = arith.constant 0 : i32
    %c0_i32_1 = arith.constant 0 : i32
    return %c0_i32, %c0_i32_0 : i32, i32
  }
  func.func @transform_4(%arg0: i32) -> (i32, i32, i32) {
    %c0_i32 = arith.constant 0 : i32
    %c0_i32_0 = arith.constant 0 : i32
    %c0_i32_1 = arith.constant 0 : i32
    return %arg0, %c0_i32, %c0_i32_0 : i32, i32, i32
  }
  func.func @transform_5(%arg0: i32) -> (i32, i32, i32) {
    %c0_i32 = arith.constant 0 : i32
    %c0_i32_0 = arith.constant 0 : i32
    %c0_i32_1 = arith.constant 0 : i32
    return %arg0, %c0_i32, %c0_i32_0 : i32, i32, i32
  }
}

module attributes {stable_mosaic.version = 11 : i64} {
  func.func @_conv_relu_stats_kernel(%arg0: i32, %arg1: memref<1x16x16xf32, #tpu.memory_space<vmem>>, %arg2: memref<1x16x32xf32, #tpu.memory_space<vmem>>, %arg3: memref<32x32xf32, #tpu.memory_space<vmem>>, %arg4: memref<1x32xf32, #tpu.memory_space<vmem>>, %arg5: memref<1x16x32xf32, #tpu.memory_space<vmem>>, %arg6: memref<16x1xf32, #tpu.memory_space<vmem>>, %arg7: memref<16x1xf32, #tpu.memory_space<vmem>>) attributes {dimension_semantics = [#tpu.dimension_semantics<arbitrary>], iteration_bounds = array<i64: 2>, scalar_prefetch = 0 : i64, scratch_operands = 0 : i64, tpu.core_type = #tpu.core_type<tc>, window_params = [{transform_indices = @transform_0, window_bounds = array<i64: 1, 16, 16>}, {transform_indices = @transform_1, window_bounds = array<i64: 1, 16, 32>}, {pipeline_mode = #tpu.pipeline_mode<synchronous>, transform_indices = @transform_2, window_bounds = array<i64: 32, 32>}, {pipeline_mode = #tpu.pipeline_mode<synchronous>, transform_indices = @transform_3, window_bounds = array<i64: 1, 32>}, {transform_indices = @transform_4, window_bounds = array<i64: 1, 16, 32>}, {pipeline_mode = #tpu.pipeline_mode<synchronous>, transform_indices = @transform_5, window_bounds = array<i64: 16, 1>}, {pipeline_mode = #tpu.pipeline_mode<synchronous>, transform_indices = @transform_6, window_bounds = array<i64: 16, 1>}]} {
    %c0 = arith.constant 0 : index
    %c0_0 = arith.constant 0 : index
    %c0_1 = arith.constant 0 : index
    %0 = vector.load %arg1[%c0, %c0_0, %c0_1] : memref<1x16x16xf32, #tpu.memory_space<vmem>>, vector<1x16x16xf32>
    %1 = vector.shape_cast %0 : vector<1x16x16xf32> to vector<16x16xf32>
    %2 = arith.truncf %1 : vector<16x16xf32> to vector<16x16xbf16>
    %c0_2 = arith.constant 0 : index
    %c0_3 = arith.constant 0 : index
    %c0_4 = arith.constant 0 : index
    %3 = vector.load %arg2[%c0_2, %c0_3, %c0_4] : memref<1x16x32xf32, #tpu.memory_space<vmem>>, vector<1x16x32xf32>
    %4 = vector.shape_cast %3 : vector<1x16x32xf32> to vector<16x32xf32>
    %5 = arith.truncf %4 : vector<16x32xf32> to vector<16x32xbf16>
    %c0_5 = arith.constant 0 : index
    %c0_6 = arith.constant 0 : index
    %6 = vector.load %arg3[%c0_5, %c0_6] : memref<32x32xf32, #tpu.memory_space<vmem>>, vector<32x32xf32>
    %7 = arith.truncf %6 : vector<32x32xf32> to vector<32x32xbf16>
    %cst = arith.constant dense<0.000000e+00> : vector<16x32xf32>
    %8 = tpu.matmul %2, %5, %cst {dimension_numbers = #tpu.dot_dimension_numbers<[1], [0], [0], [1], [0, 0, 1, 1], [], []>} : vector<16x16xbf16>, vector<16x32xbf16>, vector<16x32xf32> -> vector<16x32xf32>
    %9 = arith.truncf %8 : vector<16x32xf32> to vector<16x32xbf16>
    %cst_7 = arith.constant dense<0.000000e+00> : vector<16x32xf32>
    %10 = tpu.matmul %9, %7, %cst_7 {dimension_numbers = #tpu.dot_dimension_numbers<[1], [0], [0], [1], [0, 0, 1, 1], [], []>} : vector<16x32xbf16>, vector<32x32xbf16>, vector<16x32xf32> -> vector<16x32xf32>
    %c0_8 = arith.constant 0 : index
    %c0_9 = arith.constant 0 : index
    %11 = vector.load %arg4[%c0_8, %c0_9] : memref<1x32xf32, #tpu.memory_space<vmem>>, vector<1x32xf32>
    %12 = vector.broadcast %11 : vector<1x32xf32> to vector<16x32xf32>
    %13 = arith.addf %10, %12 : vector<16x32xf32>
    %14 = arith.mulf %13, %13 : vector<16x32xf32>
    %cst_10 = arith.constant dense<0.000000e+00> : vector<16xf32>
    %15 = vector.multi_reduction <add>, %14, %cst_10 [1] : vector<16x32xf32> to vector<16xf32>
    %16 = vector.shape_cast %15 : vector<16xf32> to vector<16x1xf32>
    %cst_11 = arith.constant 1.000000e-24 : f32
    %17 = vector.broadcast %cst_11 : f32 to vector<16x1xf32>
    %18 = arith.maximumf %16, %17 : vector<16x1xf32>
    %19 = math.rsqrt %18 : vector<16x1xf32>
    %20 = vector.broadcast %19 : vector<16x1xf32> to vector<16x32xf32>
    %21 = arith.mulf %13, %20 : vector<16x32xf32>
    %cst_12 = arith.constant 0.000000e+00 : f32
    %22 = vector.broadcast %cst_12 : f32 to vector<16x32xf32>
    %23 = arith.maximumf %21, %22 : vector<16x32xf32>
    %c0_13 = arith.constant 0 : index
    %c0_14 = arith.constant 0 : index
    %c0_15 = arith.constant 0 : index
    %24 = vector.load %arg5[%c0_13, %c0_14, %c0_15] : memref<1x16x32xf32, #tpu.memory_space<vmem>>, vector<1x16x32xf32>
    %25 = vector.shape_cast %24 : vector<1x16x32xf32> to vector<16x32xf32>
    %26 = vector.shape_cast %23 : vector<16x32xf32> to vector<1x16x32xf32>
    tpu.vector_store %arg5[%c0_13, %c0_14, %c0_15], %26 {strides = array<i32>} : memref<1x16x32xf32, #tpu.memory_space<vmem>>, vector<1x16x32xf32>,
    %c0_i32 = arith.constant 0 : i32
    %27 = arith.cmpi eq, %arg0, %c0_i32 : i32
    %28 = arith.extui %27 : i1 to i32
    %c0_i32_16 = arith.constant 0 : i32
    %29 = arith.cmpi ne, %28, %c0_i32_16 : i32
    scf.if %29 {
      %cst_27 = arith.constant 0.000000e+00 : f32
      %41 = vector.broadcast %cst_27 : f32 to vector<16x1xf32>
      %c0_28 = arith.constant 0 : index
      %c0_29 = arith.constant 0 : index
      %42 = vector.load %arg6[%c0_28, %c0_29] : memref<16x1xf32, #tpu.memory_space<vmem>>, vector<16x1xf32>
      tpu.vector_store %arg6[%c0_28, %c0_29], %41 {strides = array<i32>} : memref<16x1xf32, #tpu.memory_space<vmem>>, vector<16x1xf32>,
      %cst_30 = arith.constant 0.000000e+00 : f32
      %43 = vector.broadcast %cst_30 : f32 to vector<16x1xf32>
      %c0_31 = arith.constant 0 : index
      %c0_32 = arith.constant 0 : index
      %44 = vector.load %arg7[%c0_31, %c0_32] : memref<16x1xf32, #tpu.memory_space<vmem>>, vector<16x1xf32>
      tpu.vector_store %arg7[%c0_31, %c0_32], %43 {strides = array<i32>} : memref<16x1xf32, #tpu.memory_space<vmem>>, vector<16x1xf32>,
    } else {
    }
    %c0_17 = arith.constant 0 : index
    %c0_18 = arith.constant 0 : index
    %30 = vector.load %arg6[%c0_17, %c0_18] : memref<16x1xf32, #tpu.memory_space<vmem>>, vector<16x1xf32>
    %cst_19 = arith.constant dense<0.000000e+00> : vector<16xf32>
    %31 = vector.multi_reduction <add>, %23, %cst_19 [1] : vector<16x32xf32> to vector<16xf32>
    %32 = vector.shape_cast %31 : vector<16xf32> to vector<16x1xf32>
    %33 = arith.addf %30, %32 : vector<16x1xf32>
    %c0_20 = arith.constant 0 : index
    %c0_21 = arith.constant 0 : index
    %34 = vector.load %arg6[%c0_20, %c0_21] : memref<16x1xf32, #tpu.memory_space<vmem>>, vector<16x1xf32>
    tpu.vector_store %arg6[%c0_20, %c0_21], %33 {strides = array<i32>} : memref<16x1xf32, #tpu.memory_space<vmem>>, vector<16x1xf32>,
    %c0_22 = arith.constant 0 : index
    %c0_23 = arith.constant 0 : index
    %35 = vector.load %arg7[%c0_22, %c0_23] : memref<16x1xf32, #tpu.memory_space<vmem>>, vector<16x1xf32>
    %36 = arith.mulf %23, %23 : vector<16x32xf32>
    %cst_24 = arith.constant dense<0.000000e+00> : vector<16xf32>
    %37 = vector.multi_reduction <add>, %36, %cst_24 [1] : vector<16x32xf32> to vector<16xf32>
    %38 = vector.shape_cast %37 : vector<16xf32> to vector<16x1xf32>
    %39 = arith.addf %35, %38 : vector<16x1xf32>
    %c0_25 = arith.constant 0 : index
    %c0_26 = arith.constant 0 : index
    %40 = vector.load %arg7[%c0_25, %c0_26] : memref<16x1xf32, #tpu.memory_space<vmem>>, vector<16x1xf32>
    tpu.vector_store %arg7[%c0_25, %c0_26], %39 {strides = array<i32>} : memref<16x1xf32, #tpu.memory_space<vmem>>, vector<16x1xf32>,
    return
  }
  func.func @transform_0(%arg0: i32) -> (i32, i32, i32) {
    %c0_i32 = arith.constant 0 : i32
    %c0_i32_0 = arith.constant 0 : i32
    %c0_i32_1 = arith.constant 0 : i32
    return %arg0, %c0_i32, %c0_i32_0 : i32, i32, i32
  }
  func.func @transform_1(%arg0: i32) -> (i32, i32, i32) {
    %c0_i32 = arith.constant 0 : i32
    %c0_i32_0 = arith.constant 0 : i32
    %c0_i32_1 = arith.constant 0 : i32
    return %arg0, %c0_i32, %c0_i32_0 : i32, i32, i32
  }
  func.func @transform_2(%arg0: i32) -> (i32, i32) {
    %c0_i32 = arith.constant 0 : i32
    %c0_i32_0 = arith.constant 0 : i32
    %c0_i32_1 = arith.constant 0 : i32
    return %c0_i32, %c0_i32_0 : i32, i32
  }
  func.func @transform_3(%arg0: i32) -> (i32, i32) {
    %c0_i32 = arith.constant 0 : i32
    %c0_i32_0 = arith.constant 0 : i32
    %c0_i32_1 = arith.constant 0 : i32
    return %c0_i32, %c0_i32_0 : i32, i32
  }
  func.func @transform_4(%arg0: i32) -> (i32, i32, i32) {
    %c0_i32 = arith.constant 0 : i32
    %c0_i32_0 = arith.constant 0 : i32
    %c0_i32_1 = arith.constant 0 : i32
    return %arg0, %c0_i32, %c0_i32_0 : i32, i32, i32
  }
  func.func @transform_5(%arg0: i32) -> (i32, i32) {
    %c0_i32 = arith.constant 0 : i32
    %c0_i32_0 = arith.constant 0 : i32
    %c0_i32_1 = arith.constant 0 : i32
    return %c0_i32, %c0_i32_0 : i32, i32
  }
  func.func @transform_6(%arg0: i32) -> (i32, i32) {
    %c0_i32 = arith.constant 0 : i32
    %c0_i32_0 = arith.constant 0 : i32
    %c0_i32_1 = arith.constant 0 : i32
    return %c0_i32, %c0_i32_0 : i32, i32
  }
}

module attributes {stable_mosaic.version = 11 : i64} {
  func.func @_pool_kernel(%arg0: i32, %arg1: memref<1x16x4xf32, #tpu.memory_space<vmem>>, %arg2: memref<1x16x80xf32, #tpu.memory_space<vmem>>, %arg3: memref<1x16x16xf32, #tpu.memory_space<vmem>>, %arg4: memref<1x4x80xf32, #tpu.memory_space<vmem>>, %arg5: memref<1x4x4xf32, #tpu.memory_space<vmem>>) attributes {dimension_semantics = [#tpu.dimension_semantics<parallel>], iteration_bounds = array<i64: 2>, scalar_prefetch = 0 : i64, scratch_operands = 0 : i64, tpu.core_type = #tpu.core_type<tc>, window_params = [{transform_indices = @transform_0, window_bounds = array<i64: 1, 16, 4>}, {transform_indices = @transform_1, window_bounds = array<i64: 1, 16, 80>}, {transform_indices = @transform_2, window_bounds = array<i64: 1, 16, 16>}, {transform_indices = @transform_3, window_bounds = array<i64: 1, 4, 80>}, {transform_indices = @transform_4, window_bounds = array<i64: 1, 4, 4>}]} {
    %c0 = arith.constant 0 : index
    %c0_0 = arith.constant 0 : index
    %c0_1 = arith.constant 0 : index
    %0 = vector.load %arg1[%c0, %c0_0, %c0_1] : memref<1x16x4xf32, #tpu.memory_space<vmem>>, vector<1x16x4xf32>
    %1 = vector.shape_cast %0 : vector<1x16x4xf32> to vector<16x4xf32>
    %2 = arith.truncf %1 : vector<16x4xf32> to vector<16x4xbf16>
    %c0_2 = arith.constant 0 : index
    %c0_3 = arith.constant 0 : index
    %c0_4 = arith.constant 0 : index
    %3 = vector.load %arg2[%c0_2, %c0_3, %c0_4] : memref<1x16x80xf32, #tpu.memory_space<vmem>>, vector<1x16x80xf32>
    %4 = vector.shape_cast %3 : vector<1x16x80xf32> to vector<16x80xf32>
    %5 = arith.truncf %4 : vector<16x80xf32> to vector<16x80xbf16>
    %c0_5 = arith.constant 0 : index
    %c0_6 = arith.constant 0 : index
    %c0_7 = arith.constant 0 : index
    %6 = vector.load %arg3[%c0_5, %c0_6, %c0_7] : memref<1x16x16xf32, #tpu.memory_space<vmem>>, vector<1x16x16xf32>
    %7 = vector.shape_cast %6 : vector<1x16x16xf32> to vector<16x16xf32>
    %8 = arith.truncf %7 : vector<16x16xf32> to vector<16x16xbf16>
    %cst = arith.constant dense<0.000000e+00> : vector<4x80xf32>
    %9 = tpu.matmul %2, %5, %cst {dimension_numbers = #tpu.dot_dimension_numbers<[0], [0], [1], [1], [0, 1, 1, 1], [], []>} : vector<16x4xbf16>, vector<16x80xbf16>, vector<4x80xf32> -> vector<4x80xf32>
    %c0_8 = arith.constant 0 : index
    %c0_9 = arith.constant 0 : index
    %c0_10 = arith.constant 0 : index
    %10 = vector.load %arg4[%c0_8, %c0_9, %c0_10] : memref<1x4x80xf32, #tpu.memory_space<vmem>>, vector<1x4x80xf32>
    %11 = vector.shape_cast %10 : vector<1x4x80xf32> to vector<4x80xf32>
    %12 = vector.shape_cast %9 : vector<4x80xf32> to vector<1x4x80xf32>
    tpu.vector_store %arg4[%c0_8, %c0_9, %c0_10], %12 {strides = array<i32>} : memref<1x4x80xf32, #tpu.memory_space<vmem>>, vector<1x4x80xf32>,
    %cst_11 = arith.constant dense<0.000000e+00> : vector<4x16xf32>
    %13 = tpu.matmul %2, %8, %cst_11 {dimension_numbers = #tpu.dot_dimension_numbers<[0], [0], [1], [1], [0, 1, 1, 1], [], []>} : vector<16x4xbf16>, vector<16x16xbf16>, vector<4x16xf32> -> vector<4x16xf32>
    %14 = arith.truncf %13 : vector<4x16xf32> to vector<4x16xbf16>
    %cst_12 = arith.constant dense<0.000000e+00> : vector<4x4xf32>
    %15 = tpu.matmul %14, %2, %cst_12 {dimension_numbers = #tpu.dot_dimension_numbers<[1], [0], [0], [1], [0, 0, 1, 1], [], []>} : vector<4x16xbf16>, vector<16x4xbf16>, vector<4x4xf32> -> vector<4x4xf32>
    %c0_13 = arith.constant 0 : index
    %c0_14 = arith.constant 0 : index
    %c0_15 = arith.constant 0 : index
    %16 = vector.load %arg5[%c0_13, %c0_14, %c0_15] : memref<1x4x4xf32, #tpu.memory_space<vmem>>, vector<1x4x4xf32>
    %17 = vector.shape_cast %16 : vector<1x4x4xf32> to vector<4x4xf32>
    %18 = vector.shape_cast %15 : vector<4x4xf32> to vector<1x4x4xf32>
    tpu.vector_store %arg5[%c0_13, %c0_14, %c0_15], %18 {strides = array<i32>} : memref<1x4x4xf32, #tpu.memory_space<vmem>>, vector<1x4x4xf32>,
    return
  }
  func.func @transform_0(%arg0: i32) -> (i32, i32, i32) {
    %c0_i32 = arith.constant 0 : i32
    %c0_i32_0 = arith.constant 0 : i32
    %c0_i32_1 = arith.constant 0 : i32
    return %arg0, %c0_i32, %c0_i32_0 : i32, i32, i32
  }
  func.func @transform_1(%arg0: i32) -> (i32, i32, i32) {
    %c0_i32 = arith.constant 0 : i32
    %c0_i32_0 = arith.constant 0 : i32
    %c0_i32_1 = arith.constant 0 : i32
    return %arg0, %c0_i32, %c0_i32_0 : i32, i32, i32
  }
  func.func @transform_2(%arg0: i32) -> (i32, i32, i32) {
    %c0_i32 = arith.constant 0 : i32
    %c0_i32_0 = arith.constant 0 : i32
    %c0_i32_1 = arith.constant 0 : i32
    return %arg0, %c0_i32, %c0_i32_0 : i32, i32, i32
  }
  func.func @transform_3(%arg0: i32) -> (i32, i32, i32) {
    %c0_i32 = arith.constant 0 : i32
    %c0_i32_0 = arith.constant 0 : i32
    %c0_i32_1 = arith.constant 0 : i32
    return %arg0, %c0_i32, %c0_i32_0 : i32, i32, i32
  }
  func.func @transform_4(%arg0: i32) -> (i32, i32, i32) {
    %c0_i32 = arith.constant 0 : i32
    %c0_i32_0 = arith.constant 0 : i32
    %c0_i32_1 = arith.constant 0 : i32
    return %arg0, %c0_i32, %c0_i32_0 : i32, i32, i32
  }
}

module attributes {stable_mosaic.version = 11 : i64} {
  func.func @_linear_softmax_kernel(%arg0: i32, %arg1: memref<1x16x68xf32, #tpu.memory_space<vmem>>, %arg2: memref<68x4xf32, #tpu.memory_space<vmem>>, %arg3: memref<1x4xf32, #tpu.memory_space<vmem>>, %arg4: memref<1x16x4xf32, #tpu.memory_space<vmem>>) attributes {dimension_semantics = [#tpu.dimension_semantics<parallel>], iteration_bounds = array<i64: 2>, scalar_prefetch = 0 : i64, scratch_operands = 0 : i64, tpu.core_type = #tpu.core_type<tc>, window_params = [{transform_indices = @transform_0, window_bounds = array<i64: 1, 16, 68>}, {pipeline_mode = #tpu.pipeline_mode<synchronous>, transform_indices = @transform_1, window_bounds = array<i64: 68, 4>}, {pipeline_mode = #tpu.pipeline_mode<synchronous>, transform_indices = @transform_2, window_bounds = array<i64: 1, 4>}, {transform_indices = @transform_3, window_bounds = array<i64: 1, 16, 4>}]} {
    %c0 = arith.constant 0 : index
    %c0_0 = arith.constant 0 : index
    %c0_1 = arith.constant 0 : index
    %0 = vector.load %arg1[%c0, %c0_0, %c0_1] : memref<1x16x68xf32, #tpu.memory_space<vmem>>, vector<1x16x68xf32>
    %1 = vector.shape_cast %0 : vector<1x16x68xf32> to vector<16x68xf32>
    %2 = arith.truncf %1 : vector<16x68xf32> to vector<16x68xbf16>
    %c0_2 = arith.constant 0 : index
    %c0_3 = arith.constant 0 : index
    %3 = vector.load %arg2[%c0_2, %c0_3] : memref<68x4xf32, #tpu.memory_space<vmem>>, vector<68x4xf32>
    %4 = arith.truncf %3 : vector<68x4xf32> to vector<68x4xbf16>
    %cst = arith.constant dense<0.000000e+00> : vector<16x4xf32>
    %5 = tpu.matmul %2, %4, %cst {dimension_numbers = #tpu.dot_dimension_numbers<[1], [0], [0], [1], [0, 0, 1, 1], [], []>} : vector<16x68xbf16>, vector<68x4xbf16>, vector<16x4xf32> -> vector<16x4xf32>
    %c0_4 = arith.constant 0 : index
    %c0_5 = arith.constant 0 : index
    %6 = vector.load %arg3[%c0_4, %c0_5] : memref<1x4xf32, #tpu.memory_space<vmem>>, vector<1x4xf32>
    %7 = vector.broadcast %6 : vector<1x4xf32> to vector<16x4xf32>
    %8 = arith.addf %5, %7 : vector<16x4xf32>
    %cst_6 = arith.constant dense<0xFF800000> : vector<16xf32>
    %9 = vector.multi_reduction <maximumf>, %8, %cst_6 [1] : vector<16x4xf32> to vector<16xf32>
    %10 = vector.shape_cast %9 : vector<16xf32> to vector<16x1xf32>
    %11 = vector.broadcast %10 : vector<16x1xf32> to vector<16x4xf32>
    %12 = arith.subf %8, %11 : vector<16x4xf32>
    %13 = math.exp %12 : vector<16x4xf32>
    %cst_7 = arith.constant dense<0.000000e+00> : vector<16xf32>
    %14 = vector.multi_reduction <add>, %13, %cst_7 [1] : vector<16x4xf32> to vector<16xf32>
    %15 = vector.shape_cast %14 : vector<16xf32> to vector<16x1xf32>
    %16 = vector.broadcast %15 : vector<16x1xf32> to vector<16x4xf32>
    %17 = arith.divf %13, %16 : vector<16x4xf32>
    %c0_8 = arith.constant 0 : index
    %c0_9 = arith.constant 0 : index
    %c0_10 = arith.constant 0 : index
    %18 = vector.load %arg4[%c0_8, %c0_9, %c0_10] : memref<1x16x4xf32, #tpu.memory_space<vmem>>, vector<1x16x4xf32>
    %19 = vector.shape_cast %18 : vector<1x16x4xf32> to vector<16x4xf32>
    %20 = vector.shape_cast %17 : vector<16x4xf32> to vector<1x16x4xf32>
    tpu.vector_store %arg4[%c0_8, %c0_9, %c0_10], %20 {strides = array<i32>} : memref<1x16x4xf32, #tpu.memory_space<vmem>>, vector<1x16x4xf32>,
    return
  }
  func.func @transform_0(%arg0: i32) -> (i32, i32, i32) {
    %c0_i32 = arith.constant 0 : i32
    %c0_i32_0 = arith.constant 0 : i32
    %c0_i32_1 = arith.constant 0 : i32
    return %arg0, %c0_i32, %c0_i32_0 : i32, i32, i32
  }
  func.func @transform_1(%arg0: i32) -> (i32, i32) {
    %c0_i32 = arith.constant 0 : i32
    %c0_i32_0 = arith.constant 0 : i32
    %c0_i32_1 = arith.constant 0 : i32
    return %c0_i32, %c0_i32_0 : i32, i32
  }
  func.func @transform_2(%arg0: i32) -> (i32, i32) {
    %c0_i32 = arith.constant 0 : i32
    %c0_i32_0 = arith.constant 0 : i32
    %c0_i32_1 = arith.constant 0 : i32
    return %c0_i32, %c0_i32_0 : i32, i32
  }
  func.func @transform_3(%arg0: i32) -> (i32, i32, i32) {
    %c0_i32 = arith.constant 0 : i32
    %c0_i32_0 = arith.constant 0 : i32
    %c0_i32_1 = arith.constant 0 : i32
    return %arg0, %c0_i32, %c0_i32_0 : i32, i32, i32
  }
}

module attributes {stable_mosaic.version = 11 : i64} {
  func.func @_conv_relu_stats_kernel(%arg0: i32, %arg1: memref<1x4x4xf32, #tpu.memory_space<vmem>>, %arg2: memref<1x4x80xf32, #tpu.memory_space<vmem>>, %arg3: memref<80x32xf32, #tpu.memory_space<vmem>>, %arg4: memref<1x32xf32, #tpu.memory_space<vmem>>, %arg5: memref<1x4x32xf32, #tpu.memory_space<vmem>>, %arg6: memref<4x1xf32, #tpu.memory_space<vmem>>, %arg7: memref<4x1xf32, #tpu.memory_space<vmem>>) attributes {dimension_semantics = [#tpu.dimension_semantics<arbitrary>], iteration_bounds = array<i64: 2>, scalar_prefetch = 0 : i64, scratch_operands = 0 : i64, tpu.core_type = #tpu.core_type<tc>, window_params = [{transform_indices = @transform_0, window_bounds = array<i64: 1, 4, 4>}, {transform_indices = @transform_1, window_bounds = array<i64: 1, 4, 80>}, {pipeline_mode = #tpu.pipeline_mode<synchronous>, transform_indices = @transform_2, window_bounds = array<i64: 80, 32>}, {pipeline_mode = #tpu.pipeline_mode<synchronous>, transform_indices = @transform_3, window_bounds = array<i64: 1, 32>}, {transform_indices = @transform_4, window_bounds = array<i64: 1, 4, 32>}, {pipeline_mode = #tpu.pipeline_mode<synchronous>, transform_indices = @transform_5, window_bounds = array<i64: 4, 1>}, {pipeline_mode = #tpu.pipeline_mode<synchronous>, transform_indices = @transform_6, window_bounds = array<i64: 4, 1>}]} {
    %c0 = arith.constant 0 : index
    %c0_0 = arith.constant 0 : index
    %c0_1 = arith.constant 0 : index
    %0 = vector.load %arg1[%c0, %c0_0, %c0_1] : memref<1x4x4xf32, #tpu.memory_space<vmem>>, vector<1x4x4xf32>
    %1 = vector.shape_cast %0 : vector<1x4x4xf32> to vector<4x4xf32>
    %2 = arith.truncf %1 : vector<4x4xf32> to vector<4x4xbf16>
    %c0_2 = arith.constant 0 : index
    %c0_3 = arith.constant 0 : index
    %c0_4 = arith.constant 0 : index
    %3 = vector.load %arg2[%c0_2, %c0_3, %c0_4] : memref<1x4x80xf32, #tpu.memory_space<vmem>>, vector<1x4x80xf32>
    %4 = vector.shape_cast %3 : vector<1x4x80xf32> to vector<4x80xf32>
    %5 = arith.truncf %4 : vector<4x80xf32> to vector<4x80xbf16>
    %c0_5 = arith.constant 0 : index
    %c0_6 = arith.constant 0 : index
    %6 = vector.load %arg3[%c0_5, %c0_6] : memref<80x32xf32, #tpu.memory_space<vmem>>, vector<80x32xf32>
    %7 = arith.truncf %6 : vector<80x32xf32> to vector<80x32xbf16>
    %cst = arith.constant dense<0.000000e+00> : vector<4x32xf32>
    %8 = tpu.matmul %5, %7, %cst {dimension_numbers = #tpu.dot_dimension_numbers<[1], [0], [0], [1], [0, 0, 1, 1], [], []>} : vector<4x80xbf16>, vector<80x32xbf16>, vector<4x32xf32> -> vector<4x32xf32>
    %9 = arith.truncf %8 : vector<4x32xf32> to vector<4x32xbf16>
    %cst_7 = arith.constant dense<0.000000e+00> : vector<4x32xf32>
    %10 = tpu.matmul %2, %9, %cst_7 {dimension_numbers = #tpu.dot_dimension_numbers<[1], [0], [0], [1], [0, 0, 1, 1], [], []>} : vector<4x4xbf16>, vector<4x32xbf16>, vector<4x32xf32> -> vector<4x32xf32>
    %c0_8 = arith.constant 0 : index
    %c0_9 = arith.constant 0 : index
    %11 = vector.load %arg4[%c0_8, %c0_9] : memref<1x32xf32, #tpu.memory_space<vmem>>, vector<1x32xf32>
    %12 = vector.broadcast %11 : vector<1x32xf32> to vector<4x32xf32>
    %13 = arith.addf %10, %12 : vector<4x32xf32>
    %14 = arith.mulf %13, %13 : vector<4x32xf32>
    %cst_10 = arith.constant dense<0.000000e+00> : vector<4xf32>
    %15 = vector.multi_reduction <add>, %14, %cst_10 [1] : vector<4x32xf32> to vector<4xf32>
    %16 = vector.shape_cast %15 : vector<4xf32> to vector<4x1xf32>
    %cst_11 = arith.constant 1.000000e-24 : f32
    %17 = vector.broadcast %cst_11 : f32 to vector<4x1xf32>
    %18 = arith.maximumf %16, %17 : vector<4x1xf32>
    %19 = math.rsqrt %18 : vector<4x1xf32>
    %20 = vector.broadcast %19 : vector<4x1xf32> to vector<4x32xf32>
    %21 = arith.mulf %13, %20 : vector<4x32xf32>
    %cst_12 = arith.constant 0.000000e+00 : f32
    %22 = vector.broadcast %cst_12 : f32 to vector<4x32xf32>
    %23 = arith.maximumf %21, %22 : vector<4x32xf32>
    %c0_13 = arith.constant 0 : index
    %c0_14 = arith.constant 0 : index
    %c0_15 = arith.constant 0 : index
    %24 = vector.load %arg5[%c0_13, %c0_14, %c0_15] : memref<1x4x32xf32, #tpu.memory_space<vmem>>, vector<1x4x32xf32>
    %25 = vector.shape_cast %24 : vector<1x4x32xf32> to vector<4x32xf32>
    %26 = vector.shape_cast %23 : vector<4x32xf32> to vector<1x4x32xf32>
    tpu.vector_store %arg5[%c0_13, %c0_14, %c0_15], %26 {strides = array<i32>} : memref<1x4x32xf32, #tpu.memory_space<vmem>>, vector<1x4x32xf32>,
    %c0_i32 = arith.constant 0 : i32
    %27 = arith.cmpi eq, %arg0, %c0_i32 : i32
    %28 = arith.extui %27 : i1 to i32
    %c0_i32_16 = arith.constant 0 : i32
    %29 = arith.cmpi ne, %28, %c0_i32_16 : i32
    scf.if %29 {
      %cst_27 = arith.constant 0.000000e+00 : f32
      %41 = vector.broadcast %cst_27 : f32 to vector<4x1xf32>
      %c0_28 = arith.constant 0 : index
      %c0_29 = arith.constant 0 : index
      %42 = vector.load %arg6[%c0_28, %c0_29] : memref<4x1xf32, #tpu.memory_space<vmem>>, vector<4x1xf32>
      tpu.vector_store %arg6[%c0_28, %c0_29], %41 {strides = array<i32>} : memref<4x1xf32, #tpu.memory_space<vmem>>, vector<4x1xf32>,
      %cst_30 = arith.constant 0.000000e+00 : f32
      %43 = vector.broadcast %cst_30 : f32 to vector<4x1xf32>
      %c0_31 = arith.constant 0 : index
      %c0_32 = arith.constant 0 : index
      %44 = vector.load %arg7[%c0_31, %c0_32] : memref<4x1xf32, #tpu.memory_space<vmem>>, vector<4x1xf32>
      tpu.vector_store %arg7[%c0_31, %c0_32], %43 {strides = array<i32>} : memref<4x1xf32, #tpu.memory_space<vmem>>, vector<4x1xf32>,
    } else {
    }
    %c0_17 = arith.constant 0 : index
    %c0_18 = arith.constant 0 : index
    %30 = vector.load %arg6[%c0_17, %c0_18] : memref<4x1xf32, #tpu.memory_space<vmem>>, vector<4x1xf32>
    %cst_19 = arith.constant dense<0.000000e+00> : vector<4xf32>
    %31 = vector.multi_reduction <add>, %23, %cst_19 [1] : vector<4x32xf32> to vector<4xf32>
    %32 = vector.shape_cast %31 : vector<4xf32> to vector<4x1xf32>
    %33 = arith.addf %30, %32 : vector<4x1xf32>
    %c0_20 = arith.constant 0 : index
    %c0_21 = arith.constant 0 : index
    %34 = vector.load %arg6[%c0_20, %c0_21] : memref<4x1xf32, #tpu.memory_space<vmem>>, vector<4x1xf32>
    tpu.vector_store %arg6[%c0_20, %c0_21], %33 {strides = array<i32>} : memref<4x1xf32, #tpu.memory_space<vmem>>, vector<4x1xf32>,
    %c0_22 = arith.constant 0 : index
    %c0_23 = arith.constant 0 : index
    %35 = vector.load %arg7[%c0_22, %c0_23] : memref<4x1xf32, #tpu.memory_space<vmem>>, vector<4x1xf32>
    %36 = arith.mulf %23, %23 : vector<4x32xf32>
    %cst_24 = arith.constant dense<0.000000e+00> : vector<4xf32>
    %37 = vector.multi_reduction <add>, %36, %cst_24 [1] : vector<4x32xf32> to vector<4xf32>
    %38 = vector.shape_cast %37 : vector<4xf32> to vector<4x1xf32>
    %39 = arith.addf %35, %38 : vector<4x1xf32>
    %c0_25 = arith.constant 0 : index
    %c0_26 = arith.constant 0 : index
    %40 = vector.load %arg7[%c0_25, %c0_26] : memref<4x1xf32, #tpu.memory_space<vmem>>, vector<4x1xf32>
    tpu.vector_store %arg7[%c0_25, %c0_26], %39 {strides = array<i32>} : memref<4x1xf32, #tpu.memory_space<vmem>>, vector<4x1xf32>,
    return
  }
  func.func @transform_0(%arg0: i32) -> (i32, i32, i32) {
    %c0_i32 = arith.constant 0 : i32
    %c0_i32_0 = arith.constant 0 : i32
    %c0_i32_1 = arith.constant 0 : i32
    return %arg0, %c0_i32, %c0_i32_0 : i32, i32, i32
  }
  func.func @transform_1(%arg0: i32) -> (i32, i32, i32) {
    %c0_i32 = arith.constant 0 : i32
    %c0_i32_0 = arith.constant 0 : i32
    %c0_i32_1 = arith.constant 0 : i32
    return %arg0, %c0_i32, %c0_i32_0 : i32, i32, i32
  }
  func.func @transform_2(%arg0: i32) -> (i32, i32) {
    %c0_i32 = arith.constant 0 : i32
    %c0_i32_0 = arith.constant 0 : i32
    %c0_i32_1 = arith.constant 0 : i32
    return %c0_i32, %c0_i32_0 : i32, i32
  }
  func.func @transform_3(%arg0: i32) -> (i32, i32) {
    %c0_i32 = arith.constant 0 : i32
    %c0_i32_0 = arith.constant 0 : i32
    %c0_i32_1 = arith.constant 0 : i32
    return %c0_i32, %c0_i32_0 : i32, i32
  }
  func.func @transform_4(%arg0: i32) -> (i32, i32, i32) {
    %c0_i32 = arith.constant 0 : i32
    %c0_i32_0 = arith.constant 0 : i32
    %c0_i32_1 = arith.constant 0 : i32
    return %arg0, %c0_i32, %c0_i32_0 : i32, i32, i32
  }
  func.func @transform_5(%arg0: i32) -> (i32, i32) {
    %c0_i32 = arith.constant 0 : i32
    %c0_i32_0 = arith.constant 0 : i32
    %c0_i32_1 = arith.constant 0 : i32
    return %c0_i32, %c0_i32_0 : i32, i32
  }
  func.func @transform_6(%arg0: i32) -> (i32, i32) {
    %c0_i32 = arith.constant 0 : i32
    %c0_i32_0 = arith.constant 0 : i32
    %c0_i32_1 = arith.constant 0 : i32
    return %c0_i32, %c0_i32_0 : i32, i32
  }
}

module attributes {stable_mosaic.version = 11 : i64} {
  func.func @_bn_apply_max_kernel(%arg0: i32, %arg1: memref<1x4x32xf32, #tpu.memory_space<vmem>>, %arg2: memref<4x1xf32, #tpu.memory_space<vmem>>, %arg3: memref<4x1xf32, #tpu.memory_space<vmem>>, %arg4: memref<1x4x32xf32, #tpu.memory_space<vmem>>, %arg5: memref<1x1x32xf32, #tpu.memory_space<vmem>>) attributes {dimension_semantics = [#tpu.dimension_semantics<parallel>], iteration_bounds = array<i64: 2>, scalar_prefetch = 0 : i64, scratch_operands = 0 : i64, tpu.core_type = #tpu.core_type<tc>, window_params = [{transform_indices = @transform_0, window_bounds = array<i64: 1, 4, 32>}, {pipeline_mode = #tpu.pipeline_mode<synchronous>, transform_indices = @transform_1, window_bounds = array<i64: 4, 1>}, {pipeline_mode = #tpu.pipeline_mode<synchronous>, transform_indices = @transform_2, window_bounds = array<i64: 4, 1>}, {transform_indices = @transform_3, window_bounds = array<i64: 1, 4, 32>}, {transform_indices = @transform_4, window_bounds = array<i64: 1, 1, 32>}]} {
    %c0 = arith.constant 0 : index
    %c0_0 = arith.constant 0 : index
    %c0_1 = arith.constant 0 : index
    %0 = vector.load %arg1[%c0, %c0_0, %c0_1] : memref<1x4x32xf32, #tpu.memory_space<vmem>>, vector<1x4x32xf32>
    %1 = vector.shape_cast %0 : vector<1x4x32xf32> to vector<4x32xf32>
    %c0_2 = arith.constant 0 : index
    %c0_3 = arith.constant 0 : index
    %2 = vector.load %arg2[%c0_2, %c0_3] : memref<4x1xf32, #tpu.memory_space<vmem>>, vector<4x1xf32>
    %cst = arith.constant 1.562500e-02 : f32
    %3 = vector.broadcast %cst : f32 to vector<4x1xf32>
    %4 = arith.mulf %2, %3 : vector<4x1xf32>
    %c0_4 = arith.constant 0 : index
    %c0_5 = arith.constant 0 : index
    %5 = vector.load %arg3[%c0_4, %c0_5] : memref<4x1xf32, #tpu.memory_space<vmem>>, vector<4x1xf32>
    %cst_6 = arith.constant 1.562500e-02 : f32
    %6 = vector.broadcast %cst_6 : f32 to vector<4x1xf32>
    %7 = arith.mulf %5, %6 : vector<4x1xf32>
    %8 = arith.mulf %4, %4 : vector<4x1xf32>
    %9 = arith.subf %7, %8 : vector<4x1xf32>
    %cst_7 = arith.constant 0.000000e+00 : f32
    %10 = vector.broadcast %cst_7 : f32 to vector<4x1xf32>
    %11 = arith.maximumf %9, %10 : vector<4x1xf32>
    %cst_8 = arith.constant 9.99999974E-6 : f32
    %12 = vector.broadcast %cst_8 : f32 to vector<4x1xf32>
    %13 = arith.addf %11, %12 : vector<4x1xf32>
    %14 = math.rsqrt %13 : vector<4x1xf32>
    %15 = vector.broadcast %4 : vector<4x1xf32> to vector<4x32xf32>
    %16 = arith.subf %1, %15 : vector<4x32xf32>
    %17 = vector.broadcast %14 : vector<4x1xf32> to vector<4x32xf32>
    %18 = arith.mulf %16, %17 : vector<4x32xf32>
    %c0_9 = arith.constant 0 : index
    %c0_10 = arith.constant 0 : index
    %c0_11 = arith.constant 0 : index
    %19 = vector.load %arg4[%c0_9, %c0_10, %c0_11] : memref<1x4x32xf32, #tpu.memory_space<vmem>>, vector<1x4x32xf32>
    %20 = vector.shape_cast %19 : vector<1x4x32xf32> to vector<4x32xf32>
    %21 = vector.shape_cast %18 : vector<4x32xf32> to vector<1x4x32xf32>
    tpu.vector_store %arg4[%c0_9, %c0_10, %c0_11], %21 {strides = array<i32>} : memref<1x4x32xf32, #tpu.memory_space<vmem>>, vector<1x4x32xf32>,
    %cst_12 = arith.constant dense<0xFF800000> : vector<32xf32>
    %22 = vector.multi_reduction <maximumf>, %18, %cst_12 [0] : vector<4x32xf32> to vector<32xf32>
    %23 = vector.shape_cast %22 : vector<32xf32> to vector<1x32xf32>
    %c0_13 = arith.constant 0 : index
    %c0_14 = arith.constant 0 : index
    %c0_15 = arith.constant 0 : index
    %24 = vector.load %arg5[%c0_13, %c0_14, %c0_15] : memref<1x1x32xf32, #tpu.memory_space<vmem>>, vector<1x1x32xf32>
    %25 = vector.shape_cast %24 : vector<1x1x32xf32> to vector<1x32xf32>
    %26 = vector.shape_cast %23 : vector<1x32xf32> to vector<1x1x32xf32>
    tpu.vector_store %arg5[%c0_13, %c0_14, %c0_15], %26 {strides = array<i32>} : memref<1x1x32xf32, #tpu.memory_space<vmem>>, vector<1x1x32xf32>,
    return
  }
  func.func @transform_0(%arg0: i32) -> (i32, i32, i32) {
    %c0_i32 = arith.constant 0 : i32
    %c0_i32_0 = arith.constant 0 : i32
    %c0_i32_1 = arith.constant 0 : i32
    return %arg0, %c0_i32, %c0_i32_0 : i32, i32, i32
  }
  func.func @transform_1(%arg0: i32) -> (i32, i32) {
    %c0_i32 = arith.constant 0 : i32
    %c0_i32_0 = arith.constant 0 : i32
    %c0_i32_1 = arith.constant 0 : i32
    return %c0_i32, %c0_i32_0 : i32, i32
  }
  func.func @transform_2(%arg0: i32) -> (i32, i32) {
    %c0_i32 = arith.constant 0 : i32
    %c0_i32_0 = arith.constant 0 : i32
    %c0_i32_1 = arith.constant 0 : i32
    return %c0_i32, %c0_i32_0 : i32, i32
  }
  func.func @transform_3(%arg0: i32) -> (i32, i32, i32) {
    %c0_i32 = arith.constant 0 : i32
    %c0_i32_0 = arith.constant 0 : i32
    %c0_i32_1 = arith.constant 0 : i32
    return %arg0, %c0_i32, %c0_i32_0 : i32, i32, i32
  }
  func.func @transform_4(%arg0: i32) -> (i32, i32, i32) {
    %c0_i32 = arith.constant 0 : i32
    %c0_i32_0 = arith.constant 0 : i32
    %c0_i32_1 = arith.constant 0 : i32
    return %arg0, %c0_i32, %c0_i32_0 : i32, i32, i32
  }
}

module attributes {stable_mosaic.version = 11 : i64} {
  func.func @_conv_relu_stats_kernel(%arg0: i32, %arg1: memref<1x4x4xf32, #tpu.memory_space<vmem>>, %arg2: memref<1x4x32xf32, #tpu.memory_space<vmem>>, %arg3: memref<32x32xf32, #tpu.memory_space<vmem>>, %arg4: memref<1x32xf32, #tpu.memory_space<vmem>>, %arg5: memref<1x4x32xf32, #tpu.memory_space<vmem>>, %arg6: memref<4x1xf32, #tpu.memory_space<vmem>>, %arg7: memref<4x1xf32, #tpu.memory_space<vmem>>) attributes {dimension_semantics = [#tpu.dimension_semantics<arbitrary>], iteration_bounds = array<i64: 2>, scalar_prefetch = 0 : i64, scratch_operands = 0 : i64, tpu.core_type = #tpu.core_type<tc>, window_params = [{transform_indices = @transform_0, window_bounds = array<i64: 1, 4, 4>}, {transform_indices = @transform_1, window_bounds = array<i64: 1, 4, 32>}, {pipeline_mode = #tpu.pipeline_mode<synchronous>, transform_indices = @transform_2, window_bounds = array<i64: 32, 32>}, {pipeline_mode = #tpu.pipeline_mode<synchronous>, transform_indices = @transform_3, window_bounds = array<i64: 1, 32>}, {transform_indices = @transform_4, window_bounds = array<i64: 1, 4, 32>}, {pipeline_mode = #tpu.pipeline_mode<synchronous>, transform_indices = @transform_5, window_bounds = array<i64: 4, 1>}, {pipeline_mode = #tpu.pipeline_mode<synchronous>, transform_indices = @transform_6, window_bounds = array<i64: 4, 1>}]} {
    %c0 = arith.constant 0 : index
    %c0_0 = arith.constant 0 : index
    %c0_1 = arith.constant 0 : index
    %0 = vector.load %arg1[%c0, %c0_0, %c0_1] : memref<1x4x4xf32, #tpu.memory_space<vmem>>, vector<1x4x4xf32>
    %1 = vector.shape_cast %0 : vector<1x4x4xf32> to vector<4x4xf32>
    %2 = arith.truncf %1 : vector<4x4xf32> to vector<4x4xbf16>
    %c0_2 = arith.constant 0 : index
    %c0_3 = arith.constant 0 : index
    %c0_4 = arith.constant 0 : index
    %3 = vector.load %arg2[%c0_2, %c0_3, %c0_4] : memref<1x4x32xf32, #tpu.memory_space<vmem>>, vector<1x4x32xf32>
    %4 = vector.shape_cast %3 : vector<1x4x32xf32> to vector<4x32xf32>
    %5 = arith.truncf %4 : vector<4x32xf32> to vector<4x32xbf16>
    %c0_5 = arith.constant 0 : index
    %c0_6 = arith.constant 0 : index
    %6 = vector.load %arg3[%c0_5, %c0_6] : memref<32x32xf32, #tpu.memory_space<vmem>>, vector<32x32xf32>
    %7 = arith.truncf %6 : vector<32x32xf32> to vector<32x32xbf16>
    %cst = arith.constant dense<0.000000e+00> : vector<4x32xf32>
    %8 = tpu.matmul %2, %5, %cst {dimension_numbers = #tpu.dot_dimension_numbers<[1], [0], [0], [1], [0, 0, 1, 1], [], []>} : vector<4x4xbf16>, vector<4x32xbf16>, vector<4x32xf32> -> vector<4x32xf32>
    %9 = arith.truncf %8 : vector<4x32xf32> to vector<4x32xbf16>
    %cst_7 = arith.constant dense<0.000000e+00> : vector<4x32xf32>
    %10 = tpu.matmul %9, %7, %cst_7 {dimension_numbers = #tpu.dot_dimension_numbers<[1], [0], [0], [1], [0, 0, 1, 1], [], []>} : vector<4x32xbf16>, vector<32x32xbf16>, vector<4x32xf32> -> vector<4x32xf32>
    %c0_8 = arith.constant 0 : index
    %c0_9 = arith.constant 0 : index
    %11 = vector.load %arg4[%c0_8, %c0_9] : memref<1x32xf32, #tpu.memory_space<vmem>>, vector<1x32xf32>
    %12 = vector.broadcast %11 : vector<1x32xf32> to vector<4x32xf32>
    %13 = arith.addf %10, %12 : vector<4x32xf32>
    %14 = arith.mulf %13, %13 : vector<4x32xf32>
    %cst_10 = arith.constant dense<0.000000e+00> : vector<4xf32>
    %15 = vector.multi_reduction <add>, %14, %cst_10 [1] : vector<4x32xf32> to vector<4xf32>
    %16 = vector.shape_cast %15 : vector<4xf32> to vector<4x1xf32>
    %cst_11 = arith.constant 1.000000e-24 : f32
    %17 = vector.broadcast %cst_11 : f32 to vector<4x1xf32>
    %18 = arith.maximumf %16, %17 : vector<4x1xf32>
    %19 = math.rsqrt %18 : vector<4x1xf32>
    %20 = vector.broadcast %19 : vector<4x1xf32> to vector<4x32xf32>
    %21 = arith.mulf %13, %20 : vector<4x32xf32>
    %cst_12 = arith.constant 0.000000e+00 : f32
    %22 = vector.broadcast %cst_12 : f32 to vector<4x32xf32>
    %23 = arith.maximumf %21, %22 : vector<4x32xf32>
    %c0_13 = arith.constant 0 : index
    %c0_14 = arith.constant 0 : index
    %c0_15 = arith.constant 0 : index
    %24 = vector.load %arg5[%c0_13, %c0_14, %c0_15] : memref<1x4x32xf32, #tpu.memory_space<vmem>>, vector<1x4x32xf32>
    %25 = vector.shape_cast %24 : vector<1x4x32xf32> to vector<4x32xf32>
    %26 = vector.shape_cast %23 : vector<4x32xf32> to vector<1x4x32xf32>
    tpu.vector_store %arg5[%c0_13, %c0_14, %c0_15], %26 {strides = array<i32>} : memref<1x4x32xf32, #tpu.memory_space<vmem>>, vector<1x4x32xf32>,
    %c0_i32 = arith.constant 0 : i32
    %27 = arith.cmpi eq, %arg0, %c0_i32 : i32
    %28 = arith.extui %27 : i1 to i32
    %c0_i32_16 = arith.constant 0 : i32
    %29 = arith.cmpi ne, %28, %c0_i32_16 : i32
    scf.if %29 {
      %cst_27 = arith.constant 0.000000e+00 : f32
      %41 = vector.broadcast %cst_27 : f32 to vector<4x1xf32>
      %c0_28 = arith.constant 0 : index
      %c0_29 = arith.constant 0 : index
      %42 = vector.load %arg6[%c0_28, %c0_29] : memref<4x1xf32, #tpu.memory_space<vmem>>, vector<4x1xf32>
      tpu.vector_store %arg6[%c0_28, %c0_29], %41 {strides = array<i32>} : memref<4x1xf32, #tpu.memory_space<vmem>>, vector<4x1xf32>,
      %cst_30 = arith.constant 0.000000e+00 : f32
      %43 = vector.broadcast %cst_30 : f32 to vector<4x1xf32>
      %c0_31 = arith.constant 0 : index
      %c0_32 = arith.constant 0 : index
      %44 = vector.load %arg7[%c0_31, %c0_32] : memref<4x1xf32, #tpu.memory_space<vmem>>, vector<4x1xf32>
      tpu.vector_store %arg7[%c0_31, %c0_32], %43 {strides = array<i32>} : memref<4x1xf32, #tpu.memory_space<vmem>>, vector<4x1xf32>,
    } else {
    }
    %c0_17 = arith.constant 0 : index
    %c0_18 = arith.constant 0 : index
    %30 = vector.load %arg6[%c0_17, %c0_18] : memref<4x1xf32, #tpu.memory_space<vmem>>, vector<4x1xf32>
    %cst_19 = arith.constant dense<0.000000e+00> : vector<4xf32>
    %31 = vector.multi_reduction <add>, %23, %cst_19 [1] : vector<4x32xf32> to vector<4xf32>
    %32 = vector.shape_cast %31 : vector<4xf32> to vector<4x1xf32>
    %33 = arith.addf %30, %32 : vector<4x1xf32>
    %c0_20 = arith.constant 0 : index
    %c0_21 = arith.constant 0 : index
    %34 = vector.load %arg6[%c0_20, %c0_21] : memref<4x1xf32, #tpu.memory_space<vmem>>, vector<4x1xf32>
    tpu.vector_store %arg6[%c0_20, %c0_21], %33 {strides = array<i32>} : memref<4x1xf32, #tpu.memory_space<vmem>>, vector<4x1xf32>,
    %c0_22 = arith.constant 0 : index
    %c0_23 = arith.constant 0 : index
    %35 = vector.load %arg7[%c0_22, %c0_23] : memref<4x1xf32, #tpu.memory_space<vmem>>, vector<4x1xf32>
    %36 = arith.mulf %23, %23 : vector<4x32xf32>
    %cst_24 = arith.constant dense<0.000000e+00> : vector<4xf32>
    %37 = vector.multi_reduction <add>, %36, %cst_24 [1] : vector<4x32xf32> to vector<4xf32>
    %38 = vector.shape_cast %37 : vector<4xf32> to vector<4x1xf32>
    %39 = arith.addf %35, %38 : vector<4x1xf32>
    %c0_25 = arith.constant 0 : index
    %c0_26 = arith.constant 0 : index
    %40 = vector.load %arg7[%c0_25, %c0_26] : memref<4x1xf32, #tpu.memory_space<vmem>>, vector<4x1xf32>
    tpu.vector_store %arg7[%c0_25, %c0_26], %39 {strides = array<i32>} : memref<4x1xf32, #tpu.memory_space<vmem>>, vector<4x1xf32>,
    return
  }
  func.func @transform_0(%arg0: i32) -> (i32, i32, i32) {
    %c0_i32 = arith.constant 0 : i32
    %c0_i32_0 = arith.constant 0 : i32
    %c0_i32_1 = arith.constant 0 : i32
    return %arg0, %c0_i32, %c0_i32_0 : i32, i32, i32
  }
  func.func @transform_1(%arg0: i32) -> (i32, i32, i32) {
    %c0_i32 = arith.constant 0 : i32
    %c0_i32_0 = arith.constant 0 : i32
    %c0_i32_1 = arith.constant 0 : i32
    return %arg0, %c0_i32, %c0_i32_0 : i32, i32, i32
  }
  func.func @transform_2(%arg0: i32) -> (i32, i32) {
    %c0_i32 = arith.constant 0 : i32
    %c0_i32_0 = arith.constant 0 : i32
    %c0_i32_1 = arith.constant 0 : i32
    return %c0_i32, %c0_i32_0 : i32, i32
  }
  func.func @transform_3(%arg0: i32) -> (i32, i32) {
    %c0_i32 = arith.constant 0 : i32
    %c0_i32_0 = arith.constant 0 : i32
    %c0_i32_1 = arith.constant 0 : i32
    return %c0_i32, %c0_i32_0 : i32, i32
  }
  func.func @transform_4(%arg0: i32) -> (i32, i32, i32) {
    %c0_i32 = arith.constant 0 : i32
    %c0_i32_0 = arith.constant 0 : i32
    %c0_i32_1 = arith.constant 0 : i32
    return %arg0, %c0_i32, %c0_i32_0 : i32, i32, i32
  }
  func.func @transform_5(%arg0: i32) -> (i32, i32) {
    %c0_i32 = arith.constant 0 : i32
    %c0_i32_0 = arith.constant 0 : i32
    %c0_i32_1 = arith.constant 0 : i32
    return %c0_i32, %c0_i32_0 : i32, i32
  }
  func.func @transform_6(%arg0: i32) -> (i32, i32) {
    %c0_i32 = arith.constant 0 : i32
    %c0_i32_0 = arith.constant 0 : i32
    %c0_i32_1 = arith.constant 0 : i32
    return %c0_i32, %c0_i32_0 : i32, i32
  }
}

module attributes {stable_mosaic.version = 11 : i64} {
  func.func @_conv_max_kernel(%arg0: i32, %arg1: memref<1x4x4xf32, #tpu.memory_space<vmem>>, %arg2: memref<1x4x32xf32, #tpu.memory_space<vmem>>, %arg3: memref<32x16xf32, #tpu.memory_space<vmem>>, %arg4: memref<1x16xf32, #tpu.memory_space<vmem>>, %arg5: memref<1x4x16xf32, #tpu.memory_space<vmem>>, %arg6: memref<1x1x16xf32, #tpu.memory_space<vmem>>) attributes {dimension_semantics = [#tpu.dimension_semantics<parallel>], iteration_bounds = array<i64: 2>, scalar_prefetch = 0 : i64, scratch_operands = 0 : i64, tpu.core_type = #tpu.core_type<tc>, window_params = [{transform_indices = @transform_0, window_bounds = array<i64: 1, 4, 4>}, {transform_indices = @transform_1, window_bounds = array<i64: 1, 4, 32>}, {pipeline_mode = #tpu.pipeline_mode<synchronous>, transform_indices = @transform_2, window_bounds = array<i64: 32, 16>}, {pipeline_mode = #tpu.pipeline_mode<synchronous>, transform_indices = @transform_3, window_bounds = array<i64: 1, 16>}, {transform_indices = @transform_4, window_bounds = array<i64: 1, 4, 16>}, {transform_indices = @transform_5, window_bounds = array<i64: 1, 1, 16>}]} {
    %c0 = arith.constant 0 : index
    %c0_0 = arith.constant 0 : index
    %c0_1 = arith.constant 0 : index
    %0 = vector.load %arg1[%c0, %c0_0, %c0_1] : memref<1x4x4xf32, #tpu.memory_space<vmem>>, vector<1x4x4xf32>
    %1 = vector.shape_cast %0 : vector<1x4x4xf32> to vector<4x4xf32>
    %2 = arith.truncf %1 : vector<4x4xf32> to vector<4x4xbf16>
    %c0_2 = arith.constant 0 : index
    %c0_3 = arith.constant 0 : index
    %c0_4 = arith.constant 0 : index
    %3 = vector.load %arg2[%c0_2, %c0_3, %c0_4] : memref<1x4x32xf32, #tpu.memory_space<vmem>>, vector<1x4x32xf32>
    %4 = vector.shape_cast %3 : vector<1x4x32xf32> to vector<4x32xf32>
    %5 = arith.truncf %4 : vector<4x32xf32> to vector<4x32xbf16>
    %c0_5 = arith.constant 0 : index
    %c0_6 = arith.constant 0 : index
    %6 = vector.load %arg3[%c0_5, %c0_6] : memref<32x16xf32, #tpu.memory_space<vmem>>, vector<32x16xf32>
    %7 = arith.truncf %6 : vector<32x16xf32> to vector<32x16xbf16>
    %cst = arith.constant dense<0.000000e+00> : vector<4x16xf32>
    %8 = tpu.matmul %5, %7, %cst {dimension_numbers = #tpu.dot_dimension_numbers<[1], [0], [0], [1], [0, 0, 1, 1], [], []>} : vector<4x32xbf16>, vector<32x16xbf16>, vector<4x16xf32> -> vector<4x16xf32>
    %9 = arith.truncf %8 : vector<4x16xf32> to vector<4x16xbf16>
    %cst_7 = arith.constant dense<0.000000e+00> : vector<4x16xf32>
    %10 = tpu.matmul %2, %9, %cst_7 {dimension_numbers = #tpu.dot_dimension_numbers<[1], [0], [0], [1], [0, 0, 1, 1], [], []>} : vector<4x4xbf16>, vector<4x16xbf16>, vector<4x16xf32> -> vector<4x16xf32>
    %c0_8 = arith.constant 0 : index
    %c0_9 = arith.constant 0 : index
    %11 = vector.load %arg4[%c0_8, %c0_9] : memref<1x16xf32, #tpu.memory_space<vmem>>, vector<1x16xf32>
    %12 = vector.broadcast %11 : vector<1x16xf32> to vector<4x16xf32>
    %13 = arith.addf %10, %12 : vector<4x16xf32>
    %14 = arith.mulf %13, %13 : vector<4x16xf32>
    %cst_10 = arith.constant dense<0.000000e+00> : vector<4xf32>
    %15 = vector.multi_reduction <add>, %14, %cst_10 [1] : vector<4x16xf32> to vector<4xf32>
    %16 = vector.shape_cast %15 : vector<4xf32> to vector<4x1xf32>
    %cst_11 = arith.constant 1.000000e-24 : f32
    %17 = vector.broadcast %cst_11 : f32 to vector<4x1xf32>
    %18 = arith.maximumf %16, %17 : vector<4x1xf32>
    %19 = math.rsqrt %18 : vector<4x1xf32>
    %20 = vector.broadcast %19 : vector<4x1xf32> to vector<4x16xf32>
    %21 = arith.mulf %13, %20 : vector<4x16xf32>
    %c0_12 = arith.constant 0 : index
    %c0_13 = arith.constant 0 : index
    %c0_14 = arith.constant 0 : index
    %22 = vector.load %arg5[%c0_12, %c0_13, %c0_14] : memref<1x4x16xf32, #tpu.memory_space<vmem>>, vector<1x4x16xf32>
    %23 = vector.shape_cast %22 : vector<1x4x16xf32> to vector<4x16xf32>
    %24 = vector.shape_cast %21 : vector<4x16xf32> to vector<1x4x16xf32>
    tpu.vector_store %arg5[%c0_12, %c0_13, %c0_14], %24 {strides = array<i32>} : memref<1x4x16xf32, #tpu.memory_space<vmem>>, vector<1x4x16xf32>,
    %cst_15 = arith.constant dense<0xFF800000> : vector<16xf32>
    %25 = vector.multi_reduction <maximumf>, %21, %cst_15 [0] : vector<4x16xf32> to vector<16xf32>
    %26 = vector.shape_cast %25 : vector<16xf32> to vector<1x16xf32>
    %c0_16 = arith.constant 0 : index
    %c0_17 = arith.constant 0 : index
    %c0_18 = arith.constant 0 : index
    %27 = vector.load %arg6[%c0_16, %c0_17, %c0_18] : memref<1x1x16xf32, #tpu.memory_space<vmem>>, vector<1x1x16xf32>
    %28 = vector.shape_cast %27 : vector<1x1x16xf32> to vector<1x16xf32>
    %29 = vector.shape_cast %26 : vector<1x16xf32> to vector<1x1x16xf32>
    tpu.vector_store %arg6[%c0_16, %c0_17, %c0_18], %29 {strides = array<i32>} : memref<1x1x16xf32, #tpu.memory_space<vmem>>, vector<1x1x16xf32>,
    return
  }
  func.func @transform_0(%arg0: i32) -> (i32, i32, i32) {
    %c0_i32 = arith.constant 0 : i32
    %c0_i32_0 = arith.constant 0 : i32
    %c0_i32_1 = arith.constant 0 : i32
    return %arg0, %c0_i32, %c0_i32_0 : i32, i32, i32
  }
  func.func @transform_1(%arg0: i32) -> (i32, i32, i32) {
    %c0_i32 = arith.constant 0 : i32
    %c0_i32_0 = arith.constant 0 : i32
    %c0_i32_1 = arith.constant 0 : i32
    return %arg0, %c0_i32, %c0_i32_0 : i32, i32, i32
  }
  func.func @transform_2(%arg0: i32) -> (i32, i32) {
    %c0_i32 = arith.constant 0 : i32
    %c0_i32_0 = arith.constant 0 : i32
    %c0_i32_1 = arith.constant 0 : i32
    return %c0_i32, %c0_i32_0 : i32, i32
  }
  func.func @transform_3(%arg0: i32) -> (i32, i32) {
    %c0_i32 = arith.constant 0 : i32
    %c0_i32_0 = arith.constant 0 : i32
    %c0_i32_1 = arith.constant 0 : i32
    return %c0_i32, %c0_i32_0 : i32, i32
  }
  func.func @transform_4(%arg0: i32) -> (i32, i32, i32) {
    %c0_i32 = arith.constant 0 : i32
    %c0_i32_0 = arith.constant 0 : i32
    %c0_i32_1 = arith.constant 0 : i32
    return %arg0, %c0_i32, %c0_i32_0 : i32, i32, i32
  }
  func.func @transform_5(%arg0: i32) -> (i32, i32, i32) {
    %c0_i32 = arith.constant 0 : i32
    %c0_i32_0 = arith.constant 0 : i32
    %c0_i32_1 = arith.constant 0 : i32
    return %arg0, %c0_i32, %c0_i32_0 : i32, i32, i32
  }
}

</mosaic_0001>

<bundles_post_ra>
// kernel: soft_pooling_gcn_forward.18
= control target key start
LH: loop header
LB: loop body
LE: loop exit
PB: predicated region body
PF: predicated region fallthrough
CT: control target
= control target key end

     0   :  { %s425_s15 = smov 0   ;;  %s461_s0 = inlined_call_operand.vmem [shape: f32[2,16,32], index: 0, kind: input, shape index: {}]   ;;  %s462_s1 = inlined_call_operand.vmem [shape: f32[16,1], index: 1, kind: input, shape index: {}]   ;;  %s463_s2 = inlined_call_operand.vmem [shape: f32[16,1], index: 2, kind: input, shape index: {}]   ;;  %s464_s3 = inlined_call_operand.vmem [shape: f32[2,16,32], index: 3, kind: output, shape index: {0}]   ;;  %s465_s4 = inlined_call_operand.vmem [shape: f32[2,1,32], index: 4, kind: output, shape index: {1}]  }
   0x1 LB: > { %s363_s16 = sadd.s32 4294967295, %s397_s15   ;;  %p367_p0 = scmp.ge.s32.totalorder %s397_s15, 1  ;;  %s397_s15 = sphi %s425_s15, %s15_s15  }
   0x2   : > { %p165_p1 = scmp.lt.s32.totalorder %s397_s15, 3 }
   0x4   : > { %p166_p2 = pnand %p367_p0, %p165_p1 }
   0x5   : > { %p194_p3 = scmp.lt.s32.totalorder (!%p166_p2), %s363_s16, 1 }
   0x6   : > { %169 = sbr.rel (%p166_p2) target bundleno = 181 (0xb5), region = 32 }
   0xb   : > { %v209_v0 = vld [vmem:[%s462_s1] sm:$0xff]  ;;  %v210_v2 = vld [vmem:[%s462_s1 + $0x8] sm:$0xff]  ;;  %v399_v3 = vmov 0   ;;  %s467_s16 = smov (!%p194_p3, %s363_s16), 1  ;;  %vm269_vm6 = vcmask 261120   ;;  %vm281_vm7 = vcmask 253952  }
   0xc   : > { %v213_v1 = vld [vmem:[%s463_s2] sm:$0xff]  ;;  %385 = vset.pattern.permute.xlu0 %v399_v3  ;;  %v211_v4 = vmul.f32 0.015625, %v209_v0  ;;  %v212_v6 = vmul.f32 0.015625, %v210_v2  ;;  %v214_v7 = vld [vmem:[%s463_s2 + $0x8] sm:$0xff]  ;;  %386 = vset.pattern.permute.xlu1 %v399_v3  ;;  %s374_s25 = sshll.u32 %s467_s16, 4  ;;  %s206_s8 = scalar_lea.vmem %s465_s4, %s467_s16 }
   0xd   : > { %v215_v5 = vmul.f32 0.015625, %v213_v1  ;;  %v216_v8 = vmul.f32 0.015625, %v214_v7  ;;  %s198_s28 = scalar_lea.vmem %s461_s0, %s374_s25  ;;  %s203_s5 = scalar_lea.vmem %s464_s3, %s374_s25 }
   0xe   : > { %247 = vperm.xlu0 %385, %v211_v4   ;;  %v217_v9 = vmul.f32 %v211_v4, %v211_v4  ;;  %v218_v10 = vmul.f32 %v212_v6, %v212_v6  ;;  %v207_v32 = vld [vmem:[%s198_s28] sm:$0xff]  ;;  %v208_v37 = vld [vmem:[%s198_s28 + $0x8] sm:$0xff] }
  0x10   : > { %v219_v11 = vsub.f32 %v215_v5, %v217_v9  ;;  %v220_v12 = vsub.f32 %v216_v8, %v218_v10 }
  0x12   : > { %v221_v13 = vmax.f32 %v219_v11, 0.0  ;;  %v222_v14 = vmax.f32 %v220_v12, 0.0 }
  0x14   : > { %v223_v15 = vadd.f32 1e-05, %v221_v13  ;;  %v224_v16 = vadd.f32 1e-05, %v222_v14 }
  0x16   : > { %387 = vrsqrt.f32 %v223_v15  ;;  %252 = vperm.xlu0 %385, %v212_v6   ;;  %vm231_vm0 = vweird.f32 %v223_v15  ;;  %vm241_vm3 = vweird.f32 %v224_v16 }
  0x17   : > { %389 = vrsqrt.f32 %v224_v16 }
  0x1c   : > { %v388_v17 = vpop.eup %387 }
  0x1d   : > { %v390_v18 = vpop.eup %389  ;;  %v226_v19 = vmul.f32 %v388_v17, %v223_v15  ;;  %vm232_vm1 = vweird.f32 %v388_v17 }
  0x1e   : > { %v236_v20 = vmul.f32 %v390_v18, %v224_v16  ;;  %vm233_vm2 = vmor %vm231_vm0, %vm232_vm1  ;;  %vm242_vm4 = vweird.f32 %v390_v18 }
  0x1f   : > { %v227_v21 = vmul.f32 %v388_v17, %v226_v19  ;;  %vm243_vm5 = vmor %vm241_vm3, %vm242_vm4 }
  0x20   : > { %v237_v22 = vmul.f32 %v390_v18, %v236_v20 }
  0x21   : > { %v228_v23 = vmul.f32 0.5, %v227_v21 }
  0x22   : > { %v238_v24 = vmul.f32 0.5, %v237_v22 }
  0x23   : > { %v229_v25 = vsub.f32 1.5, %v228_v23 }
  0x24   : > { %v239_v27 = vsub.f32 1.5, %v238_v24 }
  0x25   : > { %v230_v26 = vmul.f32 %v388_v17, %v229_v25 }
  0x26   : > { %v240_v29 = vmul.f32 %v390_v18, %v239_v27 }
  0x27   : > { %v234_v28 = vsel %vm233_vm2, %v388_v17, %v230_v26 }
  0x28   : > { %259 = vperm.xlu1 %386, %v234_v28   ;;  %v244_v30 = vsel %vm243_vm5, %v390_v18, %v240_v29 }
  0x30   : > { %264 = vperm.xlu1 %386, %v244_v30  }
  0x80   : > { %v248_v31 = vpop.permute.xlu0 %247 }
  0x81   : > { %v255_v33 = vsub.f32 %v207_v32, %v248_v31 }
  0x88   : > { %v253_v36 = vpop.permute.xlu0 %252 }
  0x89   : > { %v256_v38 = vsub.f32 %v208_v37, %v253_v36 }
  0x9a   : > { %v260_v34 = vpop.permute.xlu1 %259 }
  0x9b   : > { %v267_v35 = vmul.f32 %v260_v34, %v255_v33 }
  0x9d   : > { %270 = vst.msk [vmem:[%s203_s5] sm:$0xff] %vm269_vm6, %v267_v35  ;;  %v272_v41 = vsel %vm269_vm6, %v267_v35, -inf }
  0xa2   : > { %v265_v39 = vpop.permute.xlu1 %264 }
  0xa3   : > { %v268_v40 = vmul.f32 %v265_v39, %v256_v38 }
  0xa5   : > { %271 = vst.msk [vmem:[%s203_s5 + $0x8] sm:$0xff] %vm269_vm6, %v268_v40  ;;  %v273_v42 = vsel %vm269_vm6, %v268_v40, -inf }
  0xa6   : > { %v274_v43 = vmax.f32 %v272_v41, %v273_v42 }
  0xa8   : > { %v275_v44 = vrot.slane %v274_v43, 4 }
  0xaa   : > { %v276_v45 = vmax.f32 %v274_v43, %v275_v44 }
  0xac   : > { %v277_v46 = vrot.slane %v276_v45, 2 }
  0xae   : > { %v278_v47 = vmax.f32 %v276_v45, %v277_v46 }
  0xb0   : > { %v279_v48 = vrot.slane %v278_v47, 1 }
  0xb2   : > { %v280_v49 = vmax.f32 %v278_v47, %v279_v48 }
  0xb4   : > { %282 = vst.msk [vmem:[%s206_s8] sm:$0x1] %vm281_vm7, %v280_v49 }
  0xb5 PF: > { %s15_s15 = sadd.s32 1, %s397_s15  }
  0xb6   : > { %p12_p4 = scmp.ge.s32.totalorder %s15_s15, 4  }
  0xb8   :  { %14 = sbr.rel (!%p12_p4) target bundleno = 1 (0x1), region = 74 }

// kernel: soft_pooling_gcn_forward.19
= control target key start
LH: loop header
LB: loop body
LE: loop exit
PB: predicated region body
PF: predicated region fallthrough
CT: control target
= control target key end

     0   :  { %12 = vsyncpa [#allocation3], 0  ;;  %s840_s0 = inlined_call_operand.hbm [shape: f32[2,16,16], index: 0, kind: input, shape index: {}]   ;;  %s841_s1 = inlined_call_operand.vmem [shape: f32[2,16,32], index: 1, kind: input, shape index: {}]   ;;  %s842_s2 = inlined_call_operand.vmem [shape: f32[32,32], index: 2, kind: input, shape index: {}]   ;;  %s843_s3 = inlined_call_operand.vmem [shape: f32[1,32], index: 3, kind: input, shape index: {}]   ;;  %s844_s4 = inlined_call_operand.vmem [shape: f32[2,16,32], index: 4, kind: output, shape index: {0}]   ;;  %s845_s5 = inlined_call_operand.vmem [shape: f32[16,1], index: 5, kind: output, shape index: {1}]   ;;  %s846_s6 = inlined_call_operand.vmem [shape: f32[16,1], index: 6, kind: output, shape index: {2}]  }
   0x1   :  { %14 = vsyncpa [#allocation3 + $0x1], 0  ;;  %s677_s21 = smov 0   ;;  %s679_s22 = smov 0  }
   0x2   :  { %s681_s23 = smov 0   ;;  %s683_s24 = smov 0  }
   0x3 LB: > { %s696_s25 = sadd.s32 4294967295, %s637_s24   ;;  %s699_s26 = sadd.s32 1, %s637_s24   ;;  %s637_s24 = sphi %s683_s24, %s853_s24   ;;  %s633_s23 = sphi %s681_s23, %s852_s23   ;;  %s629_s22 = sphi %s679_s22, %s851_s22   ;;  %s625_s21 = sphi %s677_s21, %s850_s21  }
   0x4   : > { %s24_s27 = ssub.s32 %s637_s24, %s699_s26  ;;  %s27_s28 = sadd.s32 1, %s633_s23 }
   0x5   : > { %p25_p0 = scmp.eq.s32.totalorder %s24_s27, 0  ;;  %p34_p1 = scmp.ne.s32.totalorder %s633_s23, %s629_s22 }
   0x6   : > { %p35_p2 = scmp.eq.s32.totalorder %s637_s24, 0  ;;  %p40_p3 = scmp.ne.s32.totalorder %s629_s22, %s625_s21 }
   0x7   : > { %s709_s29 = scalar_select %p25_p0, %s633_s23, %s27_s28  }
   0x8   : > { %p711_p4 = por %p35_p2, %p34_p1  ;;  %p41_p5 = scmp.eq.s32.totalorder %s696_s25, 0 }
   0x9   : > { %p532_p6 = scmp.lt.s32.totalorder %s637_s24, 2  ;;  %s206_s8 = sand.u32 1, %s633_s23  }
   0xa   : > { %p717_p7 = por %p41_p5, %p40_p3  ;;  %s509_s9 = sshll.u32 %s206_s8, 4 }
   0xb   : > { %s523_s10 = sshll.u32 %s637_s24, 4  ;;  %s210_s14 = scalar_lea.vmem [#allocation2], %s509_s9 }
   0xc   : > { %s215_s13 = scalar_lea.hbm %s840_s0, %s523_s10  ;;  %s218_s15 = sshll.u32 %s210_s14, 4  ;;  %s219_s15 = int_to_ptr.vmem [resolvable:$true] %s218_s15 }
   0xd   : > { %s216_s16 = sshll.u32 %s215_s13, 4  ;;  %p728_p8 = pnand %p532_p6, %p711_p4  ;;  %s217_s16 = int_to_ptr.hbm [resolvable:$true] %s216_s16 }
   0xe   : > { %p512_p9 = scmp.ge.s32.totalorder %s637_s24, 1  ;;  %s207_s18 = scalar_lea.sflag [#allocation3], %s206_s8 }
   0xf   : > { %s573_s19 = sshra.s32 %s217_s16, 4  ;;  %p577_p11 = pneg %p728_p8  ;;  %s574_s19 = int_to_ptr.hbm [resolvable:$true] %s573_s19 }
  0x10   : > { %s575_s20 = scalar_lea.hbm %s574_s19, 16  ;;  %s580_s28 = scalar_lea.hbm %s840_s0, 32 }
  0x11   : > { %p576_p10 = scmp.ne.s32.totalorder %s574_s19, %s575_s20  ;;  %p581_p0 = scmp.lt.s32.totalorder %s574_s19, %s840_s0 }
  0x12   : > { %p582_p1 = scmp.lt.s32.totalorder %s580_s28, %s575_s20 }
  0x13   : > { %p578_p12 = pnand %p577_p11, %p576_p10 }
  0x14   : > { %p583_p2 = por %p582_p1, %p581_p0 }
  0x15   : > { %p579_p13 = pneg %p578_p12 }
  0x17   : > { %p584_p3 = pnand %p583_p2, %p579_p13 }
  0x19   : > { %587 = shalt.err (!%p584_p3)
}
  0x1a   : > { %s639_s8 = smov 128   ;;  %s640_s10 = smov 8  }
  0x1b   : > { %531 = dma.hbm_to_vmem [thread:$0]  (!%p728_p8), %s217_s16, 256, %s219_s15, %s207_s18, %s639_s8, %s639_s8, %s640_s10  }
  0x1c   : > { %p234_p4 = scmp.lt.s32.totalorder %s637_s24, 3 }
  0x1e   : > { %p235_p5 = pnand %p512_p9, %p234_p4 }
  0x1f   : > { %s240_s11 = sand.u32 (!%p235_p5), 1, %s629_s22  }
  0x20   : > { %238 = sbr.rel (%p235_p5) target bundleno = 601 (0x259), region = 36  ;;  %s513_s12 = sshll.u32 (!%p235_p5), %s240_s11, 4 }
  0x21   : > { %s241_s13 = scalar_lea.sflag (!%p235_p5), [#allocation3], %s240_s11  ;;  %s244_s14 = scalar_lea.vmem (!%p235_p5), [#allocation2], %s513_s12 }
  0x25   : > { %620 = dma.done.wait (%p717_p7), %s241_s13, 256  }
  0x26   : > { %622 = vsyncadd (%p717_p7), %s241_s13, 4294967040  ;;  %p279_p6 = scmp.lt.s32.totalorder %s696_s25, 1  ;;  %v290_v2 = vld [vmem:[%s244_s14] sm:$0xff]  ;;  %v291_v4 = vld [vmem:[%s244_s14 + $0x8] sm:$0xff]  ;;  %vm302_vm0 = vcmask 130048   ;;  %vm325_vm1 = vcmask 261120  }
  0x27   : > { %v292_v5 = vpack.c.bf16 %v291_v4, %v290_v2  ;;  %v298_v6 = vld [vmem:[%s842_s2 + $0x10] sm:$0xff]  ;;  %v299_v7 = vld [vmem:[%s842_s2 + $0x18] sm:$0xff]  ;;  %v296_v9 = vld [vmem:[%s842_s2] sm:$0xff]  ;;  %p520_p7 = scmp.ne.s32.totalorder %s696_s25, 0 }
  0x28   : > { %s753_s17 = scalar_select %p279_p6, %s696_s25, 1  ;;  %v301_v8 = vpack.c.bf16 %v299_v7, %v298_v6  ;;  %v297_v10 = vld [vmem:[%s842_s2 + $0x8] sm:$0xff]  ;;  %v568_v15 = vld [vmem:[%s843_s3] ss:$0 sm:$0xff] }
  0x29   : > { %v300_v11 = vpack.c.bf16 %v297_v10, %v296_v9 }
  0x2a   : > { %s524_s24 = sshll.u32 %s753_s17, 4  ;;  %335 = vmatpush.bf16.msra.mxu1 %v301_v8 }
  0x2b   : > { %s283_s18 = scalar_lea.vmem %s841_s1, %s524_s24  ;;  %s288_s13 = scalar_lea.vmem %s844_s4, %s524_s24 }
  0x2c   : > { %v293_v0 = vld [vmem:[%s283_s18] sm:$0xff]  ;;  %v294_v1 = vld [vmem:[%s283_s18 + $0x8] sm:$0xff] }
  0x2d   : > { %v295_v3 = vpack.c.bf16 %v294_v1, %v293_v0 }
  0x2e   : > { %336 = vmatpush.bf16.msra.mxu1 %v300_v11 }
  0x2f   : > { %313 = vmatpush.bf16.msra.mxu0 %v295_v3 }
  0x32   : > { %518 = vmatmul.msk.bf16.vlgmr.msra.gmra.mxu0 %vm302_vm0, %v292_v5 }
  0xaf   : > { %v315_v12 = vpop.f32.mrf.mxu0 }
  0xb7   : > { %v317_v13 = vpop.f32.mrf.mxu0 }
  0xb8   : > { %v320_v14 = vpack.c.bf16 %v317_v13, %v315_v12 }
  0xba   : > { %519 = vmatmul.msk.bf16.vlgmr.msra.gmra.mxu1 %vm325_vm1, %v320_v14 }
 0x137   : > { %v338_v16 = vpop.f32.mrf.mxu1 }
 0x138   : > { %v339_v17 = vadd.f32 %v568_v15, %v338_v16 }
 0x13a   : > { %v343_v18 = vmul.f32 %v339_v17, %v339_v17 }
 0x13c   : > { %v345_v19 = vsel %vm325_vm1, %v343_v18, 0.0 }
 0x13d   : > { %346 = vadd.xlane.f32.xlu0 %v345_v19 }
 0x13f   : > { %v340_v20 = vpop.f32.mrf.mxu1 }
 0x140   : > { %v341_v21 = vadd.f32 %v568_v15, %v340_v20 }
 0x142   : > { %v344_v22 = vmul.f32 %v341_v21, %v341_v21 }
 0x144   : > { %v348_v23 = vsel %vm325_vm1, %v344_v22, 0.0 }
 0x145   : > { %349 = vadd.xlane.f32.xlu0 %v348_v23 }
 0x1b0   : > { %v347_v24 = vpop.xlane.xlu0 %346 }
 0x1b1   : > { %v351_v25 = vmax.f32 %v347_v24, 1e-24 }
 0x1b3   : > { %569 = vrsqrt.f32 %v351_v25  ;;  %vm359_vm3 = vweird.f32 %v351_v25 }
 0x1b8   : > { %v350_v26 = vpop.xlane.xlu0 %349 }
 0x1b9   : > { %v570_v27 = vpop.eup %569  ;;  %v352_v28 = vmax.f32 %v350_v26, 1e-24 }
 0x1ba   : > { %v354_v29 = vmul.f32 %v570_v27, %v351_v25  ;;  %vm360_vm2 = vweird.f32 %v570_v27 }
 0x1bb   : > { %571 = vrsqrt.f32 %v352_v28  ;;  %vm361_vm4 = vmor %vm359_vm3, %vm360_vm2  ;;  %vm369_vm6 = vweird.f32 %v352_v28 }
 0x1bc   : > { %v355_v30 = vmul.f32 %v570_v27, %v354_v29 }
 0x1be   : > { %v356_v31 = vmul.f32 0.5, %v355_v30 }
 0x1c0   : > { %v357_v32 = vsub.f32 1.5, %v356_v31 }
 0x1c1   : > { %v572_v33 = vpop.eup %571 }
 0x1c2   : > { %v358_v34 = vmul.f32 %v570_v27, %v357_v32  ;;  %v364_v35 = vmul.f32 %v572_v33, %v352_v28  ;;  %vm370_vm5 = vweird.f32 %v572_v33 }
 0x1c3   : > { %vm371_vm7 = vmor %vm369_vm6, %vm370_vm5 }
 0x1c4   : > { %v362_v36 = vsel %vm361_vm4, %v570_v27, %v358_v34  ;;  %v365_v37 = vmul.f32 %v572_v33, %v364_v35 }
 0x1c5   : > { %v373_v38 = vmul.f32 %v362_v36, %v339_v17 }
 0x1c6   : > { %v366_v39 = vmul.f32 0.5, %v365_v37 }
 0x1c7   : > { %v375_v40 = vmax.f32 %v373_v38, 0.0 }
 0x1c8   : > { %v367_v41 = vsub.f32 1.5, %v366_v39 }
 0x1c9   : > { %377 = vst.msk [vmem:[%s288_s13] sm:$0xff] %vm325_vm1, %v375_v40 }
 0x1ca   : > { %v368_v42 = vmul.f32 %v572_v33, %v367_v41 }
 0x1cc   : > { %v372_v43 = vsel %vm371_vm7, %v572_v33, %v368_v42 }
 0x1cd   : > { %v374_v44 = vmul.f32 %v372_v43, %v341_v21  ;;  %382 = sbr.rel (%p520_p7) target bundleno = 471 (0x1d7), region = 44 }
 0x1cf   : > { %v376_v45 = vmax.f32 %v374_v44, 0.0 }
 0x1d1   : > { %378 = vst.msk [vmem:[%s288_s13 + $0x8] sm:$0xff] %vm325_vm1, %v376_v45 }
 0x1d2   : > { %vm383_vm8 = vcmask 7168   ;;  %v641_v46 = vmov 0.0  }
 0x1d3   : > { %384 = vst.msk [vmem:[%s845_s5] sm:$0xff] %vm383_vm8, %v641_v46 }
 0x1d4   : > { %385 = vst.msk [vmem:[%s845_s5 + $0x8] sm:$0xff] %vm383_vm8, %v641_v46 }
 0x1d5   : > { %386 = vst.msk [vmem:[%s846_s6] sm:$0xff] %vm383_vm8, %v641_v46 }
 0x1d6   : > { %387 = vst.msk [vmem:[%s846_s6 + $0x8] sm:$0xff] %vm383_vm8, %v641_v46 }
 0x1d7 PF: > { %v403_v47 = vmul.f32 %v375_v40, %v375_v40  ;;  %v390_v48 = vsel %vm325_vm1, %v375_v40, 0.0  ;;  %v404_v50 = vmul.f32 %v376_v45, %v376_v45  ;;  %v393_v51 = vsel %vm325_vm1, %v376_v45, 0.0 }
 0x1d8   : > { %391 = vadd.xlane.f32.xlu0 %v390_v48  ;;  %vm398_vm9 = vcmask 7168  }
 0x1d9   : > { %v405_v49 = vsel %vm325_vm1, %v403_v47, 0.0  ;;  %v408_v52 = vsel %vm325_vm1, %v404_v50, 0.0 }
 0x1da   : > { %406 = vadd.xlane.f32.xlu1 %v405_v49  ;;  %v388_v53 = vld [vmem:[%s845_s5] sm:$0xff] }
 0x1db   : > { %v389_v59 = vld [vmem:[%s845_s5 + $0x8] sm:$0xff] }
 0x1dc   : > { %v401_v54 = vld [vmem:[%s846_s6] sm:$0xff] }
 0x1dd   : > { %v402_v60 = vld [vmem:[%s846_s6 + $0x8] sm:$0xff] }
 0x1e0   : > { %394 = vadd.xlane.f32.xlu0 %v393_v51 }
 0x1e2   : > { %409 = vadd.xlane.f32.xlu1 %v408_v52 }
 0x24b   : > { %v392_v55 = vpop.xlane.xlu0 %391 }
 0x24c   : > { %v396_v56 = vadd.f32 %v392_v55, %v388_v53 }
 0x24d   : > { %v407_v57 = vpop.xlane.xlu1 %406 }
 0x24e   : > { %v411_v58 = vadd.f32 %v407_v57, %v401_v54  ;;  %399 = vst.msk [vmem:[%s845_s5] sm:$0xff] %vm398_vm9, %v396_v56 }
 0x250   : > { %413 = vst.msk [vmem:[%s846_s6] sm:$0xff] %vm398_vm9, %v411_v58 }
 0x253   : > { %v395_v61 = vpop.xlane.xlu0 %394 }
 0x254   : > { %v397_v62 = vadd.f32 %v395_v61, %v389_v59 }
 0x255   : > { %v410_v63 = vpop.xlane.xlu1 %409 }
 0x256   : > { %v412_v0 = vadd.f32 %v410_v63, %v402_v60  ;;  %400 = vst.msk [vmem:[%s845_s5 + $0x8] sm:$0xff] %vm398_vm9, %v397_v62 }
 0x258   : > { %414 = vst.msk [vmem:[%s846_s6 + $0x8] sm:$0xff] %vm398_vm9, %v412_v0 }
 0x259 PF: > { %p17_p8 = scmp.ge.s32.totalorder %s699_s26, 4   ;;  %s850_s21 = smov %s629_s22 }
 0x25a   : > { %s851_s22 = smov %s633_s23  ;;  %s852_s23 = smov %s709_s29 }
 0x25b   : > { %s853_s24 = smov %s699_s26  ;;  %19 = sbr.rel (!%p17_p8) target bundleno = 3 (0x3), region = 99 }
 0x260   :  { %448 = vsyncpa [#allocation3], 1 }
 0x261   :  { %450 = vsyncpa [#allocation3 + $0x1], 1 }

// kernel: soft_pooling_gcn_forward.17
= control target key start
LH: loop header
LB: loop body
LE: loop exit
PB: predicated region body
PF: predicated region fallthrough
CT: control target
= control target key end

     0   :  { %12 = vsyncpa [#allocation3], 0  ;;  %s920_s0 = inlined_call_operand.hbm [shape: f32[2,16,16], index: 0, kind: input, shape index: {}]   ;;  %s921_s1 = inlined_call_operand.vmem [shape: f32[2,16,8], index: 1, kind: input, shape index: {}]   ;;  %s922_s2 = inlined_call_operand.vmem [shape: f32[8,32], index: 2, kind: input, shape index: {}]   ;;  %s923_s3 = inlined_call_operand.hbm [shape: f32[1,32], index: 3, kind: input, shape index: {}]   ;;  %s924_s4 = inlined_call_operand.vmem [shape: f32[2,16,32], index: 4, kind: output, shape index: {0}]   ;;  %s925_s5 = inlined_call_operand.vmem [shape: f32[16,1], index: 5, kind: output, shape index: {1}]   ;;  %s926_s6 = inlined_call_operand.vmem [shape: f32[16,1], index: 6, kind: output, shape index: {2}]  }
   0x1   :  { %14 = vsyncpa [#allocation3 + $0x1], 0 }
   0x2   :  { %15 = vsyncpa [#allocation5], 0  ;;  %s751_s21 = smov 0   ;;  %s753_s22 = smov 0  }
   0x3   :  { %s755_s23 = smov 0   ;;  %s757_s24 = smov 0  }
   0x4 LB: > { %s770_s25 = sadd.s32 4294967295, %s710_s24   ;;  %s773_s26 = sadd.s32 1, %s710_s24   ;;  %s710_s24 = sphi %s757_s24, %s934_s24   ;;  %s706_s23 = sphi %s755_s23, %s933_s23   ;;  %s702_s22 = sphi %s753_s22, %s932_s22   ;;  %s698_s21 = sphi %s751_s21, %s931_s21  }
   0x5   : > { %s25_s27 = ssub.s32 %s710_s24, %s773_s26  ;;  %s28_s28 = sadd.s32 1, %s706_s23 }
   0x6   : > { %p26_p0 = scmp.eq.s32.totalorder %s25_s27, 0  ;;  %p35_p1 = scmp.ne.s32.totalorder %s706_s23, %s702_s22 }
   0x7   : > { %p36_p2 = scmp.eq.s32.totalorder %s710_s24, 0  ;;  %p41_p3 = scmp.ne.s32.totalorder %s702_s22, %s698_s21 }
   0x8   : > { %s783_s29 = scalar_select %p26_p0, %s706_s23, %s28_s28  }
   0x9   : > { %p785_p4 = por %p36_p2, %p35_p1  ;;  %p42_p5 = scmp.eq.s32.totalorder %s770_s25, 0 }
   0xa   : > { %p533_p6 = scmp.ge.s32.totalorder %s710_s24, 1  ;;  %p188_p7 = scmp.lt.s32.totalorder %s710_s24, 3 }
   0xb   : > { %p794_p8 = por %p42_p5, %p41_p3  ;;  %p534_p9 = scmp.ne.s32.totalorder %s770_s25, 0 }
   0xc   : > { %p799_p10 = pnand %p533_p6, %p188_p7  ;;  %s203_s11 = sshll.u32 %s923_s3, 4  ;;  %s204_s11 = int_to_ptr.hbm [resolvable:$true] %s203_s11 }
   0xd   : > { %s712_s12 = smov [#allocation4]   ;;  %p569_p13 = scmp.lt.s32.totalorder %s710_s24, 2 }
   0xe   : > { %p560_p11 = pneg %p799_p10  ;;  %s205_s13 = sshll.u32 %s712_s12, 4  ;;  %s206_s13 = int_to_ptr.vmem [resolvable:$true] %s205_s13 }
   0xf   : > { %s216_s14 = sand.u32 1, %s706_s23   ;;  %s551_s15 = sshll.u32 %s710_s24, 4 }
  0x10   : > { %p561_p12 = pnand %p560_p11, %p42_p5  ;;  %p815_p0 = pnand %p569_p13, %p785_p4 }
  0x11   : > { %s536_s17 = sshll.u32 %s216_s14, 4  ;;  %s225_s20 = scalar_lea.hbm %s920_s0, %s551_s15 }
  0x12   : > { %563 = dma.hbm_to_vmem [thread:$0]  (!%p561_p12), %s204_s11, 16, %s206_s13, [#allocation5]  }
  0x13   : > { %s226_s21 = sshll.u32 %s225_s20, 4  ;;  %s220_s27 = scalar_lea.vmem [#allocation2], %s536_s17  ;;  %s227_s21 = int_to_ptr.hbm [resolvable:$true] %s226_s21 }
  0x14   : > { %s228_s28 = sshll.u32 %s220_s27, 4  ;;  %s217_s9 = scalar_lea.sflag [#allocation3], %s216_s14  ;;  %s229_s28 = int_to_ptr.vmem [resolvable:$true] %s228_s28 }
  0x15   : > { %s642_s10 = sshra.s32 %s227_s21, 4  ;;  %p646_p2 = pneg %p815_p0  ;;  %s643_s10 = int_to_ptr.hbm [resolvable:$true] %s642_s10 }
  0x16   : > { %s644_s24 = scalar_lea.hbm %s643_s10, 16  ;;  %s649_s12 = scalar_lea.hbm %s920_s0, 32 }
  0x17   : > { %p645_p1 = scmp.ne.s32.totalorder %s643_s10, %s644_s24  ;;  %p650_p6 = scmp.lt.s32.totalorder %s643_s10, %s920_s0 }
  0x18   : > { %p651_p7 = scmp.lt.s32.totalorder %s649_s12, %s644_s24 }
  0x19   : > { %p647_p3 = pnand %p646_p2, %p645_p1 }
  0x1a   : > { %p652_p11 = por %p651_p7, %p650_p6 }
  0x1b   : > { %p648_p4 = pneg %p647_p3 }
  0x1d   : > { %p653_p12 = pnand %p652_p11, %p648_p4 }
  0x1f   : > { %656 = shalt.err (!%p653_p12)
}
  0x20   : > { %s713_s14 = smov 128   ;;  %s714_s17 = smov 8  }
  0x21   : > { %567 = dma.hbm_to_vmem [thread:$0]  (!%p815_p0), %s227_s21, 256, %s229_s28, %s217_s9, %s713_s14, %s713_s14, %s714_s17  }
  0x22   : > { %248 = sbr.rel (%p799_p10) target bundleno = 605 (0x25d), region = 36  ;;  %s250_s18 = sand.u32 (!%p799_p10), 1, %s702_s22  }
  0x23   : > { %s540_s19 = sshll.u32 (!%p799_p10), %s250_s18, 4  ;;  %s251_s20 = scalar_lea.sflag (!%p799_p10), [#allocation3], %s250_s18 }
  0x24   : > { %s254_s27 = scalar_lea.vmem (!%p799_p10), [#allocation2], %s540_s19 }
  0x27   : > { %689 = dma.done.wait (%p794_p8), %s251_s20, 256  }
  0x28   : > { %691 = vsyncadd (%p794_p8), %s251_s20, 4294967040 }
  0x29   : > { %693 = dma.done.wait (%p42_p5), [#allocation5], 16  }
  0x2a   : > { %695 = vsyncadd (%p42_p5), [#allocation5], 4294967280  ;;  %p294_p10 = scmp.lt.s32.totalorder %s770_s25, 1  ;;  %v305_v2 = vld [vmem:[%s254_s27] sm:$0xff]  ;;  %v306_v4 = vld [vmem:[%s254_s27 + $0x8] sm:$0xff]  ;;  %vm313_vm0 = vcmask 130048  }
  0x2b   : > { %v307_v5 = vpack.c.bf16 %v306_v4, %v305_v2  ;;  %v311_v6 = vld [vmem:[%s922_s2] sm:$0xff]  ;;  %vm340_vm1 = vcmask 1043456   ;;  %vm336_vm2 = vcmask 64512   ;;  %vm360_vm3 = vcmask 261120  }
  0x2c   : > { %s845_s8 = scalar_select %p294_p10, %s770_s25, 1  ;;  %v312_v7 = vpack.c.bf16 %v311_v6, %v311_v6  ;;  %v607_v12 = vld [vmem:[#allocation4] ss:$0 sm:$0xff] }
  0x2e   : > { %s552_s16 = sshll.u32 %s845_s8, 4  ;;  %v342_v8 = vsel %vm340_vm1, %v312_v7, 0 }
  0x2f   : > { %s298_s7 = scalar_lea.vmem %s921_s1, %s552_s16  ;;  %351 = vmatpush.bf16.msra.mxu1 %v342_v8  ;;  %s303_s11 = scalar_lea.vmem %s924_s4, %s552_s16 }
  0x30   : > { %v308_v0 = vld [vmem:[%s298_s7] sm:$0xff]  ;;  %v309_v1 = vld [vmem:[%s298_s7 + $0x8] sm:$0xff] }
  0x31   : > { %v310_v3 = vpack.c.bf16 %v309_v1, %v308_v0 }
  0x33   : > { %324 = vmatpush.bf16.msra.mxu0 %v310_v3 }
  0x36   : > { %546 = vmatmul.msk.bf16.vlgmr.msra.gmra.mxu0 %vm313_vm0, %v307_v5 }
  0xb3   : > { %v326_v9 = vpop.f32.mrf.mxu0 }
  0xbb   : > { %v328_v10 = vpop.f32.mrf.mxu0 }
  0xbc   : > { %v331_v11 = vpack.c.bf16 %v328_v10, %v326_v9 }
  0xbe   : > { %547 = vmatmul.msk.bf16.vlgmr.msra.gmra.mxu1 %vm336_vm2, %v331_v11 }
 0x13b   : > { %v353_v13 = vpop.f32.mrf.mxu1 }
 0x13c   : > { %v354_v14 = vadd.f32 %v607_v12, %v353_v13 }
 0x13e   : > { %v358_v15 = vmul.f32 %v354_v14, %v354_v14 }
 0x140   : > { %v361_v16 = vsel %vm360_vm3, %v358_v15, 0.0 }
 0x141   : > { %362 = vadd.xlane.f32.xlu0 %v361_v16 }
 0x143   : > { %v355_v17 = vpop.f32.mrf.mxu1 }
 0x144   : > { %v356_v18 = vadd.f32 %v607_v12, %v355_v17 }
 0x146   : > { %v359_v19 = vmul.f32 %v356_v18, %v356_v18 }
 0x148   : > { %v364_v20 = vsel %vm360_vm3, %v359_v19, 0.0 }
 0x149   : > { %365 = vadd.xlane.f32.xlu0 %v364_v20 }
 0x1b4   : > { %v363_v21 = vpop.xlane.xlu0 %362 }
 0x1b5   : > { %v367_v22 = vmax.f32 %v363_v21, 1e-24 }
 0x1b7   : > { %608 = vrsqrt.f32 %v367_v22  ;;  %vm375_vm5 = vweird.f32 %v367_v22 }
 0x1bc   : > { %v366_v23 = vpop.xlane.xlu0 %365 }
 0x1bd   : > { %v609_v24 = vpop.eup %608  ;;  %v368_v25 = vmax.f32 %v366_v23, 1e-24 }
 0x1be   : > { %v370_v26 = vmul.f32 %v609_v24, %v367_v22  ;;  %vm376_vm4 = vweird.f32 %v609_v24 }
 0x1bf   : > { %610 = vrsqrt.f32 %v368_v25  ;;  %vm377_vm6 = vmor %vm375_vm5, %vm376_vm4  ;;  %vm385_vm8 = vweird.f32 %v368_v25 }
 0x1c0   : > { %v371_v27 = vmul.f32 %v609_v24, %v370_v26 }
 0x1c2   : > { %v372_v28 = vmul.f32 0.5, %v371_v27 }
 0x1c4   : > { %v373_v29 = vsub.f32 1.5, %v372_v28 }
 0x1c5   : > { %v611_v30 = vpop.eup %610 }
 0x1c6   : > { %v374_v31 = vmul.f32 %v609_v24, %v373_v29  ;;  %v380_v32 = vmul.f32 %v611_v30, %v368_v25  ;;  %vm386_vm7 = vweird.f32 %v611_v30 }
 0x1c7   : > { %vm387_vm9 = vmor %vm385_vm8, %vm386_vm7 }
 0x1c8   : > { %v378_v33 = vsel %vm377_vm6, %v609_v24, %v374_v31  ;;  %v381_v34 = vmul.f32 %v611_v30, %v380_v32 }
 0x1c9   : > { %v389_v35 = vmul.f32 %v378_v33, %v354_v14 }
 0x1ca   : > { %v382_v36 = vmul.f32 0.5, %v381_v34 }
 0x1cb   : > { %v391_v37 = vmax.f32 %v389_v35, 0.0 }
 0x1cc   : > { %v383_v38 = vsub.f32 1.5, %v382_v36 }
 0x1cd   : > { %393 = vst.msk [vmem:[%s303_s11] sm:$0xff] %vm360_vm3, %v391_v37 }
 0x1ce   : > { %v384_v39 = vmul.f32 %v611_v30, %v383_v38 }
 0x1d0   : > { %v388_v40 = vsel %vm387_vm9, %v611_v30, %v384_v39 }
 0x1d1   : > { %v390_v41 = vmul.f32 %v388_v40, %v356_v18  ;;  %398 = sbr.rel (%p534_p9) target bundleno = 475 (0x1db), region = 48 }
 0x1d3   : > { %v392_v42 = vmax.f32 %v390_v41, 0.0 }
 0x1d5   : > { %394 = vst.msk [vmem:[%s303_s11 + $0x8] sm:$0xff] %vm360_vm3, %v392_v42 }
 0x1d6   : > { %vm399_vm10 = vcmask 7168   ;;  %v715_v43 = vmov 0.0  }
 0x1d7   : > { %400 = vst.msk [vmem:[%s925_s5] sm:$0xff] %vm399_vm10, %v715_v43 }
 0x1d8   : > { %401 = vst.msk [vmem:[%s925_s5 + $0x8] sm:$0xff] %vm399_vm10, %v715_v43 }
 0x1d9   : > { %402 = vst.msk [vmem:[%s926_s6] sm:$0xff] %vm399_vm10, %v715_v43 }
 0x1da   : > { %403 = vst.msk [vmem:[%s926_s6 + $0x8] sm:$0xff] %vm399_vm10, %v715_v43 }
 0x1db PF: > { %v419_v44 = vmul.f32 %v391_v37, %v391_v37  ;;  %v406_v45 = vsel %vm360_vm3, %v391_v37, 0.0  ;;  %v420_v47 = vmul.f32 %v392_v42, %v392_v42  ;;  %v409_v48 = vsel %vm360_vm3, %v392_v42, 0.0 }
 0x1dc   : > { %407 = vadd.xlane.f32.xlu0 %v406_v45  ;;  %vm414_vm11 = vcmask 7168  }
 0x1dd   : > { %v421_v46 = vsel %vm360_vm3, %v419_v44, 0.0  ;;  %v424_v49 = vsel %vm360_vm3, %v420_v47, 0.0 }
 0x1de   : > { %422 = vadd.xlane.f32.xlu1 %v421_v46  ;;  %v404_v50 = vld [vmem:[%s925_s5] sm:$0xff] }
 0x1df   : > { %v405_v56 = vld [vmem:[%s925_s5 + $0x8] sm:$0xff] }
 0x1e0   : > { %v417_v51 = vld [vmem:[%s926_s6] sm:$0xff] }
 0x1e1   : > { %v418_v57 = vld [vmem:[%s926_s6 + $0x8] sm:$0xff] }
 0x1e4   : > { %410 = vadd.xlane.f32.xlu0 %v409_v48 }
 0x1e6   : > { %425 = vadd.xlane.f32.xlu1 %v424_v49 }
 0x24f   : > { %v408_v52 = vpop.xlane.xlu0 %407 }
 0x250   : > { %v412_v53 = vadd.f32 %v408_v52, %v404_v50 }
 0x251   : > { %v423_v54 = vpop.xlane.xlu1 %422 }
 0x252   : > { %v427_v55 = vadd.f32 %v423_v54, %v417_v51  ;;  %415 = vst.msk [vmem:[%s925_s5] sm:$0xff] %vm414_vm11, %v412_v53 }
 0x254   : > { %429 = vst.msk [vmem:[%s926_s6] sm:$0xff] %vm414_vm11, %v427_v55 }
 0x257   : > { %v411_v58 = vpop.xlane.xlu0 %410 }
 0x258   : > { %v413_v59 = vadd.f32 %v411_v58, %v405_v56 }
 0x259   : > { %v426_v60 = vpop.xlane.xlu1 %425 }
 0x25a   : > { %v428_v61 = vadd.f32 %v426_v60, %v418_v57  ;;  %416 = vst.msk [vmem:[%s925_s5 + $0x8] sm:$0xff] %vm414_vm11, %v413_v59 }
 0x25c   : > { %430 = vst.msk [vmem:[%s926_s6 + $0x8] sm:$0xff] %vm414_vm11, %v428_v61 }
 0x25d PF: > { %p18_p5 = scmp.ge.s32.totalorder %s773_s26, 4   ;;  %s931_s21 = smov %s702_s22 }
 0x25e   : > { %s932_s22 = smov %s706_s23  ;;  %s933_s23 = smov %s783_s29 }
 0x25f   : > { %s934_s24 = smov %s773_s26  ;;  %20 = sbr.rel (!%p18_p5) target bundleno = 4 (0x4), region = 103 }
 0x264   :  { %464 = vsyncpa [#allocation3], 1 }
 0x265   :  { %466 = vsyncpa [#allocation3 + $0x1], 1 }
 0x266   :  { %467 = vsyncpa [#allocation5], 1 }

// kernel: soft_pooling_gcn_forward.21
= control target key start
LH: loop header
LB: loop body
LE: loop exit
PB: predicated region body
PF: predicated region fallthrough
CT: control target
= control target key end

     0   :  { %s514_s18 = smov 0   ;;  %s568_s0 = inlined_call_operand.vmem [shape: f32[2,16,16], index: 0, kind: input, shape index: {}]   ;;  %s569_s1 = inlined_call_operand.vmem [shape: f32[2,16,32], index: 1, kind: input, shape index: {}]   ;;  %s570_s2 = inlined_call_operand.vmem [shape: f32[32,16], index: 2, kind: input, shape index: {}]   ;;  %s571_s3 = inlined_call_operand.vmem [shape: f32[1,16], index: 3, kind: input, shape index: {}]   ;;  %s572_s4 = inlined_call_operand.vmem [shape: f32[2,16,16], index: 4, kind: output, shape index: {0}]   ;;  %s573_s5 = inlined_call_operand.vmem [shape: f32[2,1,16], index: 5, kind: output, shape index: {1}]  }
   0x1 LB: > { %s445_s19 = sadd.s32 4294967295, %s482_s18   ;;  %p449_p0 = scmp.ge.s32.totalorder %s482_s18, 1  ;;  %s482_s18 = sphi %s514_s18, %s16_s18  }
   0x2   : > { %p200_p1 = scmp.lt.s32.totalorder %s482_s18, 3 }
   0x4   : > { %p201_p2 = pnand %p449_p0, %p200_p1 }
   0x5   : > { %p236_p3 = scmp.lt.s32.totalorder (!%p201_p2), %s445_s19, 1 }
   0x6   : > { %204 = sbr.rel (%p201_p2) target bundleno = 453 (0x1c5), region = 36 }
   0xb   : > { %v263_v0 = vld [vmem:[%s570_s2 + $0x10] sm:$0xff]  ;;  %v264_v1 = vld [vmem:[%s570_s2 + $0x18] sm:$0xff]  ;;  %v261_v2 = vld [vmem:[%s570_s2] sm:$0xff]  ;;  %s575_s19 = smov (!%p236_p3, %s445_s19), 1  ;;  %vm267_vm0 = vcmask 261120   ;;  %vm290_vm1 = vcmask 130048  }
   0xc   : > { %v266_v3 = vpack.c.bf16 %v264_v1, %v263_v0  ;;  %v262_v4 = vld [vmem:[%s570_s2 + $0x8] sm:$0xff]  ;;  %s537_s28 = sshll.u32 %s575_s19, 4  ;;  %v471_v15 = vld [vmem:[%s571_s3] ss:$0 sm:$0xff]  ;;  %s253_s17 = scalar_lea.vmem %s573_s5, %s575_s19  ;;  %vm351_vm8 = vcmask 122880  }
   0xd   : > { %v265_v5 = vpack.c.bf16 %v262_v4, %v261_v2  ;;  %s245_s6 = scalar_lea.vmem %s569_s1, %s537_s28  ;;  %s240_s9 = scalar_lea.vmem %s568_s0, %s537_s28 }
   0xe   : > { %277 = vmatpush.bf16.msra.mxu0 %v266_v3  ;;  %v258_v6 = vld [vmem:[%s245_s6] sm:$0xff]  ;;  %v259_v7 = vld [vmem:[%s245_s6 + $0x8] sm:$0xff]  ;;  %s250_s14 = scalar_lea.vmem %s572_s4, %s537_s28 }
   0xf   : > { %v260_v8 = vpack.c.bf16 %v259_v7, %v258_v6  ;;  %v255_v10 = vld [vmem:[%s240_s9] sm:$0xff]  ;;  %v256_v11 = vld [vmem:[%s240_s9 + $0x8] sm:$0xff] }
  0x10   : > { %v257_v14 = vpack.c.bf16 %v256_v11, %v255_v10 }
  0x12   : > { %278 = vmatpush.bf16.msra.mxu0 %v265_v5 }
  0x15   : > { %456 = vmatmul.msk.bf16.vlgmr.msra.gmra.mxu0 %vm267_vm0, %v260_v8 }
  0x92   : > { %v280_v9 = vpop.f32.mrf.mxu0 }
  0x9a   : > { %v282_v12 = vpop.f32.mrf.mxu0 }
  0x9b   : > { %v285_v13 = vpack.c.bf16 %v282_v12, %v280_v9 }
  0x9d   : > { %301 = vmatpush.bf16.msra.mxu1 %v285_v13 }
  0xa0   : > { %457 = vmatmul.msk.bf16.vlgmr.msra.gmra.mxu1 %vm290_vm1, %v257_v14 }
 0x11d   : > { %v303_v16 = vpop.f32.mrf.mxu1 }
 0x11e   : > { %v304_v17 = vadd.f32 %v471_v15, %v303_v16 }
 0x120   : > { %v308_v18 = vmul.f32 %v304_v17, %v304_v17 }
 0x122   : > { %v310_v19 = vsel %vm290_vm1, %v308_v18, 0.0 }
 0x123   : > { %311 = vadd.xlane.f32.xlu0 %v310_v19 }
 0x125   : > { %v305_v20 = vpop.f32.mrf.mxu1 }
 0x126   : > { %v306_v21 = vadd.f32 %v471_v15, %v305_v20 }
 0x128   : > { %v309_v22 = vmul.f32 %v306_v21, %v306_v21 }
 0x12a   : > { %v313_v23 = vsel %vm290_vm1, %v309_v22, 0.0 }
 0x12b   : > { %314 = vadd.xlane.f32.xlu0 %v313_v23 }
 0x196   : > { %v312_v24 = vpop.xlane.xlu0 %311 }
 0x197   : > { %v316_v25 = vmax.f32 %v312_v24, 1e-24 }
 0x199   : > { %472 = vrsqrt.f32 %v316_v25  ;;  %vm324_vm3 = vweird.f32 %v316_v25 }
 0x19e   : > { %v315_v26 = vpop.xlane.xlu0 %314 }
 0x19f   : > { %v473_v27 = vpop.eup %472  ;;  %v317_v28 = vmax.f32 %v315_v26, 1e-24 }
 0x1a0   : > { %v319_v29 = vmul.f32 %v473_v27, %v316_v25  ;;  %vm325_vm2 = vweird.f32 %v473_v27 }
 0x1a1   : > { %474 = vrsqrt.f32 %v317_v28  ;;  %vm326_vm4 = vmor %vm324_vm3, %vm325_vm2  ;;  %vm334_vm6 = vweird.f32 %v317_v28 }
 0x1a2   : > { %v320_v30 = vmul.f32 %v473_v27, %v319_v29 }
 0x1a4   : > { %v321_v31 = vmul.f32 0.5, %v320_v30 }
 0x1a6   : > { %v322_v32 = vsub.f32 1.5, %v321_v31 }
 0x1a7   : > { %v475_v33 = vpop.eup %474 }
 0x1a8   : > { %v323_v34 = vmul.f32 %v473_v27, %v322_v32  ;;  %v329_v35 = vmul.f32 %v475_v33, %v317_v28  ;;  %vm335_vm5 = vweird.f32 %v475_v33 }
 0x1a9   : > { %vm336_vm7 = vmor %vm334_vm6, %vm335_vm5 }
 0x1aa   : > { %v327_v36 = vsel %vm326_vm4, %v473_v27, %v323_v34  ;;  %v330_v37 = vmul.f32 %v475_v33, %v329_v35 }
 0x1ab   : > { %v338_v38 = vmul.f32 %v327_v36, %v304_v17 }
 0x1ac   : > { %v331_v39 = vmul.f32 0.5, %v330_v37 }
 0x1ad   : > { %340 = vst.msk [vmem:[%s250_s14] sm:$0xff] %vm290_vm1, %v338_v38  ;;  %v342_v44 = vsel %vm290_vm1, %v338_v38, -inf }
 0x1ae   : > { %v332_v40 = vsub.f32 1.5, %v331_v39 }
 0x1b0   : > { %v333_v41 = vmul.f32 %v475_v33, %v332_v40 }
 0x1b2   : > { %v337_v42 = vsel %vm336_vm7, %v475_v33, %v333_v41 }
 0x1b3   : > { %v339_v43 = vmul.f32 %v337_v42, %v306_v21 }
 0x1b5   : > { %341 = vst.msk [vmem:[%s250_s14 + $0x8] sm:$0xff] %vm290_vm1, %v339_v43  ;;  %v343_v45 = vsel %vm290_vm1, %v339_v43, -inf }
 0x1b6   : > { %v344_v46 = vmax.f32 %v342_v44, %v343_v45 }
 0x1b8   : > { %v345_v47 = vrot.slane %v344_v46, 4 }
 0x1ba   : > { %v346_v48 = vmax.f32 %v344_v46, %v345_v47 }
 0x1bc   : > { %v347_v49 = vrot.slane %v346_v48, 2 }
 0x1be   : > { %v348_v50 = vmax.f32 %v346_v48, %v347_v49 }
 0x1c0   : > { %v349_v51 = vrot.slane %v348_v50, 1 }
 0x1c2   : > { %v350_v52 = vmax.f32 %v348_v50, %v349_v51 }
 0x1c4   : > { %352 = vst.msk [vmem:[%s253_s17] sm:$0x1] %vm351_vm8, %v350_v52 }
 0x1c5 PF: > { %s16_s18 = sadd.s32 1, %s482_s18  }
 0x1c6   : > { %p13_p4 = scmp.ge.s32.totalorder %s16_s18, 4  }
 0x1c8   :  { %15 = sbr.rel (!%p13_p4) target bundleno = 1 (0x1), region = 81 }

// kernel: soft_pooling_gcn_forward.22
= control target key start
LH: loop header
LB: loop body
LE: loop exit
PB: predicated region body
PF: predicated region fallthrough
CT: control target
= control target key end

     0   :  { %s550_s21 = smov 0   ;;  %s630_s0 = inlined_call_operand.vmem [shape: f32[2,16,16], index: 0, kind: input, shape index: {}]   ;;  %s631_s1 = inlined_call_operand.vmem [shape: f32[2,16,8], index: 1, kind: input, shape index: {}]   ;;  %s632_s2 = inlined_call_operand.vmem [shape: f32[8,32], index: 2, kind: input, shape index: {}]   ;;  %s633_s3 = inlined_call_operand.vmem [shape: f32[1,32], index: 3, kind: input, shape index: {}]   ;;  %s634_s4 = inlined_call_operand.vmem [shape: f32[2,16,32], index: 4, kind: output, shape index: {0}]   ;;  %s635_s5 = inlined_call_operand.vmem [shape: f32[16,1], index: 5, kind: output, shape index: {1}]   ;;  %s636_s6 = inlined_call_operand.vmem [shape: f32[16,1], index: 6, kind: output, shape index: {2}]  }
   0x1 LB: > { %s556_s22 = sadd.s32 4294967295, %s512_s21   ;;  %p477_p0 = scmp.ge.s32.totalorder %s512_s21, 1  ;;  %s512_s21 = sphi %s550_s21, %s17_s21  }
   0x2   : > { %p217_p1 = scmp.lt.s32.totalorder %s512_s21, 3 }
   0x4   : > { %p218_p2 = pnand %p477_p0, %p217_p1 }
   0x5   : > { %p252_p3 = scmp.lt.s32.totalorder (!%p218_p2), %s556_s22, 1  ;;  %p486_p4 = scmp.ne.s32.totalorder (!%p218_p2), %s556_s22, 0 }
   0x6   : > { %221 = sbr.rel (%p218_p2) target bundleno = 572 (0x23c), region = 36 }
   0xb   : > { %s253_s23 = scalar_select %p252_p3, %s556_s22, 1  ;;  %vm276_vm0 = vcmask 130048   ;;  %v274_v6 = vld [vmem:[%s632_s2] sm:$0xff]  ;;  %vm303_vm1 = vcmask 1043456   ;;  %vm299_vm2 = vcmask 64512   ;;  %vm323_vm3 = vcmask 261120  }
   0xc   : > { %v275_v7 = vpack.c.bf16 %v274_v6, %v274_v6  ;;  %v501_v12 = vld [vmem:[%s633_s3] ss:$0 sm:$0xff] }
   0xd   : > { %s562_s24 = sshll.u32 %s253_s23, 4 }
   0xe   : > { %s261_s27 = scalar_lea.vmem %s631_s1, %s562_s24  ;;  %s256_s30 = scalar_lea.vmem %s630_s0, %s562_s24  ;;  %v305_v8 = vsel %vm303_vm1, %v275_v7, 0 }
   0xf   : > { %v271_v0 = vld [vmem:[%s261_s27] sm:$0xff]  ;;  %v272_v1 = vld [vmem:[%s261_s27 + $0x8] sm:$0xff]  ;;  %314 = vmatpush.bf16.msra.mxu1 %v305_v8  ;;  %s266_s13 = scalar_lea.vmem %s634_s4, %s562_s24 }
  0x10   : > { %v273_v2 = vpack.c.bf16 %v272_v1, %v271_v0  ;;  %v268_v3 = vld [vmem:[%s256_s30] sm:$0xff]  ;;  %v269_v4 = vld [vmem:[%s256_s30 + $0x8] sm:$0xff] }
  0x11   : > { %v270_v5 = vpack.c.bf16 %v269_v4, %v268_v3 }
  0x12   : > { %287 = vmatpush.bf16.msra.mxu0 %v273_v2 }
  0x15   : > { %484 = vmatmul.msk.bf16.vlgmr.msra.gmra.mxu0 %vm276_vm0, %v270_v5 }
  0x92   : > { %v289_v9 = vpop.f32.mrf.mxu0 }
  0x9a   : > { %v291_v10 = vpop.f32.mrf.mxu0 }
  0x9b   : > { %v294_v11 = vpack.c.bf16 %v291_v10, %v289_v9 }
  0x9d   : > { %485 = vmatmul.msk.bf16.vlgmr.msra.gmra.mxu1 %vm299_vm2, %v294_v11 }
 0x11a   : > { %v316_v13 = vpop.f32.mrf.mxu1 }
 0x11b   : > { %v317_v14 = vadd.f32 %v501_v12, %v316_v13 }
 0x11d   : > { %v321_v15 = vmul.f32 %v317_v14, %v317_v14 }
 0x11f   : > { %v324_v16 = vsel %vm323_vm3, %v321_v15, 0.0 }
 0x120   : > { %325 = vadd.xlane.f32.xlu0 %v324_v16 }
 0x122   : > { %v318_v17 = vpop.f32.mrf.mxu1 }
 0x123   : > { %v319_v18 = vadd.f32 %v501_v12, %v318_v17 }
 0x125   : > { %v322_v19 = vmul.f32 %v319_v18, %v319_v18 }
 0x127   : > { %v327_v20 = vsel %vm323_vm3, %v322_v19, 0.0 }
 0x128   : > { %328 = vadd.xlane.f32.xlu0 %v327_v20 }
 0x193   : > { %v326_v21 = vpop.xlane.xlu0 %325 }
 0x194   : > { %v330_v22 = vmax.f32 %v326_v21, 1e-24 }
 0x196   : > { %502 = vrsqrt.f32 %v330_v22  ;;  %vm338_vm5 = vweird.f32 %v330_v22 }
 0x19b   : > { %v329_v23 = vpop.xlane.xlu0 %328 }
 0x19c   : > { %v503_v24 = vpop.eup %502  ;;  %v331_v25 = vmax.f32 %v329_v23, 1e-24 }
 0x19d   : > { %v333_v26 = vmul.f32 %v503_v24, %v330_v22  ;;  %vm339_vm4 = vweird.f32 %v503_v24 }
 0x19e   : > { %504 = vrsqrt.f32 %v331_v25  ;;  %vm340_vm6 = vmor %vm338_vm5, %vm339_vm4  ;;  %vm348_vm8 = vweird.f32 %v331_v25 }
 0x19f   : > { %v334_v27 = vmul.f32 %v503_v24, %v333_v26 }
 0x1a1   : > { %v335_v28 = vmul.f32 0.5, %v334_v27 }
 0x1a3   : > { %v336_v29 = vsub.f32 1.5, %v335_v28 }
 0x1a4   : > { %v505_v30 = vpop.eup %504 }
 0x1a5   : > { %v337_v31 = vmul.f32 %v503_v24, %v336_v29  ;;  %v343_v32 = vmul.f32 %v505_v30, %v331_v25  ;;  %vm349_vm7 = vweird.f32 %v505_v30 }
 0x1a6   : > { %vm350_vm9 = vmor %vm348_vm8, %vm349_vm7 }
 0x1a7   : > { %v341_v33 = vsel %vm340_vm6, %v503_v24, %v337_v31  ;;  %v344_v34 = vmul.f32 %v505_v30, %v343_v32 }
 0x1a8   : > { %v352_v35 = vmul.f32 %v341_v33, %v317_v14 }
 0x1a9   : > { %v345_v36 = vmul.f32 0.5, %v344_v34 }
 0x1aa   : > { %v354_v37 = vmax.f32 %v352_v35, 0.0 }
 0x1ab   : > { %v346_v38 = vsub.f32 1.5, %v345_v36 }
 0x1ac   : > { %356 = vst.msk [vmem:[%s266_s13] sm:$0xff] %vm323_vm3, %v354_v37 }
 0x1ad   : > { %v347_v39 = vmul.f32 %v505_v30, %v346_v38 }
 0x1af   : > { %v351_v40 = vsel %vm350_vm9, %v505_v30, %v347_v39 }
 0x1b0   : > { %v353_v41 = vmul.f32 %v351_v40, %v319_v18  ;;  %361 = sbr.rel (%p486_p4) target bundleno = 442 (0x1ba), region = 40 }
 0x1b2   : > { %v355_v42 = vmax.f32 %v353_v41, 0.0 }
 0x1b4   : > { %357 = vst.msk [vmem:[%s266_s13 + $0x8] sm:$0xff] %vm323_vm3, %v355_v42 }
 0x1b5   : > { %vm362_vm10 = vcmask 7168   ;;  %v514_v43 = vmov 0.0  }
 0x1b6   : > { %363 = vst.msk [vmem:[%s635_s5] sm:$0xff] %vm362_vm10, %v514_v43 }
 0x1b7   : > { %364 = vst.msk [vmem:[%s635_s5 + $0x8] sm:$0xff] %vm362_vm10, %v514_v43 }
 0x1b8   : > { %365 = vst.msk [vmem:[%s636_s6] sm:$0xff] %vm362_vm10, %v514_v43 }
 0x1b9   : > { %366 = vst.msk [vmem:[%s636_s6 + $0x8] sm:$0xff] %vm362_vm10, %v514_v43 }
 0x1ba PF: > { %v382_v44 = vmul.f32 %v354_v37, %v354_v37  ;;  %v369_v45 = vsel %vm323_vm3, %v354_v37, 0.0  ;;  %v383_v47 = vmul.f32 %v355_v42, %v355_v42  ;;  %v372_v48 = vsel %vm323_vm3, %v355_v42, 0.0 }
 0x1bb   : > { %370 = vadd.xlane.f32.xlu0 %v369_v45  ;;  %vm377_vm11 = vcmask 7168  }
 0x1bc   : > { %v384_v46 = vsel %vm323_vm3, %v382_v44, 0.0  ;;  %v387_v49 = vsel %vm323_vm3, %v383_v47, 0.0 }
 0x1bd   : > { %385 = vadd.xlane.f32.xlu1 %v384_v46  ;;  %v367_v50 = vld [vmem:[%s635_s5] sm:$0xff] }
 0x1be   : > { %v368_v56 = vld [vmem:[%s635_s5 + $0x8] sm:$0xff] }
 0x1bf   : > { %v380_v51 = vld [vmem:[%s636_s6] sm:$0xff] }
 0x1c0   : > { %v381_v57 = vld [vmem:[%s636_s6 + $0x8] sm:$0xff] }
 0x1c3   : > { %373 = vadd.xlane.f32.xlu0 %v372_v48 }
 0x1c5   : > { %388 = vadd.xlane.f32.xlu1 %v387_v49 }
 0x22e   : > { %v371_v52 = vpop.xlane.xlu0 %370 }
 0x22f   : > { %v375_v53 = vadd.f32 %v371_v52, %v367_v50 }
 0x230   : > { %v386_v54 = vpop.xlane.xlu1 %385 }
 0x231   : > { %v390_v55 = vadd.f32 %v386_v54, %v380_v51  ;;  %378 = vst.msk [vmem:[%s635_s5] sm:$0xff] %vm377_vm11, %v375_v53 }
 0x233   : > { %392 = vst.msk [vmem:[%s636_s6] sm:$0xff] %vm377_vm11, %v390_v55 }
 0x236   : > { %v374_v58 = vpop.xlane.xlu0 %373 }
 0x237   : > { %v376_v59 = vadd.f32 %v374_v58, %v368_v56 }
 0x238   : > { %v389_v60 = vpop.xlane.xlu1 %388 }
 0x239   : > { %v391_v61 = vadd.f32 %v389_v60, %v381_v57  ;;  %379 = vst.msk [vmem:[%s635_s5 + $0x8] sm:$0xff] %vm377_vm11, %v376_v59 }
 0x23b   : > { %393 = vst.msk [vmem:[%s636_s6 + $0x8] sm:$0xff] %vm377_vm11, %v391_v61 }
 0x23c PF: > { %s17_s21 = sadd.s32 1, %s512_s21  }
 0x23d   : > { %p14_p5 = scmp.ge.s32.totalorder %s17_s21, 4  }
 0x23f   :  { %16 = sbr.rel (!%p14_p5) target bundleno = 1 (0x1), region = 89 }

// kernel: soft_pooling_gcn_forward.23
= control target key start
LH: loop header
LB: loop body
LE: loop exit
PB: predicated region body
PF: predicated region fallthrough
CT: control target
= control target key end

     0   :  { %10 = vsyncpa [#allocation3], 0  ;;  %s633_s0 = inlined_call_operand.vmem [shape: f32[2,16,32], index: 0, kind: input, shape index: {}]   ;;  %s634_s1 = inlined_call_operand.vmem [shape: f32[16,1], index: 1, kind: input, shape index: {}]   ;;  %s635_s2 = inlined_call_operand.vmem [shape: f32[16,1], index: 2, kind: input, shape index: {}]   ;;  %s636_s3 = inlined_call_operand.vmem [shape: f32[2,16,32], index: 3, kind: output, shape index: {0}]   ;;  %s637_s4 = inlined_call_operand.hbm [shape: f32[2,1,32], index: 4, kind: output, shape index: {1}]  }
   0x1   :  { %12 = vsyncpa [#allocation3 + $0x1], 0  ;;  %s533_s15 = smov 0   ;;  %s535_s16 = smov 0  }
   0x2   :  { %s537_s17 = smov 0   ;;  %s539_s18 = smov 0  }
   0x3 LB: > { %s554_s19 = sadd.s32 4294967295, %s505_s18   ;;  %s385_s20 = sadd.s32 4294967294, %s505_s18   ;;  %s505_s18 = sphi %s539_s18, %s643_s18   ;;  %s501_s17 = sphi %s537_s17, %s642_s17   ;;  %s497_s16 = sphi %s535_s16, %s641_s16   ;;  %s493_s15 = sphi %s533_s15, %s640_s15  }
   0x4   : > { %s558_s21 = sadd.s32 1, %s505_s18   ;;  %s119_s22 = sadd.s32 1, %s501_s17 }
   0x5   : > { %s116_s23 = ssub.s32 %s505_s18, %s558_s21  ;;  %p129_p0 = scmp.ne.s32.totalorder %s501_s17, %s497_s16 }
   0x6   : > { %p117_p1 = scmp.eq.s32.totalorder %s116_s23, 0  ;;  %p130_p2 = scmp.eq.s32.totalorder %s554_s19, 1 }
   0x7   : > { %p135_p3 = scmp.ne.s32.totalorder %s497_s16, %s493_s15  ;;  %p136_p4 = scmp.eq.s32.totalorder %s385_s20, 1 }
   0x8   : > { %s569_s24 = scalar_select %p117_p1, %s501_s17, %s119_s22  }
   0x9   : > { %p571_p5 = por %p130_p2, %p129_p0  ;;  %p575_p6 = por %p136_p4, %p135_p3 }
   0xa   : > { %p388_p7 = scmp.ge.s32.totalorder %s505_s18, 1  ;;  %p168_p8 = scmp.lt.s32.totalorder %s505_s18, 3 }
   0xc   : > { %p169_p9 = pnand %p388_p7, %p168_p8 }
   0xd   : > { %p198_p10 = scmp.lt.s32.totalorder (!%p169_p9), %s554_s19, 1  ;;  %s196_s23 = sand.u32 (!%p169_p9), 1, %s497_s16  }
   0xe   : > { %172 = sbr.rel (%p169_p9) target bundleno = 191 (0xbf), region = 32  ;;  %s301_s29 = scalar_lea.hbm (!%p169_p9), %s637_s4, %s554_s19 }
   0xf   : > { %s197_s30 = scalar_lea.vmem (!%p169_p9), [#allocation2], %s196_s23  ;;  %s305_s6 = sshll.u32 (!%p169_p9), %s301_s29, 4  ;;  %s306_s6 = int_to_ptr.hbm [resolvable:$true] %s305_s6 }
  0x10   : > { %s303_s5 = sshll.u32 (!%p169_p9), %s197_s30, 4  ;;  %s290_s7 = scalar_lea.sflag (!%p169_p9), [#allocation3], %s196_s23  ;;  %s304_s5 = int_to_ptr.vmem [resolvable:$true] %s303_s5 }
  0x11   : > { %s457_s8 = sshra.s32 (!%p169_p9), %s306_s6, 4  ;;  %s463_s11 = scalar_lea.hbm (!%p169_p9), %s637_s4, 2  ;;  %s458_s8 = int_to_ptr.hbm [resolvable:$true] %s457_s8 }
  0x12   : > { %p464_p0 = scmp.lt.s32.totalorder (!%p169_p9), %s458_s8, %s637_s4 }
  0x13   : > { %v210_v0 = vld [vmem:[%s634_s1] sm:$0xff]  ;;  %v211_v2 = vld [vmem:[%s634_s1 + $0x8] sm:$0xff]  ;;  %v507_v3 = vmov 0   ;;  %s199_s9 = scalar_select %p198_p10, %s554_s19, 1  ;;  %vm270_vm6 = vcmask 261120   ;;  %vm282_vm7 = vcmask 253952  }
  0x14   : > { %v214_v1 = vld [vmem:[%s635_s2] sm:$0xff]  ;;  %437 = vset.pattern.permute.xlu0 %v507_v3  ;;  %v212_v4 = vmul.f32 0.015625, %v210_v0  ;;  %v213_v6 = vmul.f32 0.015625, %v211_v2  ;;  %v215_v7 = vld [vmem:[%s635_s2 + $0x8] sm:$0xff]  ;;  %438 = vset.pattern.permute.xlu1 %v507_v3 }
  0x15   : > { %v216_v5 = vmul.f32 0.015625, %v214_v1  ;;  %v217_v8 = vmul.f32 0.015625, %v215_v7  ;;  %s395_s10 = sshll.u32 %s199_s9, 4  ;;  %s459_s9 = scalar_lea.hbm %s458_s8, 1 }
  0x16   : > { %248 = vperm.xlu0 %437, %v212_v4   ;;  %v218_v9 = vmul.f32 %v212_v4, %v212_v4  ;;  %v219_v10 = vmul.f32 %v213_v6, %v213_v6  ;;  %s202_s13 = scalar_lea.vmem %s633_s0, %s395_s10  ;;  %s207_s22 = scalar_lea.vmem %s636_s3, %s395_s10 }
  0x17   : > { %v208_v32 = vld [vmem:[%s202_s13] sm:$0xff]  ;;  %v209_v37 = vld [vmem:[%s202_s13 + $0x8] sm:$0xff]  ;;  %p460_p11 = scmp.ne.s32.totalorder %s458_s8, %s459_s9  ;;  %p465_p1 = scmp.lt.s32.totalorder %s463_s11, %s459_s9 }
  0x18   : > { %v220_v11 = vsub.f32 %v216_v5, %v218_v9  ;;  %v221_v12 = vsub.f32 %v217_v8, %v219_v10 }
  0x19   : > { %p461_p12 = pnand %p460_p11, %p571_p5  ;;  %p466_p2 = por %p465_p1, %p464_p0 }
  0x1a   : > { %v222_v13 = vmax.f32 %v220_v11, 0.0  ;;  %v223_v14 = vmax.f32 %v221_v12, 0.0 }
  0x1b   : > { %p462_p13 = pneg %p461_p12 }
  0x1c   : > { %v224_v15 = vadd.f32 1e-05, %v222_v13  ;;  %v225_v16 = vadd.f32 1e-05, %v223_v14 }
  0x1d   : > { %p467_p3 = pnand %p466_p2, %p462_p13 }
  0x1e   : > { %439 = vrsqrt.f32 %v224_v15  ;;  %253 = vperm.xlu0 %437, %v213_v6   ;;  %vm232_vm0 = vweird.f32 %v224_v15  ;;  %vm242_vm3 = vweird.f32 %v225_v16 }
  0x1f   : > { %441 = vrsqrt.f32 %v225_v16 }
  0x24   : > { %v440_v17 = vpop.eup %439 }
  0x25   : > { %v442_v18 = vpop.eup %441  ;;  %v227_v19 = vmul.f32 %v440_v17, %v224_v15  ;;  %vm233_vm1 = vweird.f32 %v440_v17 }
  0x26   : > { %v237_v20 = vmul.f32 %v442_v18, %v225_v16  ;;  %vm234_vm2 = vmor %vm232_vm0, %vm233_vm1  ;;  %vm243_vm4 = vweird.f32 %v442_v18 }
  0x27   : > { %v228_v21 = vmul.f32 %v440_v17, %v227_v19  ;;  %vm244_vm5 = vmor %vm242_vm3, %vm243_vm4 }
  0x28   : > { %v238_v22 = vmul.f32 %v442_v18, %v237_v20 }
  0x29   : > { %v229_v23 = vmul.f32 0.5, %v228_v21 }
  0x2a   : > { %v239_v24 = vmul.f32 0.5, %v238_v22 }
  0x2b   : > { %v230_v25 = vsub.f32 1.5, %v229_v23 }
  0x2c   : > { %v240_v27 = vsub.f32 1.5, %v239_v24 }
  0x2d   : > { %v231_v26 = vmul.f32 %v440_v17, %v230_v25 }
  0x2e   : > { %v241_v29 = vmul.f32 %v442_v18, %v240_v27 }
  0x2f   : > { %v235_v28 = vsel %vm234_vm2, %v440_v17, %v231_v26 }
  0x30   : > { %260 = vperm.xlu1 %438, %v235_v28   ;;  %v245_v30 = vsel %vm244_vm5, %v442_v18, %v241_v29 }
  0x38   : > { %265 = vperm.xlu1 %438, %v245_v30  }
  0x88   : > { %v249_v31 = vpop.permute.xlu0 %248 }
  0x89   : > { %v256_v33 = vsub.f32 %v208_v32, %v249_v31 }
  0x90   : > { %v254_v36 = vpop.permute.xlu0 %253 }
  0x91   : > { %v257_v38 = vsub.f32 %v209_v37, %v254_v36 }
  0xa2   : > { %v261_v34 = vpop.permute.xlu1 %260 }
  0xa3   : > { %v268_v35 = vmul.f32 %v261_v34, %v256_v33 }
  0xa5   : > { %271 = vst.msk [vmem:[%s207_s22] sm:$0xff] %vm270_vm6, %v268_v35  ;;  %v273_v41 = vsel %vm270_vm6, %v268_v35, -inf }
  0xaa   : > { %v266_v39 = vpop.permute.xlu1 %265 }
  0xab   : > { %v269_v40 = vmul.f32 %v266_v39, %v257_v38 }
  0xad   : > { %272 = vst.msk [vmem:[%s207_s22 + $0x8] sm:$0xff] %vm270_vm6, %v269_v40  ;;  %v274_v42 = vsel %vm270_vm6, %v269_v40, -inf }
  0xae   : > { %v275_v43 = vmax.f32 %v273_v41, %v274_v42 }
  0xb0   : > { %v276_v44 = vrot.slane %v275_v43, 4 }
  0xb2   : > { %v277_v45 = vmax.f32 %v275_v43, %v276_v44 }
  0xb4   : > { %v278_v46 = vrot.slane %v277_v45, 2 }
  0xb6   : > { %v279_v47 = vmax.f32 %v277_v45, %v278_v46 }
  0xb8   : > { %v280_v48 = vrot.slane %v279_v47, 1 }
  0xba   : > { %v281_v49 = vmax.f32 %v279_v47, %v280_v48 }
  0xbc   : > { %283 = vst.msk [vmem:[%s197_s30] sm:$0x1] %vm282_vm7, %v281_v49 }
  0xbd   : > { %470 = shalt.err (!%p467_p3)
}
  0xbe   : > { %397 = dma.vmem_to_hbm [thread:$0]  (%p571_p5), %s304_s5, 16, %s306_s6, %s290_s7  }
  0xbf PF: > { %p403_p4 = scmp.ge.s32.totalorder %s505_s18, 2  ;;  %s325_s14 = sand.u32 1, %s493_s15  }
  0xc0   : > { %s326_s20 = scalar_lea.sflag [#allocation3], %s325_s14 }
  0xc1   : > { %p400_p7 = pnand %p403_p4, %p575_p6 }
  0xc3   : > { %p401_p8 = pneg %p400_p7 }
  0xc5   : > { %488 = dma.done.wait (%p401_p8), %s326_s20, 16  }
  0xc6   : > { %490 = vsyncadd (%p401_p8), %s326_s20, 4294967280  ;;  %p15_p9 = scmp.ge.s32.totalorder %s558_s21, 4   ;;  %s640_s15 = smov %s497_s16 }
  0xc7   : > { %s641_s16 = smov %s501_s17  ;;  %s642_s17 = smov %s569_s24 }
  0xc8   : > { %s643_s18 = smov %s558_s21  ;;  %17 = sbr.rel (!%p15_p9) target bundleno = 3 (0x3), region = 79 }
  0xcd   :  { %331 = vsyncpa [#allocation3], 1 }
  0xce   :  { %333 = vsyncpa [#allocation3 + $0x1], 1 }

// kernel: soft_pooling_gcn_forward.26
= control target key start
LH: loop header
LB: loop body
LE: loop exit
PB: predicated region body
PF: predicated region fallthrough
CT: control target
= control target key end

     0   :  { %11 = vsyncpa [#allocation3], 0  ;;  %s740_s0 = inlined_call_operand.vmem [shape: f32[2,16,16], index: 0, kind: input, shape index: {}]   ;;  %s741_s1 = inlined_call_operand.vmem [shape: f32[2,16,32], index: 1, kind: input, shape index: {}]   ;;  %s742_s2 = inlined_call_operand.vmem [shape: f32[32,4], index: 2, kind: input, shape index: {}]   ;;  %s743_s3 = inlined_call_operand.vmem [shape: f32[1,4], index: 3, kind: input, shape index: {}]   ;;  %s744_s4 = inlined_call_operand.vmem [shape: f32[2,16,4], index: 4, kind: output, shape index: {0}]   ;;  %s745_s5 = inlined_call_operand.hbm [shape: f32[2,1,4], index: 5, kind: output, shape index: {1}]  }
   0x1   :  { %13 = vsyncpa [#allocation3 + $0x1], 0  ;;  %s623_s18 = smov 0   ;;  %s625_s19 = smov 0  }
   0x2   :  { %s627_s20 = smov 0   ;;  %s629_s21 = smov 0  }
   0x3 LB: > { %s644_s22 = sadd.s32 4294967295, %s591_s21   ;;  %s468_s23 = sadd.s32 4294967294, %s591_s21   ;;  %s591_s21 = sphi %s629_s21, %s751_s21   ;;  %s587_s20 = sphi %s627_s20, %s750_s20   ;;  %s583_s19 = sphi %s625_s19, %s749_s19   ;;  %s579_s18 = sphi %s623_s18, %s748_s18  }
   0x4   : > { %s648_s24 = sadd.s32 1, %s591_s21   ;;  %s146_s25 = sadd.s32 1, %s587_s20 }
   0x5   : > { %s143_s26 = ssub.s32 %s591_s21, %s648_s24  ;;  %p156_p0 = scmp.ne.s32.totalorder %s587_s20, %s583_s19 }
   0x6   : > { %p144_p1 = scmp.eq.s32.totalorder %s143_s26, 0  ;;  %p157_p2 = scmp.eq.s32.totalorder %s644_s22, 1 }
   0x7   : > { %p162_p3 = scmp.ne.s32.totalorder %s583_s19, %s579_s18  ;;  %p163_p4 = scmp.eq.s32.totalorder %s468_s23, 1 }
   0x8   : > { %s659_s27 = scalar_select %p144_p1, %s587_s20, %s146_s25  }
   0x9   : > { %p661_p5 = por %p157_p2, %p156_p0  ;;  %p665_p6 = por %p163_p4, %p162_p3 }
   0xa   : > { %p471_p7 = scmp.ge.s32.totalorder %s591_s21, 1  ;;  %p203_p8 = scmp.lt.s32.totalorder %s591_s21, 3 }
   0xc   : > { %p204_p9 = pnand %p471_p7, %p203_p8 }
   0xd   : > { %p240_p10 = scmp.lt.s32.totalorder (!%p204_p9), %s644_s22, 1  ;;  %s238_s10 = sand.u32 (!%p204_p9), 1, %s583_s19  }
   0xe   : > { %207 = sbr.rel (%p204_p9) target bundleno = 463 (0x1cf), region = 36  ;;  %s549_s30 = scalar_lea.hbm (!%p204_p9), %s745_s5, 2 }
  0x13   : > { %v264_v0 = vld [vmem:[%s742_s2 + $0x10] sm:$0xff]  ;;  %v265_v1 = vld [vmem:[%s742_s2 + $0x18] sm:$0xff]  ;;  %v262_v2 = vld [vmem:[%s742_s2] sm:$0xff]  ;;  %s241_s13 = scalar_select %p240_p10, %s644_s22, 1  ;;  %vm268_vm0 = vcmask 261120   ;;  %vm291_vm1 = vcmask 130048  }
  0x14   : > { %v267_v3 = vpack.c.bf16 %v265_v1, %v264_v0  ;;  %v263_v4 = vld [vmem:[%s742_s2 + $0x8] sm:$0xff]  ;;  %v524_v15 = vld [vmem:[%s743_s3] ss:$0 sm:$0xff]  ;;  %vm311_vm2 = vcmask 31744   ;;  %vm353_vm9 = vcmask 24576  }
  0x15   : > { %v266_v5 = vpack.c.bf16 %v263_v4, %v262_v2  ;;  %s685_s14 = sshll.u32 %s241_s13, 4  ;;  %s372_s13 = scalar_lea.hbm %s745_s5, %s644_s22 }
  0x16   : > { %278 = vmatpush.bf16.msra.mxu0 %v267_v3  ;;  %s249_s17 = scalar_lea.vmem %s741_s1, %s685_s14  ;;  %s244_s26 = scalar_lea.vmem %s740_s0, %s685_s14 }
  0x17   : > { %v259_v6 = vld [vmem:[%s249_s17] sm:$0xff]  ;;  %v260_v7 = vld [vmem:[%s249_s17 + $0x8] sm:$0xff]  ;;  %s254_s9 = scalar_lea.vmem %s744_s4, %s685_s14  ;;  %s239_s14 = scalar_lea.vmem [#allocation2], %s238_s10 }
  0x18   : > { %v261_v8 = vpack.c.bf16 %v260_v7, %v259_v6  ;;  %v256_v10 = vld [vmem:[%s244_s26] sm:$0xff]  ;;  %v257_v11 = vld [vmem:[%s244_s26 + $0x8] sm:$0xff]  ;;  %s374_s15 = sshll.u32 %s239_s14, 4  ;;  %s376_s16 = sshll.u32 %s372_s13, 4  ;;  %s375_s15 = int_to_ptr.vmem [resolvable:$true] %s374_s15  ;;  %s377_s16 = int_to_ptr.hbm [resolvable:$true] %s376_s16 }
  0x19   : > { %v258_v14 = vpack.c.bf16 %v257_v11, %v256_v10  ;;  %s361_s17 = scalar_lea.sflag [#allocation3], %s238_s10  ;;  %s543_s23 = sshra.s32 %s377_s16, 4  ;;  %s544_s23 = int_to_ptr.hbm [resolvable:$true] %s543_s23 }
  0x1a   : > { %279 = vmatpush.bf16.msra.mxu0 %v266_v5  ;;  %s545_s25 = scalar_lea.hbm %s544_s23, 1  ;;  %p550_p0 = scmp.lt.s32.totalorder %s544_s23, %s745_s5 }
  0x1b   : > { %p546_p11 = scmp.ne.s32.totalorder %s544_s23, %s545_s25  ;;  %p551_p1 = scmp.lt.s32.totalorder %s549_s30, %s545_s25 }
  0x1d   : > { %478 = vmatmul.msk.bf16.vlgmr.msra.gmra.mxu0 %vm268_vm0, %v261_v8  ;;  %p547_p12 = pnand %p546_p11, %p661_p5  ;;  %p552_p2 = por %p551_p1, %p550_p0 }
  0x1f   : > { %p548_p13 = pneg %p547_p12 }
  0x21   : > { %p553_p3 = pnand %p552_p2, %p548_p13 }
  0x9a   : > { %v281_v9 = vpop.f32.mrf.mxu0 }
  0xa2   : > { %v283_v12 = vpop.f32.mrf.mxu0 }
  0xa3   : > { %v286_v13 = vpack.c.bf16 %v283_v12, %v281_v9 }
  0xa5   : > { %302 = vmatpush.bf16.msra.mxu1 %v286_v13 }
  0xa8   : > { %479 = vmatmul.msk.bf16.vlgmr.msra.gmra.mxu1 %vm291_vm1, %v258_v14 }
 0x125   : > { %v304_v16 = vpop.f32.mrf.mxu1 }
 0x126   : > { %v305_v17 = vadd.f32 %v524_v15, %v304_v16 }
 0x128   : > { %v309_v18 = vmul.f32 %v305_v17, %v305_v17 }
 0x12a   : > { %v312_v19 = vsel %vm311_vm2, %v309_v18, 0.0 }
 0x12b   : > { %313 = vadd.xlane.f32.xlu0 %v312_v19 }
 0x12d   : > { %v306_v20 = vpop.f32.mrf.mxu1 }
 0x12e   : > { %v307_v21 = vadd.f32 %v524_v15, %v306_v20 }
 0x130   : > { %v310_v22 = vmul.f32 %v307_v21, %v307_v21 }
 0x132   : > { %v315_v23 = vsel %vm311_vm2, %v310_v22, 0.0 }
 0x133   : > { %316 = vadd.xlane.f32.xlu0 %v315_v23 }
 0x19e   : > { %v314_v24 = vpop.xlane.xlu0 %313 }
 0x19f   : > { %v318_v25 = vmax.f32 %v314_v24, 1e-24 }
 0x1a1   : > { %525 = vrsqrt.f32 %v318_v25  ;;  %vm326_vm4 = vweird.f32 %v318_v25 }
 0x1a6   : > { %v317_v26 = vpop.xlane.xlu0 %316 }
 0x1a7   : > { %v526_v27 = vpop.eup %525  ;;  %v319_v28 = vmax.f32 %v317_v26, 1e-24 }
 0x1a8   : > { %v321_v29 = vmul.f32 %v526_v27, %v318_v25  ;;  %vm327_vm3 = vweird.f32 %v526_v27 }
 0x1a9   : > { %527 = vrsqrt.f32 %v319_v28  ;;  %vm328_vm5 = vmor %vm326_vm4, %vm327_vm3  ;;  %vm336_vm7 = vweird.f32 %v319_v28 }
 0x1aa   : > { %v322_v30 = vmul.f32 %v526_v27, %v321_v29 }
 0x1ac   : > { %v323_v31 = vmul.f32 0.5, %v322_v30 }
 0x1ae   : > { %v324_v32 = vsub.f32 1.5, %v323_v31 }
 0x1af   : > { %v528_v33 = vpop.eup %527 }
 0x1b0   : > { %v325_v34 = vmul.f32 %v526_v27, %v324_v32  ;;  %v331_v35 = vmul.f32 %v528_v33, %v319_v28  ;;  %vm337_vm6 = vweird.f32 %v528_v33 }
 0x1b1   : > { %vm338_vm8 = vmor %vm336_vm7, %vm337_vm6 }
 0x1b2   : > { %v329_v36 = vsel %vm328_vm5, %v526_v27, %v325_v34  ;;  %v332_v37 = vmul.f32 %v528_v33, %v331_v35 }
 0x1b3   : > { %v340_v38 = vmul.f32 %v329_v36, %v305_v17 }
 0x1b4   : > { %v333_v39 = vmul.f32 0.5, %v332_v37 }
 0x1b5   : > { %342 = vst.msk [vmem:[%s254_s9] sm:$0xff] %vm311_vm2, %v340_v38  ;;  %v344_v44 = vsel %vm311_vm2, %v340_v38, -inf }
 0x1b6   : > { %v334_v40 = vsub.f32 1.5, %v333_v39 }
 0x1b8   : > { %v335_v41 = vmul.f32 %v528_v33, %v334_v40 }
 0x1ba   : > { %v339_v42 = vsel %vm338_vm8, %v528_v33, %v335_v41 }
 0x1bb   : > { %v341_v43 = vmul.f32 %v339_v42, %v307_v21 }
 0x1bd   : > { %343 = vst.msk [vmem:[%s254_s9 + $0x8] sm:$0xff] %vm311_vm2, %v341_v43  ;;  %v345_v45 = vsel %vm311_vm2, %v341_v43, -inf }
 0x1be   : > { %v346_v46 = vmax.f32 %v344_v44, %v345_v45 }
 0x1c0   : > { %v347_v47 = vrot.slane %v346_v46, 4 }
 0x1c2   : > { %v348_v48 = vmax.f32 %v346_v46, %v347_v47 }
 0x1c4   : > { %v349_v49 = vrot.slane %v348_v48, 2 }
 0x1c6   : > { %v350_v50 = vmax.f32 %v348_v48, %v349_v49 }
 0x1c8   : > { %v351_v51 = vrot.slane %v350_v50, 1 }
 0x1ca   : > { %v352_v52 = vmax.f32 %v350_v50, %v351_v51 }
 0x1cc   : > { %354 = vst.msk [vmem:[%s239_s14] sm:$0x1] %vm353_vm9, %v352_v52 }
 0x1cd   : > { %556 = shalt.err (!%p553_p3)
}
 0x1ce   : > { %485 = dma.vmem_to_hbm [thread:$0]  (%p661_p5), %s375_s15, 16, %s377_s16, %s361_s17  }
 0x1cf PF: > { %p491_p4 = scmp.ge.s32.totalorder %s591_s21, 2  ;;  %s396_s8 = sand.u32 1, %s579_s18  }
 0x1d0   : > { %s397_s9 = scalar_lea.sflag [#allocation3], %s396_s8 }
 0x1d1   : > { %p488_p7 = pnand %p491_p4, %p665_p6 }
 0x1d3   : > { %p489_p8 = pneg %p488_p7 }
 0x1d5   : > { %574 = dma.done.wait (%p489_p8), %s397_s9, 16  }
 0x1d6   : > { %576 = vsyncadd (%p489_p8), %s397_s9, 4294967280  ;;  %p16_p9 = scmp.ge.s32.totalorder %s648_s24, 4   ;;  %s748_s18 = smov %s583_s19 }
 0x1d7   : > { %s749_s19 = smov %s587_s20  ;;  %s750_s20 = smov %s659_s27 }
 0x1d8   : > { %s751_s21 = smov %s648_s24  ;;  %18 = sbr.rel (!%p16_p9) target bundleno = 3 (0x3), region = 86 }
 0x1dd   :  { %402 = vsyncpa [#allocation3], 1 }
 0x1de   :  { %404 = vsyncpa [#allocation3 + $0x1], 1 }

// kernel: soft_pooling_gcn_forward.24
= control target key start
LH: loop header
LB: loop body
LE: loop exit
PB: predicated region body
PF: predicated region fallthrough
CT: control target
= control target key end

     0   :  { %s549_s21 = smov 0   ;;  %s639_s0 = inlined_call_operand.vmem [shape: f32[2,16,16], index: 0, kind: input, shape index: {}]   ;;  %s640_s1 = inlined_call_operand.vmem [shape: f32[2,16,32], index: 1, kind: input, shape index: {}]   ;;  %s641_s2 = inlined_call_operand.vmem [shape: f32[32,32], index: 2, kind: input, shape index: {}]   ;;  %s642_s3 = inlined_call_operand.vmem [shape: f32[1,32], index: 3, kind: input, shape index: {}]   ;;  %s643_s4 = inlined_call_operand.vmem [shape: f32[2,16,32], index: 4, kind: output, shape index: {0}]   ;;  %s644_s5 = inlined_call_operand.vmem [shape: f32[16,1], index: 5, kind: output, shape index: {1}]   ;;  %s645_s6 = inlined_call_operand.vmem [shape: f32[16,1], index: 6, kind: output, shape index: {2}]  }
   0x1 LB: > { %s555_s22 = sadd.s32 4294967295, %s511_s21   ;;  %p476_p0 = scmp.ge.s32.totalorder %s511_s21, 1  ;;  %s511_s21 = sphi %s549_s21, %s17_s21  }
   0x2   : > { %p217_p1 = scmp.lt.s32.totalorder %s511_s21, 3 }
   0x4   : > { %p218_p2 = pnand %p476_p0, %p217_p1 }
   0x5   : > { %p252_p3 = scmp.lt.s32.totalorder (!%p218_p2), %s555_s22, 1  ;;  %p485_p4 = scmp.ne.s32.totalorder (!%p218_p2), %s555_s22, 0 }
   0x6   : > { %221 = sbr.rel (%p218_p2) target bundleno = 572 (0x23c), region = 36 }
   0xb   : > { %s253_s23 = scalar_select %p252_p3, %s555_s22, 1  ;;  %vm280_vm0 = vcmask 130048   ;;  %v276_v6 = vld [vmem:[%s641_s2 + $0x10] sm:$0xff]  ;;  %v277_v7 = vld [vmem:[%s641_s2 + $0x18] sm:$0xff]  ;;  %v274_v9 = vld [vmem:[%s641_s2] sm:$0xff]  ;;  %vm303_vm1 = vcmask 261120  }
   0xc   : > { %v279_v8 = vpack.c.bf16 %v277_v7, %v276_v6  ;;  %v275_v10 = vld [vmem:[%s641_s2 + $0x8] sm:$0xff]  ;;  %v500_v15 = vld [vmem:[%s642_s3] ss:$0 sm:$0xff] }
   0xd   : > { %s561_s24 = sshll.u32 %s253_s23, 4  ;;  %v278_v11 = vpack.c.bf16 %v275_v10, %v274_v9 }
   0xe   : > { %s261_s27 = scalar_lea.vmem %s640_s1, %s561_s24  ;;  %s256_s30 = scalar_lea.vmem %s639_s0, %s561_s24  ;;  %313 = vmatpush.bf16.msra.mxu1 %v279_v8 }
   0xf   : > { %v271_v0 = vld [vmem:[%s261_s27] sm:$0xff]  ;;  %v272_v1 = vld [vmem:[%s261_s27 + $0x8] sm:$0xff]  ;;  %s266_s19 = scalar_lea.vmem %s643_s4, %s561_s24 }
  0x10   : > { %v273_v2 = vpack.c.bf16 %v272_v1, %v271_v0  ;;  %v268_v3 = vld [vmem:[%s256_s30] sm:$0xff]  ;;  %v269_v4 = vld [vmem:[%s256_s30 + $0x8] sm:$0xff] }
  0x11   : > { %v270_v5 = vpack.c.bf16 %v269_v4, %v268_v3 }
  0x12   : > { %291 = vmatpush.bf16.msra.mxu0 %v273_v2  ;;  %314 = vmatpush.bf16.msra.mxu1 %v278_v11 }
  0x15   : > { %483 = vmatmul.msk.bf16.vlgmr.msra.gmra.mxu0 %vm280_vm0, %v270_v5 }
  0x92   : > { %v293_v12 = vpop.f32.mrf.mxu0 }
  0x9a   : > { %v295_v13 = vpop.f32.mrf.mxu0 }
  0x9b   : > { %v298_v14 = vpack.c.bf16 %v295_v13, %v293_v12 }
  0x9d   : > { %484 = vmatmul.msk.bf16.vlgmr.msra.gmra.mxu1 %vm303_vm1, %v298_v14 }
 0x11a   : > { %v316_v16 = vpop.f32.mrf.mxu1 }
 0x11b   : > { %v317_v17 = vadd.f32 %v500_v15, %v316_v16 }
 0x11d   : > { %v321_v18 = vmul.f32 %v317_v17, %v317_v17 }
 0x11f   : > { %v323_v19 = vsel %vm303_vm1, %v321_v18, 0.0 }
 0x120   : > { %324 = vadd.xlane.f32.xlu0 %v323_v19 }
 0x122   : > { %v318_v20 = vpop.f32.mrf.mxu1 }
 0x123   : > { %v319_v21 = vadd.f32 %v500_v15, %v318_v20 }
 0x125   : > { %v322_v22 = vmul.f32 %v319_v21, %v319_v21 }
 0x127   : > { %v326_v23 = vsel %vm303_vm1, %v322_v22, 0.0 }
 0x128   : > { %327 = vadd.xlane.f32.xlu0 %v326_v23 }
 0x193   : > { %v325_v24 = vpop.xlane.xlu0 %324 }
 0x194   : > { %v329_v25 = vmax.f32 %v325_v24, 1e-24 }
 0x196   : > { %501 = vrsqrt.f32 %v329_v25  ;;  %vm337_vm3 = vweird.f32 %v329_v25 }
 0x19b   : > { %v328_v26 = vpop.xlane.xlu0 %327 }
 0x19c   : > { %v502_v27 = vpop.eup %501  ;;  %v330_v28 = vmax.f32 %v328_v26, 1e-24 }
 0x19d   : > { %v332_v29 = vmul.f32 %v502_v27, %v329_v25  ;;  %vm338_vm2 = vweird.f32 %v502_v27 }
 0x19e   : > { %503 = vrsqrt.f32 %v330_v28  ;;  %vm339_vm4 = vmor %vm337_vm3, %vm338_vm2  ;;  %vm347_vm6 = vweird.f32 %v330_v28 }
 0x19f   : > { %v333_v30 = vmul.f32 %v502_v27, %v332_v29 }
 0x1a1   : > { %v334_v31 = vmul.f32 0.5, %v333_v30 }
 0x1a3   : > { %v335_v32 = vsub.f32 1.5, %v334_v31 }
 0x1a4   : > { %v504_v33 = vpop.eup %503 }
 0x1a5   : > { %v336_v34 = vmul.f32 %v502_v27, %v335_v32  ;;  %v342_v35 = vmul.f32 %v504_v33, %v330_v28  ;;  %vm348_vm5 = vweird.f32 %v504_v33 }
 0x1a6   : > { %vm349_vm7 = vmor %vm347_vm6, %vm348_vm5 }
 0x1a7   : > { %v340_v36 = vsel %vm339_vm4, %v502_v27, %v336_v34  ;;  %v343_v37 = vmul.f32 %v504_v33, %v342_v35 }
 0x1a8   : > { %v351_v38 = vmul.f32 %v340_v36, %v317_v17 }
 0x1a9   : > { %v344_v39 = vmul.f32 0.5, %v343_v37 }
 0x1aa   : > { %v353_v40 = vmax.f32 %v351_v38, 0.0 }
 0x1ab   : > { %v345_v41 = vsub.f32 1.5, %v344_v39 }
 0x1ac   : > { %355 = vst.msk [vmem:[%s266_s19] sm:$0xff] %vm303_vm1, %v353_v40 }
 0x1ad   : > { %v346_v42 = vmul.f32 %v504_v33, %v345_v41 }
 0x1af   : > { %v350_v43 = vsel %vm349_vm7, %v504_v33, %v346_v42 }
 0x1b0   : > { %v352_v44 = vmul.f32 %v350_v43, %v319_v21  ;;  %360 = sbr.rel (%p485_p4) target bundleno = 442 (0x1ba), region = 40 }
 0x1b2   : > { %v354_v45 = vmax.f32 %v352_v44, 0.0 }
 0x1b4   : > { %356 = vst.msk [vmem:[%s266_s19 + $0x8] sm:$0xff] %vm303_vm1, %v354_v45 }
 0x1b5   : > { %vm361_vm8 = vcmask 7168   ;;  %v513_v46 = vmov 0.0  }
 0x1b6   : > { %362 = vst.msk [vmem:[%s644_s5] sm:$0xff] %vm361_vm8, %v513_v46 }
 0x1b7   : > { %363 = vst.msk [vmem:[%s644_s5 + $0x8] sm:$0xff] %vm361_vm8, %v513_v46 }
 0x1b8   : > { %364 = vst.msk [vmem:[%s645_s6] sm:$0xff] %vm361_vm8, %v513_v46 }
 0x1b9   : > { %365 = vst.msk [vmem:[%s645_s6 + $0x8] sm:$0xff] %vm361_vm8, %v513_v46 }
 0x1ba PF: > { %v381_v47 = vmul.f32 %v353_v40, %v353_v40  ;;  %v368_v48 = vsel %vm303_vm1, %v353_v40, 0.0  ;;  %v382_v50 = vmul.f32 %v354_v45, %v354_v45  ;;  %v371_v51 = vsel %vm303_vm1, %v354_v45, 0.0 }
 0x1bb   : > { %369 = vadd.xlane.f32.xlu0 %v368_v48  ;;  %vm376_vm9 = vcmask 7168  }
 0x1bc   : > { %v383_v49 = vsel %vm303_vm1, %v381_v47, 0.0  ;;  %v386_v52 = vsel %vm303_vm1, %v382_v50, 0.0 }
 0x1bd   : > { %384 = vadd.xlane.f32.xlu1 %v383_v49  ;;  %v366_v53 = vld [vmem:[%s644_s5] sm:$0xff] }
 0x1be   : > { %v367_v59 = vld [vmem:[%s644_s5 + $0x8] sm:$0xff] }
 0x1bf   : > { %v379_v54 = vld [vmem:[%s645_s6] sm:$0xff] }
 0x1c0   : > { %v380_v60 = vld [vmem:[%s645_s6 + $0x8] sm:$0xff] }
 0x1c3   : > { %372 = vadd.xlane.f32.xlu0 %v371_v51 }
 0x1c5   : > { %387 = vadd.xlane.f32.xlu1 %v386_v52 }
 0x22e   : > { %v370_v55 = vpop.xlane.xlu0 %369 }
 0x22f   : > { %v374_v56 = vadd.f32 %v370_v55, %v366_v53 }
 0x230   : > { %v385_v57 = vpop.xlane.xlu1 %384 }
 0x231   : > { %v389_v58 = vadd.f32 %v385_v57, %v379_v54  ;;  %377 = vst.msk [vmem:[%s644_s5] sm:$0xff] %vm376_vm9, %v374_v56 }
 0x233   : > { %391 = vst.msk [vmem:[%s645_s6] sm:$0xff] %vm376_vm9, %v389_v58 }
 0x236   : > { %v373_v61 = vpop.xlane.xlu0 %372 }
 0x237   : > { %v375_v62 = vadd.f32 %v373_v61, %v367_v59 }
 0x238   : > { %v388_v63 = vpop.xlane.xlu1 %387 }
 0x239   : > { %v390_v0 = vadd.f32 %v388_v63, %v380_v60  ;;  %378 = vst.msk [vmem:[%s644_s5 + $0x8] sm:$0xff] %vm376_vm9, %v375_v62 }
 0x23b   : > { %392 = vst.msk [vmem:[%s645_s6 + $0x8] sm:$0xff] %vm376_vm9, %v390_v0 }
 0x23c PF: > { %s17_s21 = sadd.s32 1, %s511_s21  }
 0x23d   : > { %p14_p5 = scmp.ge.s32.totalorder %s17_s21, 4  }
 0x23f   :  { %16 = sbr.rel (!%p14_p5) target bundleno = 1 (0x1), region = 89 }

// kernel: soft_pooling_gcn_forward.28
= control target key start
LH: loop header
LB: loop body
LE: loop exit
PB: predicated region body
PF: predicated region fallthrough
CT: control target
= control target key end

     0   :  { %s495_s15 = smov 0   ;;  %s525_s0 = inlined_call_operand.vmem [shape: f32[2,16,4], index: 0, kind: input, shape index: {}]   ;;  %s526_s1 = inlined_call_operand.vmem [shape: f32[2,16,80], index: 1, kind: input, shape index: {}]   ;;  %s527_s2 = inlined_call_operand.vmem [shape: f32[2,16,16], index: 2, kind: input, shape index: {}]   ;;  %s528_s3 = inlined_call_operand.vmem [shape: f32[2,4,80], index: 3, kind: output, shape index: {0}]   ;;  %s529_s4 = inlined_call_operand.vmem [shape: f32[2,4,4], index: 4, kind: output, shape index: {1}]  }
   0x1 LB: > { %s432_s16 = sadd.s32 4294967295, %s468_s15   ;;  %p436_p0 = scmp.ge.s32.totalorder %s468_s15, 1  ;;  %s468_s15 = sphi %s495_s15, %s15_s15  }
   0x2   : > { %p185_p1 = scmp.lt.s32.totalorder %s468_s15, 3 }
   0x4   : > { %p186_p2 = pnand %p436_p0, %p185_p1 }
   0x5   : > { %p224_p3 = scmp.lt.s32.totalorder (!%p186_p2), %s432_s16, 1 }
   0x6   : > { %189 = sbr.rel (%p186_p2) target bundleno = 458 (0x1ca), region = 32 }
   0xb   : > { %s531_s16 = smov (!%p224_p3, %s432_s16), 1  ;;  %vm273_vm0 = vcmask 130048   ;;  %vm290_vm1 = vcmask 650240   ;;  %vm322_vm2 = vcmask 27648  }
   0xc   : > { %s450_s17 = sshll.u32 %s531_s16, 4  ;;  %s443_s27 = sshll.u32 %s531_s16, 2 }
   0xd   : > { %s228_s20 = scalar_lea.vmem %s525_s0, %s450_s17  ;;  %s233_s23 = scalar_lea.vmem %s526_s1, %s450_s17 }
   0xe   : > { %v248_v0 = vld [vmem:[%s228_s20] sm:$0xff]  ;;  %v249_v1 = vld [vmem:[%s228_s20 + $0x8] sm:$0xff]  ;;  %s238_s26 = scalar_lea.vmem %s527_s2, %s450_s17  ;;  %s242_s30 = scalar_lea.vmem %s528_s3, %s443_s27 }
   0xf   : > { %v251_v2 = vld [vmem:[%s233_s23] sm:$0xff]  ;;  %v250_v3 = vpack.c.bf16 %v249_v1, %v248_v0  ;;  %v252_v4 = vld [vmem:[%s233_s23 + $0x8] sm:$0xff]  ;;  %s246_s7 = scalar_lea.vmem %s529_s4, %s443_s27 }
  0x10   : > { %v254_v5 = vld [vmem:[%s238_s26] sm:$0xff]  ;;  %v255_v6 = vld [vmem:[%s238_s26 + $0x8] sm:$0xff]  ;;  %v253_v7 = vpack.c.bf16 %v252_v4, %v251_v2 }
  0x11   : > { %v256_v8 = vpack.c.bf16 %v255_v6, %v254_v5  ;;  %257 = vxpose.xlu0.c.b16.start.end [1/1] (short) (narrow) %v250_v3, 16  ;;  %316 = vmatpush.bf16.msra.mxu2 %v250_v3 }
  0x12   : > { %284 = vmatpush.bf16.msra.mxu0 %v253_v7 }
  0x13   : > { %299 = vmatpush.bf16.msra.mxu1 %v256_v8 }
  0xbd   : > { %v265_v9 = vpop.trf.xlu0 }
  0xbe   : > { %445 = vmatmul.msk.bf16.vlgmr.msra.gmra.mxu0 %vm273_vm0, %v265_v9  ;;  %446 = vmatmul.msk.bf16.vlgmr.msra.gmra.mxu1 %vm273_vm0, %v265_v9 }
 0x13b   : > { %v286_v10 = vpop.f32.mrf.mxu0  ;;  %v301_v11 = vpop.f32.mrf.mxu1 }
 0x13c   : > { %291 = vst.msk [vmem:[%s242_s30] sm:$0xf] %vm290_vm1, %v286_v10  ;;  %v305_v12 = vpack.c.bf16 %v301_v11, %v301_v11 }
 0x13e   : > { %447 = vmatmul.msk.bf16.vlgmr.msra.gmra.mxu2 %vm273_vm0, %v305_v12 }
 0x143   : > { %v288_v13 = vpop.f32.mrf.mxu0  ;;  %v303_v14 = vpop.f32.mrf.mxu1 }
 0x1c1   : > { %v318_v15 = vpop.f32.mrf.mxu2 }
 0x1c2   : > { %323 = vst.msk [vmem:[%s246_s7] sm:$0xf] %vm322_vm2, %v318_v15 }
 0x1c9   : > { %v320_v16 = vpop.f32.mrf.mxu2 }
 0x1ca PF: > { %s15_s15 = sadd.s32 1, %s468_s15  }
 0x1cb   : > { %p12_p4 = scmp.ge.s32.totalorder %s15_s15, 4  }
 0x1cd   :  { %14 = sbr.rel (!%p12_p4) target bundleno = 1 (0x1), region = 80 }

// kernel: soft_pooling_gcn_forward.30
= control target key start
LH: loop header
LB: loop body
LE: loop exit
PB: predicated region body
PF: predicated region fallthrough
CT: control target
= control target key end

     0   :  { %s377_s15 = smov 0   ;;  %s403_s0 = inlined_call_operand.vmem [shape: f32[2,4,32], index: 0, kind: input, shape index: {}]   ;;  %s404_s1 = inlined_call_operand.vmem [shape: f32[4,1], index: 1, kind: input, shape index: {}]   ;;  %s405_s2 = inlined_call_operand.vmem [shape: f32[4,1], index: 2, kind: input, shape index: {}]   ;;  %s406_s3 = inlined_call_operand.vmem [shape: f32[2,4,32], index: 3, kind: output, shape index: {0}]   ;;  %s407_s4 = inlined_call_operand.vmem [shape: f32[2,1,32], index: 4, kind: output, shape index: {1}]  }
   0x1 LB: > { %s322_s16 = sadd.s32 4294967295, %s349_s15   ;;  %p326_p0 = scmp.ge.s32.totalorder %s349_s15, 1  ;;  %s349_s15 = sphi %s377_s15, %s15_s15  }
   0x2   : > { %p164_p1 = scmp.lt.s32.totalorder %s349_s15, 3 }
   0x4   : > { %p165_p2 = pnand %p326_p0, %p164_p1 }
   0x5   : > { %p191_p3 = scmp.lt.s32.totalorder (!%p165_p2), %s322_s16, 1 }
   0x6   : > { %168 = sbr.rel (%p165_p2) target bundleno = 171 (0xab), region = 32 }
   0xb   : > { %v203_v0 = vld [vmem:[%s404_s1] sm:$0xf]  ;;  %v351_v2 = vmov 0   ;;  %s409_s16 = smov (!%p191_p3, %s322_s16), 1  ;;  %vm233_vm3 = vcmask 257024   ;;  %vm242_vm4 = vcmask 253952  }
   0xc   : > { %v205_v1 = vld [vmem:[%s405_s2] sm:$0xf]  ;;  %340 = vset.pattern.permute.xlu0 %v351_v2  ;;  %v204_v3 = vmul.f32 0.015625, %v203_v0  ;;  %s327_s21 = sshll.u32 %s409_s16, 2  ;;  %s201_s30 = scalar_lea.vmem %s407_s4, %s409_s16 }
   0xd   : > { %v206_v4 = vmul.f32 0.015625, %v205_v1  ;;  %s194_s24 = scalar_lea.vmem %s403_s0, %s327_s21  ;;  %s198_s27 = scalar_lea.vmem %s406_s3, %s327_s21 }
   0xe   : > { %223 = vperm.xlu0 %340, %v204_v3   ;;  %v207_v5 = vmul.f32 %v204_v3, %v204_v3  ;;  %v202_v17 = vld [vmem:[%s194_s24] sm:$0xf] }
  0x10   : > { %v208_v6 = vsub.f32 %v206_v4, %v207_v5 }
  0x12   : > { %v209_v7 = vmax.f32 %v208_v6, 0.0 }
  0x14   : > { %v210_v8 = vadd.f32 1e-05, %v209_v7 }
  0x16   : > { %341 = vrsqrt.f32 %v210_v8  ;;  %vm217_vm0 = vweird.f32 %v210_v8 }
  0x1c   : > { %v342_v9 = vpop.eup %341 }
  0x1d   : > { %v212_v10 = vmul.f32 %v342_v9, %v210_v8  ;;  %vm218_vm1 = vweird.f32 %v342_v9 }
  0x1e   : > { %vm219_vm2 = vmor %vm217_vm0, %vm218_vm1 }
  0x1f   : > { %v213_v11 = vmul.f32 %v342_v9, %v212_v10 }
  0x21   : > { %v214_v12 = vmul.f32 0.5, %v213_v11 }
  0x23   : > { %v215_v13 = vsub.f32 1.5, %v214_v12 }
  0x25   : > { %v216_v14 = vmul.f32 %v342_v9, %v215_v13 }
  0x27   : > { %v220_v15 = vsel %vm219_vm2, %v342_v9, %v216_v14 }
  0x28   : > { %229 = vperm.xlu0 %340, %v220_v15  }
  0x80   : > { %v224_v16 = vpop.permute.xlu0 %223 }
  0x81   : > { %v226_v18 = vsub.f32 %v202_v17, %v224_v16 }
  0x9a   : > { %v230_v19 = vpop.permute.xlu0 %229 }
  0x9b   : > { %v232_v20 = vmul.f32 %v230_v19, %v226_v18 }
  0x9d   : > { %234 = vst.msk [vmem:[%s198_s27] sm:$0xf] %vm233_vm3, %v232_v20  ;;  %v235_v21 = vsel %vm233_vm3, %v232_v20, -inf }
  0x9e   : > { %v236_v22 = vrot.slane %v235_v21, 4 }
  0xa0   : > { %v237_v23 = vmax.f32 %v235_v21, %v236_v22 }
  0xa2   : > { %v238_v24 = vrot.slane %v237_v23, 2 }
  0xa4   : > { %v239_v25 = vmax.f32 %v237_v23, %v238_v24 }
  0xa6   : > { %v240_v26 = vrot.slane %v239_v25, 1 }
  0xa8   : > { %v241_v27 = vmax.f32 %v239_v25, %v240_v26 }
  0xaa   : > { %243 = vst.msk [vmem:[%s201_s30] sm:$0x1] %vm242_vm4, %v241_v27 }
  0xab PF: > { %s15_s15 = sadd.s32 1, %s349_s15  }
  0xac   : > { %p12_p4 = scmp.ge.s32.totalorder %s15_s15, 4  }
  0xae   :  { %14 = sbr.rel (!%p12_p4) target bundleno = 1 (0x1), region = 74 }

// kernel: soft_pooling_gcn_forward.27
= control target key start
LH: loop header
LB: loop body
LE: loop exit
PB: predicated region body
PF: predicated region fallthrough
CT: control target
= control target key end

     0   :  { %s380_s12 = smov 0   ;;  %s440_s0 = inlined_call_operand.vmem [shape: f32[2,16,68], index: 0, kind: input, shape index: {}]   ;;  %s441_s1 = inlined_call_operand.vmem [shape: f32[68,4], index: 1, kind: input, shape index: {}]   ;;  %s442_s2 = inlined_call_operand.vmem [shape: f32[1,4], index: 2, kind: input, shape index: {}]   ;;  %s443_s3 = inlined_call_operand.vmem [shape: f32[2,16,4], index: 3, kind: output, shape index: {}]  }
   0x1 LB: > { %s321_s13 = sadd.s32 4294967295, %s358_s12   ;;  %p325_p0 = scmp.ge.s32.totalorder %s358_s12, 1  ;;  %s358_s12 = sphi %s380_s12, %s13_s12  }
   0x2   : > { %p137_p1 = scmp.lt.s32.totalorder %s358_s12, 3 }
   0x4   : > { %p138_p2 = pnand %p325_p0, %p137_p1 }
   0x5   : > { %p161_p3 = scmp.lt.s32.totalorder (!%p138_p2), %s321_s13, 1 }
   0x6   : > { %141 = sbr.rel (%p138_p2) target bundleno = 435 (0x1b3), region = 32 }
   0xb   : > { %v183_v0 = vld [vmem:[%s441_s1 + $0x40] sm:$0xf]  ;;  %vm197_vm0 = vcmask 1041408   ;;  %v181_v2 = vld [vmem:[%s441_s1 + $0x30] sm:$0xff]  ;;  %v182_v3 = vld [vmem:[%s441_s1 + $0x38] sm:$0xff]  ;;  %s445_s13 = smov (!%p161_p3, %s321_s13), 1 }
   0xc   : > { %v188_v1 = vpack.c.bf16 %v183_v0, %v183_v0  ;;  %v187_v5 = vpack.c.bf16 %v182_v3, %v181_v2  ;;  %v179_v6 = vld [vmem:[%s441_s1 + $0x20] sm:$0xff]  ;;  %v180_v7 = vld [vmem:[%s441_s1 + $0x28] sm:$0xff]  ;;  %v177_v9 = vld [vmem:[%s441_s1 + $0x10] sm:$0xff]  ;;  %s333_s28 = sshll.u32 %s445_s13, 4  ;;  %vm193_vm1 = vcmask 556032   ;;  %vm215_vm2 = vcmask 31744  }
   0xd   : > { %v186_v8 = vpack.c.bf16 %v180_v7, %v179_v6  ;;  %v178_v10 = vld [vmem:[%s441_s1 + $0x18] sm:$0xff]  ;;  %v175_v12 = vld [vmem:[%s441_s1] sm:$0xff]  ;;  %v176_v13 = vld [vmem:[%s441_s1 + $0x8] sm:$0xff]  ;;  %s165_s8 = scalar_lea.vmem %s440_s0, %s333_s28  ;;  %s170_s15 = scalar_lea.vmem %s443_s3, %s333_s28 }
   0xe   : > { %v199_v4 = vsel %vm197_vm0, %v188_v1, 0  ;;  %v185_v11 = vpack.c.bf16 %v178_v10, %v177_v9  ;;  %v184_v14 = vpack.c.bf16 %v176_v13, %v175_v12  ;;  %v172_v15 = vld [vmem:[%s165_s8] sm:$0xff]  ;;  %v173_v16 = vld [vmem:[%s165_s8 + $0x8] sm:$0xff] }
   0xf   : > { %204 = vmatpush.bf16.msra.mxu0 %v199_v4  ;;  %v174_v17 = vpack.c.bf16 %v173_v16, %v172_v15  ;;  %v343_v18 = vld [vmem:[%s442_s2] ss:$0 sm:$0xff] }
  0x13   : > { %205 = vmatpush.bf16.msra.mxu0 %v187_v5 }
  0x17   : > { %206 = vmatpush.bf16.msra.mxu0 %v186_v8 }
  0x1b   : > { %207 = vmatpush.bf16.msra.mxu0 %v185_v11 }
  0x1f   : > { %208 = vmatpush.bf16.msra.mxu0 %v184_v14 }
  0x22   : > { %330 = vmatmul.msk.bf16.vlgmr.msra.gmra.mxu0 %vm193_vm1, %v174_v17 }
  0x9f   : > { %v210_v19 = vpop.f32.mrf.mxu0 }
  0xa0   : > { %v211_v20 = vadd.f32 %v343_v18, %v210_v19 }
  0xa2   : > { %v216_v21 = vsel %vm215_vm2, %v211_v20, -inf }
  0xa3   : > { %217 = vmax.xlane.f32.xlu0 %v216_v21 }
  0xa7   : > { %v212_v22 = vpop.f32.mrf.mxu0 }
  0xa8   : > { %v213_v23 = vadd.f32 %v343_v18, %v212_v22 }
  0xaa   : > { %v219_v24 = vsel %vm215_vm2, %v213_v23, -inf }
  0xab   : > { %220 = vmax.xlane.f32.xlu0 %v219_v24 }
 0x116   : > { %v218_v25 = vpop.xlane.xlu0 %217 }
 0x117   : > { %v222_v26 = vsub.f32 %v211_v20, %v218_v25 }
 0x119   : > { %v224_v27 = vmul.f32 1.442695, %v222_v26 }
 0x11b   : > { %344 = vpow2.f32 %v224_v27 }
 0x11e   : > { %v221_v28 = vpop.xlane.xlu0 %220 }
 0x11f   : > { %v223_v29 = vsub.f32 %v213_v23, %v221_v28 }
 0x121   : > { %v345_v30 = vpop.eup %344  ;;  %v226_v31 = vmul.f32 1.442695, %v223_v29 }
 0x122   : > { %v228_v32 = vsel %vm215_vm2, %v345_v30, 0.0 }
 0x123   : > { %346 = vpow2.f32 %v226_v31  ;;  %229 = vadd.xlane.f32.xlu1 %v228_v32 }
 0x129   : > { %v347_v33 = vpop.eup %346 }
 0x12a   : > { %v231_v34 = vsel %vm215_vm2, %v347_v33, 0.0 }
 0x12b   : > { %232 = vadd.xlane.f32.xlu1 %v231_v34 }
 0x196   : > { %v230_v35 = vpop.xlane.xlu1 %229 }
 0x197   : > { %348 = vrcp.f32 %v230_v35  ;;  %v245_v40 = vand.u32 2147483648, %v230_v35  ;;  %v243_v42 = vand.u32 2147483647, %v230_v35  ;;  %vm239_vm4 = vweird.f32 %v230_v35 }
 0x199   : > { %v246_v45 = vor.u32 1.1754944e-38, %v245_v40  ;;  %vm244_vm6 = vcmp.eq.f32.partialorder %v243_v42, 8.507059e+37 }
 0x19d   : > { %v349_v36 = vpop.eup %348 }
 0x19e   : > { %v235_v37 = vmul.f32 %v349_v36, %v230_v35  ;;  %v233_v38 = vpop.xlane.xlu1 %232  ;;  %vm240_vm3 = vweird.f32 %v349_v36 }
 0x19f   : > { %350 = vrcp.f32 %v233_v38  ;;  %vm241_vm5 = vmor %vm239_vm4, %vm240_vm3  ;;  %v260_v51 = vand.u32 2147483648, %v233_v38  ;;  %v258_v53 = vand.u32 2147483647, %v233_v38  ;;  %vm254_vm8 = vweird.f32 %v233_v38 }
 0x1a0   : > { %v236_v39 = vsub.f32 1.0, %v235_v37 }
 0x1a1   : > { %v261_v55 = vor.u32 1.1754944e-38, %v260_v51  ;;  %vm259_vm10 = vcmp.eq.f32.partialorder %v258_v53, 8.507059e+37 }
 0x1a2   : > { %v237_v41 = vmul.f32 %v349_v36, %v236_v39 }
 0x1a4   : > { %v238_v43 = vadd.f32 %v349_v36, %v237_v41 }
 0x1a5   : > { %v351_v44 = vpop.eup %350 }
 0x1a6   : > { %v242_v46 = vsel %vm241_vm5, %v349_v36, %v238_v43  ;;  %v250_v47 = vmul.f32 %v351_v44, %v233_v38  ;;  %vm255_vm7 = vweird.f32 %v351_v44 }
 0x1a7   : > { %v247_v48 = vsel %vm244_vm6, %v246_v45, %v242_v46  ;;  %vm256_vm9 = vmor %vm254_vm8, %vm255_vm7 }
 0x1a8   : > { %v248_v49 = vmul.f32 %v345_v30, %v247_v48  ;;  %v251_v50 = vsub.f32 1.0, %v250_v47 }
 0x1aa   : > { %264 = vst.msk [vmem:[%s170_s15] sm:$0xff] %vm215_vm2, %v248_v49  ;;  %v252_v52 = vmul.f32 %v351_v44, %v251_v50 }
 0x1ac   : > { %v253_v54 = vadd.f32 %v351_v44, %v252_v52 }
 0x1ae   : > { %v257_v56 = vsel %vm256_vm9, %v351_v44, %v253_v54 }
 0x1af   : > { %v262_v57 = vsel %vm259_vm10, %v261_v55, %v257_v56 }
 0x1b0   : > { %v263_v58 = vmul.f32 %v347_v33, %v262_v57 }
 0x1b2   : > { %265 = vst.msk [vmem:[%s170_s15 + $0x8] sm:$0xff] %vm215_vm2, %v263_v58 }
 0x1b3 PF: > { %s13_s12 = sadd.s32 1, %s358_s12  }
 0x1b4   : > { %p10_p4 = scmp.ge.s32.totalorder %s13_s12, 4  }
 0x1b6   :  { %12 = sbr.rel (!%p10_p4) target bundleno = 1 (0x1), region = 62 }

// kernel: soft_pooling_gcn_forward.29
= control target key start
LH: loop header
LB: loop body
LE: loop exit
PB: predicated region body
PF: predicated region fallthrough
CT: control target
= control target key end

     0   :  { %s508_s21 = smov 0   ;;  %s593_s0 = inlined_call_operand.vmem [shape: f32[2,4,4], index: 0, kind: input, shape index: {}]   ;;  %s594_s1 = inlined_call_operand.vmem [shape: f32[2,4,80], index: 1, kind: input, shape index: {}]   ;;  %s595_s2 = inlined_call_operand.vmem [shape: f32[80,32], index: 2, kind: input, shape index: {}]   ;;  %s596_s3 = inlined_call_operand.vmem [shape: f32[1,32], index: 3, kind: input, shape index: {}]   ;;  %s597_s4 = inlined_call_operand.vmem [shape: f32[2,4,32], index: 4, kind: output, shape index: {0}]   ;;  %s598_s5 = inlined_call_operand.vmem [shape: f32[4,1], index: 5, kind: output, shape index: {1}]   ;;  %s599_s6 = inlined_call_operand.vmem [shape: f32[4,1], index: 6, kind: output, shape index: {2}]  }
   0x1 LB: > { %s514_s22 = sadd.s32 4294967295, %s470_s21   ;;  %p443_p0 = scmp.ge.s32.totalorder %s470_s21, 1  ;;  %s470_s21 = sphi %s508_s21, %s17_s21  }
   0x2   : > { %p215_p1 = scmp.lt.s32.totalorder %s470_s21, 3 }
   0x4   : > { %p216_p2 = pnand %p443_p0, %p215_p1 }
   0x5   : > { %p247_p3 = scmp.lt.s32.totalorder (!%p216_p2), %s514_s22, 1  ;;  %p449_p4 = scmp.ne.s32.totalorder (!%p216_p2), %s514_s22, 0 }
   0x6   : > { %219 = sbr.rel (%p216_p2) target bundleno = 568 (0x238), region = 36 }
   0xb   : > { %v272_v0 = vld [vmem:[%s595_s2 + $0x40] sm:$0xff]  ;;  %v273_v1 = vld [vmem:[%s595_s2 + $0x48] sm:$0xff]  ;;  %v270_v2 = vld [vmem:[%s595_s2 + $0x30] sm:$0xff]  ;;  %s248_s11 = scalar_select %p247_p3, %s514_s22, 1  ;;  %vm279_vm0 = vcmask 654336   ;;  %vm305_vm1 = vcmask 1041408  }
   0xc   : > { %v278_v3 = vpack.c.bf16 %v273_v1, %v272_v0  ;;  %v271_v4 = vld [vmem:[%s595_s2 + $0x38] sm:$0xff]  ;;  %v268_v6 = vld [vmem:[%s595_s2 + $0x20] sm:$0xff]  ;;  %v269_v7 = vld [vmem:[%s595_s2 + $0x28] sm:$0xff]  ;;  %vm301_vm2 = vcmask 31744   ;;  %vm323_vm3 = vcmask 257024  }
   0xd   : > { %v277_v5 = vpack.c.bf16 %v271_v4, %v270_v2  ;;  %v276_v8 = vpack.c.bf16 %v269_v7, %v268_v6  ;;  %v266_v9 = vld [vmem:[%s595_s2 + $0x10] sm:$0xff]  ;;  %v267_v10 = vld [vmem:[%s595_s2 + $0x18] sm:$0xff]  ;;  %s544_s16 = sshll.u32 %s248_s11, 2  ;;  %v264_v12 = vld [vmem:[%s595_s2] sm:$0xff] }
   0xe   : > { %286 = vmatpush.bf16.msra.mxu0 %v278_v3  ;;  %v275_v11 = vpack.c.bf16 %v267_v10, %v266_v9  ;;  %v265_v13 = vld [vmem:[%s595_s2 + $0x8] sm:$0xff]  ;;  %s254_s25 = scalar_lea.vmem %s594_s1, %s544_s16  ;;  %s250_s28 = scalar_lea.vmem %s593_s0, %s544_s16  ;;  %v461_v23 = vld [vmem:[%s596_s3] ss:$0 sm:$0xff] }
   0xf   : > { %v274_v14 = vpack.c.bf16 %v265_v13, %v264_v12  ;;  %v262_v15 = vld [vmem:[%s254_s25] sm:$0xf]  ;;  %s258_s9 = scalar_lea.vmem %s597_s4, %s544_s16 }
  0x10   : > { %v263_v16 = vpack.c.bf16 %v262_v15, %v262_v15  ;;  %v260_v18 = vld [vmem:[%s250_s28] sm:$0xf] }
  0x11   : > { %v261_v21 = vpack.c.bf16 %v260_v18, %v260_v18 }
  0x12   : > { %287 = vmatpush.bf16.msra.mxu0 %v277_v5 }
  0x16   : > { %288 = vmatpush.bf16.msra.mxu0 %v276_v8 }
  0x1a   : > { %289 = vmatpush.bf16.msra.mxu0 %v275_v11 }
  0x1e   : > { %290 = vmatpush.bf16.msra.mxu0 %v274_v14 }
  0x21   : > { %447 = vmatmul.msk.bf16.vlgmr.msra.gmra.mxu0 %vm279_vm0, %v263_v16 }
  0x9e   : > { %v292_v17 = vpop.f32.mrf.mxu0 }
  0x9f   : > { %v296_v19 = vpack.c.bf16 %v292_v17, %v292_v17 }
  0xa1   : > { %v307_v20 = vsel %vm305_vm1, %v296_v19, 0 }
  0xa2   : > { %316 = vmatpush.bf16.msra.mxu1 %v307_v20 }
  0xa5   : > { %448 = vmatmul.msk.bf16.vlgmr.msra.gmra.mxu1 %vm301_vm2, %v261_v21 }
  0xa6   : > { %v294_v22 = vpop.f32.mrf.mxu0 }
 0x122   : > { %v318_v24 = vpop.f32.mrf.mxu1 }
 0x123   : > { %v319_v25 = vadd.f32 %v461_v23, %v318_v24 }
 0x125   : > { %v322_v26 = vmul.f32 %v319_v25, %v319_v25 }
 0x127   : > { %v324_v27 = vsel %vm323_vm3, %v322_v26, 0.0 }
 0x128   : > { %325 = vadd.xlane.f32.xlu0 %v324_v27 }
 0x12a   : > { %v320_v28 = vpop.f32.mrf.mxu1 }
 0x19b   : > { %v326_v29 = vpop.xlane.xlu0 %325 }
 0x19c   : > { %v327_v30 = vmax.f32 %v326_v29, 1e-24 }
 0x19e   : > { %462 = vrsqrt.f32 %v327_v30  ;;  %vm334_vm5 = vweird.f32 %v327_v30 }
 0x1a4   : > { %v463_v31 = vpop.eup %462 }
 0x1a5   : > { %v329_v32 = vmul.f32 %v463_v31, %v327_v30  ;;  %vm335_vm4 = vweird.f32 %v463_v31 }
 0x1a6   : > { %vm336_vm6 = vmor %vm334_vm5, %vm335_vm4 }
 0x1a7   : > { %v330_v33 = vmul.f32 %v463_v31, %v329_v32 }
 0x1a9   : > { %v331_v34 = vmul.f32 0.5, %v330_v33 }
 0x1ab   : > { %v332_v35 = vsub.f32 1.5, %v331_v34 }
 0x1ad   : > { %v333_v36 = vmul.f32 %v463_v31, %v332_v35 }
 0x1af   : > { %v337_v37 = vsel %vm336_vm6, %v463_v31, %v333_v36 }
 0x1b0   : > { %v338_v38 = vmul.f32 %v337_v37, %v319_v25  ;;  %344 = sbr.rel (%p449_p4) target bundleno = 440 (0x1b8), region = 40 }
 0x1b2   : > { %v339_v39 = vmax.f32 %v338_v38, 0.0 }
 0x1b4   : > { %340 = vst.msk [vmem:[%s258_s9] sm:$0xf] %vm323_vm3, %v339_v39 }
 0x1b5   : > { %vm345_vm7 = vcmask 3072   ;;  %v472_v40 = vmov 0.0  }
 0x1b6   : > { %346 = vst.msk [vmem:[%s598_s5] sm:$0xf] %vm345_vm7, %v472_v40 }
 0x1b7   : > { %347 = vst.msk [vmem:[%s599_s6] sm:$0xf] %vm345_vm7, %v472_v40 }
 0x1b8 PF: > { %v349_v41 = vsel %vm323_vm3, %v339_v39, 0.0  ;;  %v356_v42 = vmul.f32 %v339_v39, %v339_v39  ;;  %vm353_vm8 = vcmask 3072  }
 0x1b9   : > { %350 = vadd.xlane.f32.xlu0 %v349_v41 }
 0x1ba   : > { %v357_v43 = vsel %vm323_vm3, %v356_v42, 0.0 }
 0x1bd   : > { %v348_v44 = vld [vmem:[%s598_s5] sm:$0xf] }
 0x1be   : > { %v355_v47 = vld [vmem:[%s599_s6] sm:$0xf] }
 0x1c1   : > { %358 = vadd.xlane.f32.xlu0 %v357_v43 }
 0x22c   : > { %v351_v45 = vpop.xlane.xlu0 %350 }
 0x22d   : > { %v352_v46 = vadd.f32 %v351_v45, %v348_v44 }
 0x22f   : > { %354 = vst.msk [vmem:[%s598_s5] sm:$0xf] %vm353_vm8, %v352_v46 }
 0x234   : > { %v359_v48 = vpop.xlane.xlu0 %358 }
 0x235   : > { %v360_v49 = vadd.f32 %v359_v48, %v355_v47 }
 0x237   : > { %361 = vst.msk [vmem:[%s599_s6] sm:$0xf] %vm353_vm8, %v360_v49 }
 0x238 PF: > { %s17_s21 = sadd.s32 1, %s470_s21  }
 0x239   : > { %p14_p5 = scmp.ge.s32.totalorder %s17_s21, 4  }
 0x23b   :  { %16 = sbr.rel (!%p14_p5) target bundleno = 1 (0x1), region = 89 }

// kernel: soft_pooling_gcn_forward.31
= control target key start
LH: loop header
LB: loop body
LE: loop exit
PB: predicated region body
PF: predicated region fallthrough
CT: control target
= control target key end

     0   :  { %s499_s21 = smov 0   ;;  %s566_s0 = inlined_call_operand.vmem [shape: f32[2,4,4], index: 0, kind: input, shape index: {}]   ;;  %s567_s1 = inlined_call_operand.vmem [shape: f32[2,4,32], index: 1, kind: input, shape index: {}]   ;;  %s568_s2 = inlined_call_operand.vmem [shape: f32[32,32], index: 2, kind: input, shape index: {}]   ;;  %s569_s3 = inlined_call_operand.vmem [shape: f32[1,32], index: 3, kind: input, shape index: {}]   ;;  %s570_s4 = inlined_call_operand.vmem [shape: f32[2,4,32], index: 4, kind: output, shape index: {0}]   ;;  %s571_s5 = inlined_call_operand.vmem [shape: f32[4,1], index: 5, kind: output, shape index: {1}]   ;;  %s572_s6 = inlined_call_operand.vmem [shape: f32[4,1], index: 6, kind: output, shape index: {2}]  }
   0x1 LB: > { %s505_s22 = sadd.s32 4294967295, %s461_s21   ;;  %p434_p0 = scmp.ge.s32.totalorder %s461_s21, 1  ;;  %s461_s21 = sphi %s499_s21, %s17_s21  }
   0x2   : > { %p215_p1 = scmp.lt.s32.totalorder %s461_s21, 3 }
   0x4   : > { %p216_p2 = pnand %p434_p0, %p215_p1 }
   0x5   : > { %p247_p3 = scmp.lt.s32.totalorder (!%p216_p2), %s505_s22, 1  ;;  %p440_p4 = scmp.ne.s32.totalorder (!%p216_p2), %s505_s22, 0 }
   0x6   : > { %219 = sbr.rel (%p216_p2) target bundleno = 553 (0x229), region = 36 }
   0xb   : > { %v266_v0 = vld [vmem:[%s568_s2 + $0x10] sm:$0xff]  ;;  %v267_v1 = vld [vmem:[%s568_s2 + $0x18] sm:$0xff]  ;;  %s248_s27 = scalar_select %p247_p3, %s505_s22, 1  ;;  %vm274_vm0 = vcmask 1041408   ;;  %vm270_vm1 = vcmask 31744   ;;  %v264_v8 = vld [vmem:[%s568_s2] sm:$0xff] }
   0xc   : > { %v269_v2 = vpack.c.bf16 %v267_v1, %v266_v0  ;;  %v265_v9 = vld [vmem:[%s568_s2 + $0x8] sm:$0xff]  ;;  %vm296_vm2 = vcmask 261120   ;;  %v452_v14 = vld [vmem:[%s569_s3] ss:$0 sm:$0xff]  ;;  %vm314_vm3 = vcmask 257024  }
   0xd   : > { %s517_s28 = sshll.u32 %s248_s27, 2  ;;  %v268_v10 = vpack.c.bf16 %v265_v9, %v264_v8 }
   0xe   : > { %306 = vmatpush.bf16.msra.mxu1 %v269_v2  ;;  %s254_s7 = scalar_lea.vmem %s567_s1, %s517_s28  ;;  %s250_s10 = scalar_lea.vmem %s566_s0, %s517_s28 }
   0xf   : > { %v262_v3 = vld [vmem:[%s254_s7] sm:$0xf]  ;;  %s258_s19 = scalar_lea.vmem %s570_s4, %s517_s28 }
  0x10   : > { %v263_v4 = vpack.c.bf16 %v262_v3, %v262_v3  ;;  %v260_v5 = vld [vmem:[%s250_s10] sm:$0xf] }
  0x11   : > { %v261_v7 = vpack.c.bf16 %v260_v5, %v260_v5 }
  0x12   : > { %v276_v6 = vsel %vm274_vm0, %v263_v4, 0  ;;  %307 = vmatpush.bf16.msra.mxu1 %v268_v10 }
  0x13   : > { %285 = vmatpush.bf16.msra.mxu0 %v276_v6 }
  0x16   : > { %438 = vmatmul.msk.bf16.vlgmr.msra.gmra.mxu0 %vm270_vm1, %v261_v7 }
  0x93   : > { %v287_v11 = vpop.f32.mrf.mxu0 }
  0x94   : > { %v291_v12 = vpack.c.bf16 %v287_v11, %v287_v11 }
  0x96   : > { %439 = vmatmul.msk.bf16.vlgmr.msra.gmra.mxu1 %vm296_vm2, %v291_v12 }
  0x9b   : > { %v289_v13 = vpop.f32.mrf.mxu0 }
 0x113   : > { %v309_v15 = vpop.f32.mrf.mxu1 }
 0x114   : > { %v310_v16 = vadd.f32 %v452_v14, %v309_v15 }
 0x116   : > { %v313_v17 = vmul.f32 %v310_v16, %v310_v16 }
 0x118   : > { %v315_v18 = vsel %vm314_vm3, %v313_v17, 0.0 }
 0x119   : > { %316 = vadd.xlane.f32.xlu0 %v315_v18 }
 0x11b   : > { %v311_v19 = vpop.f32.mrf.mxu1 }
 0x18c   : > { %v317_v20 = vpop.xlane.xlu0 %316 }
 0x18d   : > { %v318_v21 = vmax.f32 %v317_v20, 1e-24 }
 0x18f   : > { %453 = vrsqrt.f32 %v318_v21  ;;  %vm325_vm5 = vweird.f32 %v318_v21 }
 0x195   : > { %v454_v22 = vpop.eup %453 }
 0x196   : > { %v320_v23 = vmul.f32 %v454_v22, %v318_v21  ;;  %vm326_vm4 = vweird.f32 %v454_v22 }
 0x197   : > { %vm327_vm6 = vmor %vm325_vm5, %vm326_vm4 }
 0x198   : > { %v321_v24 = vmul.f32 %v454_v22, %v320_v23 }
 0x19a   : > { %v322_v25 = vmul.f32 0.5, %v321_v24 }
 0x19c   : > { %v323_v26 = vsub.f32 1.5, %v322_v25 }
 0x19e   : > { %v324_v27 = vmul.f32 %v454_v22, %v323_v26 }
 0x1a0   : > { %v328_v28 = vsel %vm327_vm6, %v454_v22, %v324_v27 }
 0x1a1   : > { %v329_v29 = vmul.f32 %v328_v28, %v310_v16  ;;  %335 = sbr.rel (%p440_p4) target bundleno = 425 (0x1a9), region = 40 }
 0x1a3   : > { %v330_v30 = vmax.f32 %v329_v29, 0.0 }
 0x1a5   : > { %331 = vst.msk [vmem:[%s258_s19] sm:$0xf] %vm314_vm3, %v330_v30 }
 0x1a6   : > { %vm336_vm7 = vcmask 3072   ;;  %v463_v31 = vmov 0.0  }
 0x1a7   : > { %337 = vst.msk [vmem:[%s571_s5] sm:$0xf] %vm336_vm7, %v463_v31 }
 0x1a8   : > { %338 = vst.msk [vmem:[%s572_s6] sm:$0xf] %vm336_vm7, %v463_v31 }
 0x1a9 PF: > { %v340_v32 = vsel %vm314_vm3, %v330_v30, 0.0  ;;  %v347_v33 = vmul.f32 %v330_v30, %v330_v30  ;;  %vm344_vm8 = vcmask 3072  }
 0x1aa   : > { %341 = vadd.xlane.f32.xlu0 %v340_v32 }
 0x1ab   : > { %v348_v34 = vsel %vm314_vm3, %v347_v33, 0.0 }
 0x1ae   : > { %v339_v35 = vld [vmem:[%s571_s5] sm:$0xf] }
 0x1af   : > { %v346_v38 = vld [vmem:[%s572_s6] sm:$0xf] }
 0x1b2   : > { %349 = vadd.xlane.f32.xlu0 %v348_v34 }
 0x21d   : > { %v342_v36 = vpop.xlane.xlu0 %341 }
 0x21e   : > { %v343_v37 = vadd.f32 %v342_v36, %v339_v35 }
 0x220   : > { %345 = vst.msk [vmem:[%s571_s5] sm:$0xf] %vm344_vm8, %v343_v37 }
 0x225   : > { %v350_v39 = vpop.xlane.xlu0 %349 }
 0x226   : > { %v351_v40 = vadd.f32 %v350_v39, %v346_v38 }
 0x228   : > { %352 = vst.msk [vmem:[%s572_s6] sm:$0xf] %vm344_vm8, %v351_v40 }
 0x229 PF: > { %s17_s21 = sadd.s32 1, %s461_s21  }
 0x22a   : > { %p14_p5 = scmp.ge.s32.totalorder %s17_s21, 4  }
 0x22c   :  { %16 = sbr.rel (!%p14_p5) target bundleno = 1 (0x1), region = 89 }

// kernel: soft_pooling_gcn_forward.33
= control target key start
LH: loop header
LB: loop body
LE: loop exit
PB: predicated region body
PF: predicated region fallthrough
CT: control target
= control target key end

     0   :  { %11 = vsyncpa [#allocation3], 0  ;;  %s701_s0 = inlined_call_operand.vmem [shape: f32[2,4,4], index: 0, kind: input, shape index: {}]   ;;  %s702_s1 = inlined_call_operand.vmem [shape: f32[2,4,32], index: 1, kind: input, shape index: {}]   ;;  %s703_s2 = inlined_call_operand.vmem [shape: f32[32,16], index: 2, kind: input, shape index: {}]   ;;  %s704_s3 = inlined_call_operand.vmem [shape: f32[1,16], index: 3, kind: input, shape index: {}]   ;;  %s705_s4 = inlined_call_operand.hbm [shape: f32[2,4,16], index: 4, kind: output, shape index: {0}]   ;;  %s706_s5 = inlined_call_operand.vmem [shape: f32[2,1,16], index: 5, kind: output, shape index: {1}]  }
   0x1   :  { %13 = vsyncpa [#allocation3 + $0x1], 0  ;;  %s588_s18 = smov 0   ;;  %s590_s19 = smov 0  }
   0x2   :  { %s592_s20 = smov 0   ;;  %s594_s21 = smov 0  }
   0x3 LB: > { %s609_s22 = sadd.s32 4294967295, %s556_s21   ;;  %s439_s23 = sadd.s32 4294967294, %s556_s21   ;;  %s556_s21 = sphi %s594_s21, %s712_s21   ;;  %s552_s20 = sphi %s592_s20, %s711_s20   ;;  %s548_s19 = sphi %s590_s19, %s710_s19   ;;  %s544_s18 = sphi %s588_s18, %s709_s18  }
   0x4   : > { %s613_s24 = sadd.s32 1, %s556_s21   ;;  %s120_s25 = sadd.s32 1, %s552_s20 }
   0x5   : > { %s117_s26 = ssub.s32 %s556_s21, %s613_s24  ;;  %p130_p0 = scmp.ne.s32.totalorder %s552_s20, %s548_s19 }
   0x6   : > { %p118_p1 = scmp.eq.s32.totalorder %s117_s26, 0  ;;  %p131_p2 = scmp.eq.s32.totalorder %s609_s22, 1 }
   0x7   : > { %p136_p3 = scmp.ne.s32.totalorder %s548_s19, %s544_s18  ;;  %p137_p4 = scmp.eq.s32.totalorder %s439_s23, 1 }
   0x8   : > { %s624_s27 = scalar_select %p118_p1, %s552_s20, %s120_s25  }
   0x9   : > { %p626_p5 = por %p131_p2, %p130_p0  ;;  %p630_p6 = por %p137_p4, %p136_p3 }
   0xa   : > { %p442_p7 = scmp.ge.s32.totalorder %s556_s21, 1  ;;  %p201_p8 = scmp.lt.s32.totalorder %s556_s21, 3 }
   0xc   : > { %p202_p9 = pnand %p442_p7, %p201_p8 }
   0xd   : > { %p235_p10 = scmp.lt.s32.totalorder (!%p202_p9), %s609_s22, 1  ;;  %s227_s7 = sand.u32 (!%p202_p9), 1, %s548_s19  }
   0xe   : > { %205 = sbr.rel (%p202_p9) target bundleno = 444 (0x1bc), region = 36  ;;  %s449_s8 = sshll.u32 (!%p202_p9), %s609_s22, 2 }
   0xf   : > { %s443_s9 = sshll.u32 (!%p202_p9), %s227_s7, 2  ;;  %s341_s12 = scalar_lea.hbm (!%p202_p9), %s705_s4, %s449_s8 }
  0x10   : > { %s345_s16 = sshll.u32 (!%p202_p9), %s341_s12, 4  ;;  %s514_s30 = scalar_lea.hbm (!%p202_p9), %s705_s4, 8  ;;  %s346_s16 = int_to_ptr.hbm [resolvable:$true] %s345_s16 }
  0x13   : > { %v253_v0 = vld [vmem:[%s703_s2 + $0x10] sm:$0xff]  ;;  %v254_v1 = vld [vmem:[%s703_s2 + $0x18] sm:$0xff]  ;;  %v251_v2 = vld [vmem:[%s703_s2] sm:$0xff]  ;;  %s650_s13 = scalar_select %p235_p10, %s609_s22, 1  ;;  %vm257_vm0 = vcmask 261120   ;;  %vm283_vm1 = vcmask 1041408  }
  0x14   : > { %v256_v3 = vpack.c.bf16 %v254_v1, %v253_v0  ;;  %v252_v4 = vld [vmem:[%s703_s2 + $0x8] sm:$0xff]  ;;  %vm279_vm2 = vcmask 31744   ;;  %v491_v14 = vld [vmem:[%s704_s3] ss:$0 sm:$0xff]  ;;  %vm301_vm3 = vcmask 125952   ;;  %s328_s22 = scalar_lea.sflag [#allocation3], %s227_s7 }
  0x15   : > { %v255_v5 = vpack.c.bf16 %v252_v4, %v251_v2  ;;  %s444_s14 = sshll.u32 %s650_s13, 2 }
  0x16   : > { %267 = vmatpush.bf16.msra.mxu0 %v256_v3  ;;  %s242_s17 = scalar_lea.vmem %s702_s1, %s444_s14  ;;  %s238_s26 = scalar_lea.vmem %s701_s0, %s444_s14 }
  0x17   : > { %v249_v6 = vld [vmem:[%s242_s17] sm:$0xf]  ;;  %s229_s14 = scalar_lea.vmem [#allocation2], %s443_s9  ;;  %s508_s17 = sshra.s32 %s346_s16, 4  ;;  %s509_s17 = int_to_ptr.hbm [resolvable:$true] %s508_s17 }
  0x18   : > { %v250_v7 = vpack.c.bf16 %v249_v6, %v249_v6  ;;  %v247_v9 = vld [vmem:[%s238_s26] sm:$0xf]  ;;  %s343_s15 = sshll.u32 %s229_s14, 4  ;;  %s510_s23 = scalar_lea.hbm %s509_s17, 4  ;;  %s344_s15 = int_to_ptr.vmem [resolvable:$true] %s343_s15 }
  0x19   : > { %v248_v12 = vpack.c.bf16 %v247_v9, %v247_v9  ;;  %p511_p11 = scmp.ne.s32.totalorder %s509_s17, %s510_s23  ;;  %p515_p0 = scmp.lt.s32.totalorder %s509_s17, %s705_s4 }
  0x1a   : > { %268 = vmatpush.bf16.msra.mxu0 %v255_v5  ;;  %p516_p1 = scmp.lt.s32.totalorder %s514_s30, %s510_s23 }
  0x1b   : > { %p512_p12 = pnand %p511_p11, %p626_p5 }
  0x1c   : > { %p517_p2 = por %p516_p1, %p515_p0 }
  0x1d   : > { %446 = vmatmul.msk.bf16.vlgmr.msra.gmra.mxu0 %vm257_vm0, %v250_v7  ;;  %p513_p13 = pneg %p512_p12 }
  0x1f   : > { %p518_p3 = pnand %p517_p2, %p513_p13 }
  0x9a   : > { %v270_v8 = vpop.f32.mrf.mxu0 }
  0x9b   : > { %v274_v10 = vpack.c.bf16 %v270_v8, %v270_v8 }
  0x9d   : > { %v285_v11 = vsel %vm283_vm1, %v274_v10, 0 }
  0x9e   : > { %294 = vmatpush.bf16.msra.mxu1 %v285_v11 }
  0xa1   : > { %447 = vmatmul.msk.bf16.vlgmr.msra.gmra.mxu1 %vm279_vm2, %v248_v12 }
  0xa2   : > { %v272_v13 = vpop.f32.mrf.mxu0 }
 0x11e   : > { %v296_v15 = vpop.f32.mrf.mxu1 }
 0x11f   : > { %v297_v16 = vadd.f32 %v491_v14, %v296_v15 }
 0x121   : > { %v300_v17 = vmul.f32 %v297_v16, %v297_v16 }
 0x123   : > { %v302_v18 = vsel %vm301_vm3, %v300_v17, 0.0 }
 0x124   : > { %303 = vadd.xlane.f32.xlu0 %v302_v18 }
 0x126   : > { %v298_v19 = vpop.f32.mrf.mxu1 }
 0x197   : > { %v304_v20 = vpop.xlane.xlu0 %303 }
 0x198   : > { %v305_v21 = vmax.f32 %v304_v20, 1e-24 }
 0x19a   : > { %492 = vrsqrt.f32 %v305_v21  ;;  %vm312_vm5 = vweird.f32 %v305_v21 }
 0x1a0   : > { %v493_v22 = vpop.eup %492 }
 0x1a1   : > { %v307_v23 = vmul.f32 %v493_v22, %v305_v21  ;;  %vm313_vm4 = vweird.f32 %v493_v22 }
 0x1a2   : > { %vm314_vm6 = vmor %vm312_vm5, %vm313_vm4 }
 0x1a3   : > { %v308_v24 = vmul.f32 %v493_v22, %v307_v23 }
 0x1a5   : > { %v309_v25 = vmul.f32 0.5, %v308_v24 }
 0x1a7   : > { %v310_v26 = vsub.f32 1.5, %v309_v25 }
 0x1a9   : > { %v311_v27 = vmul.f32 %v493_v22, %v310_v26 }
 0x1ab   : > { %v315_v28 = vsel %vm314_vm6, %v493_v22, %v311_v27 }
 0x1ac   : > { %v316_v29 = vmul.f32 %v315_v28, %v297_v16 }
 0x1ae   : > { %317 = vst.msk [vmem:[%s229_s14] sm:$0xf] %vm301_vm3, %v316_v29  ;;  %v318_v30 = vsel %vm301_vm3, %v316_v29, -inf }
 0x1af   : > { %v319_v31 = vrot.slane %v318_v30, 4 }
 0x1b0   : > { %521 = shalt.err (!%p518_p3)
}
 0x1b1   : > { %452 = dma.vmem_to_hbm [thread:$0]  (%p626_p5), %s344_s15, 64, %s346_s16, %s328_s22   ;;  %v320_v32 = vmax.f32 %v318_v30, %v319_v31  ;;  %vm325_vm7 = vcmask 122880  }
 0x1b2   : > { %s245_s10 = scalar_lea.vmem %s706_s5, %s650_s13 }
 0x1b3   : > { %v321_v33 = vrot.slane %v320_v32, 2 }
 0x1b5   : > { %v322_v34 = vmax.f32 %v320_v32, %v321_v33 }
 0x1b7   : > { %v323_v35 = vrot.slane %v322_v34, 1 }
 0x1b9   : > { %v324_v36 = vmax.f32 %v322_v34, %v323_v35 }
 0x1bb   : > { %326 = vst.msk [vmem:[%s245_s10] sm:$0x1] %vm325_vm7, %v324_v36 }
 0x1bc PF: > { %p458_p4 = scmp.ge.s32.totalorder %s556_s21, 2  ;;  %s360_s11 = sand.u32 1, %s544_s18  }
 0x1bd   : > { %s361_s28 = scalar_lea.sflag [#allocation3], %s360_s11 }
 0x1be   : > { %p455_p7 = pnand %p458_p4, %p630_p6 }
 0x1c0   : > { %p456_p5 = pneg %p455_p7 }
 0x1c2   : > { %539 = dma.done.wait (%p456_p5), %s361_s28, 64  }
 0x1c3   : > { %541 = vsyncadd (%p456_p5), %s361_s28, 4294967232  ;;  %p16_p8 = scmp.ge.s32.totalorder %s613_s24, 4   ;;  %s709_s18 = smov %s548_s19 }
 0x1c4   : > { %s710_s19 = smov %s552_s20  ;;  %s711_s20 = smov %s624_s27 }
 0x1c5   : > { %s712_s21 = smov %s613_s24  ;;  %18 = sbr.rel (!%p16_p8) target bundleno = 3 (0x3), region = 86 }
 0x1ca   :  { %373 = vsyncpa [#allocation3], 1 }
 0x1cb   :  { %375 = vsyncpa [#allocation3 + $0x1], 1 }

</bundles_post_ra>
